<compile_context>
chip_gen: v7x
topology: tpu7x:2x2x1
jax: 0.10.0
libtpu: 0.0.40
codegen_flags: <defaults>
</compile_context>

<pallas_src>
import functools

import jax
import jax.numpy as jnp
from jax import lax
from jax.experimental import pallas as pl
from jax.experimental.pallas import tpu as pltpu

_LANE = 128            # lane width / gate padding multiple
_SUBLANE = 16          # bf16 sublane packing -> batch tiles are multiples of 16
_UNROLL = 8            # time-loop unroll factor (LLO visibility, no spill storm)


def _round_up(n, m):
    return ((n + m - 1) // m) * m


def _vmem_capacity_bytes():
    try:
        return int(pltpu.get_tpu_info().vmem_capacity_bytes)
    except Exception:                      # conservative fallback (v7x-sized)
        return 64 * 1024 * 1024


def _vmem_block_bytes(tt, bt, in_dim, hp, out_f, seq_out):
    """Approximate VMEM footprint of one grid cell (double-buffered blocks)."""
    g = 4 * hp
    total = 2 * tt * bt * in_dim * 2          # x chunk (bf16, double-buffered)
    total += 2 * in_dim * g * 2               # W_ih^T (bf16)
    total += 2 * hp * g * 2                   # W_hh^T (bf16)
    total += 2 * g * 4                        # combined bias (f32)
    total += 2 * 2 * bt * hp * 4              # h0 + c0 tiles (f32)
    if seq_out:
        total += 2 * tt * bt * hp * 2         # out chunk (bf16)
    else:
        total += 2 * (hp * out_f * 2 + out_f * 4)   # fused head weights
        total += bt * out_f * 4               # resident pred block
    total += bt * hp * (2 + 4)                # h (bf16) + c (f32) carries
    total += tt * bt * g * 2                  # hoisted x-projection (bf16)
    return total


def _tile_config(T, B, max_in_dim, hp, out_f):
    """Per-generation, VMEM-budget-aware (time-chunk, batch-tile) selection."""
    cap = _vmem_capacity_bytes()
    small_vmem = cap <= 80 * 1024 * 1024      # v7x-like: 64 MiB VMEM, 2 TCs
    tt_cap = 32 if small_vmem else 64
    bt_cap = 256                              # MXU row width (v6e/v7x)
    budget = int(cap * 0.55)                  # headroom for compiler scratch
    vmem_limit = int(cap * 0.80)

    b_pad0 = _round_up(B, _SUBLANE)
    bt = min(bt_cap, b_pad0)
    if small_vmem and b_pad0 >= 2 * _SUBLANE:
        # 2 TensorCores per chip: keep >=2 tiles on the "parallel" batch axis.
        bt = min(bt, _round_up((b_pad0 + 1) // 2, _SUBLANE))
    tt = max(1, min(tt_cap, T))

    def fits(tt_, bt_):
        worst = max(_vmem_block_bytes(tt_, bt_, max_in_dim, hp, out_f, True),
                    _vmem_block_bytes(tt_, bt_, max_in_dim, hp, out_f, False))
        return worst <= budget

    while not fits(tt, bt) and (tt > 8 or bt > _SUBLANE):
        if tt > 8:
            tt = max(8, tt // 2)
        else:
            bt = max(_SUBLANE, bt - _SUBLANE)

    return dict(tt=tt, bt=bt,
                t_pad=_round_up(T, tt), b_pad=_round_up(B, bt),
                vmem_limit=vmem_limit)


def _cost(t, b, in_dim, hp, out_f, seq_out):
    flops = 2 * t * b * (in_dim + hp) * 4 * hp
    transcendentals = 5 * t * b * hp
    bytes_accessed = (t * b * in_dim * 2 + 2 * b * hp * 4
                      + (in_dim + hp) * 4 * hp * 2 + 4 * hp * 4)
    if seq_out:
        bytes_accessed += t * b * hp * 2
    else:
        flops += 2 * b * hp * out_f
        bytes_accessed += b * out_f * 4 + hp * out_f * 2 + out_f * 4
    return pl.CostEstimate(flops=int(flops),
                           transcendentals=int(transcendentals),
                           bytes_accessed=int(bytes_accessed))


def _lstm_chunk(x_ref, wih_ref, whh_ref, b_ref, h0_ref, c0_ref,
                h_sc, c_sc, xp_sc, out_ref, *, seq_len, mask_tail, unroll):
    """Recurrence over one (batch-tile, time-chunk) grid cell.

    x_ref:   (tt, bt, in)   bf16 time-major input chunk
    wih_ref: (in, 4Hp)      bf16 (gate-padded W_ih^T)
    whh_ref: (Hp, 4Hp)      bf16 (gate/row-padded W_hh^T)
    b_ref:   (1, 4Hp)       f32  (gate-padded b_ih + b_hh)
    h0/c0:   (bt, Hp)       f32  initial state for this batch tile
    h_sc:    (bt, Hp)       bf16 hidden carry across time chunks
    c_sc:    (bt, Hp)       f32  cell carry across time chunks
    xp_sc:   (tt, bt, 4Hp)  bf16 hoisted input projection for this chunk
    out_ref: (tt, bt, Hp)   bf16 per-step hidden states, or None (last layer)
    NOTE: correctness of the h/c scratch carry requires the time axis to be
    the innermost, sequentially-executed ("arbitrary") grid axis.
    """
    tt, bt, in_dim = x_ref.shape
    hp = h_sc.shape[-1]

    # First time chunk of this batch tile: load the initial state.
    @pl.when(pl.program_id(1) == 0)
    def _():
        h_sc[...] = h0_ref[...].astype(h_sc.dtype)
        c_sc[...] = c0_ref[...]

    # Loop-invariant recurrent weight, hoisted out of the time loop.
    whh = whh_ref[...]

    # Hoisted off the serial path: input projection + bias for the whole chunk
    # as a single (tt*bt, in) x (in, 4Hp) MXU matmul (bf16 in, f32 accumulate).
    x2d = x_ref[...].reshape(tt * bt, in_dim).astype(jnp.bfloat16)
    xp = jnp.dot(x2d, wih_ref[...], preferred_element_type=jnp.float32)
    xp = xp + b_ref[...]
    xp_sc[...] = xp.reshape(tt, bt, 4 * hp).astype(xp_sc.dtype)

    t0 = pl.program_id(1) * tt

    def step(t, carry):
        h_t = h_sc[...]                                   # (bt, Hp) bf16
        c_t = c_sc[...]                                   # (bt, Hp) f32
        gates = xp_sc[t].astype(jnp.float32) + jnp.dot(
            h_t, whh, preferred_element_type=jnp.float32)
        # Hp is a multiple of 128 -> whole-lane-block slices (no XLU tax).
        i_g = jax.nn.sigmoid(gates[:, 0 * hp:1 * hp])
        f_g = jax.nn.sigmoid(gates[:, 1 * hp:2 * hp])
        g_g = jnp.tanh(gates[:, 2 * hp:3 * hp])
        o_g = jax.nn.sigmoid(gates[:, 3 * hp:4 * hp])
        c_new = f_g * c_t + i_g * g_g
        h_new = (o_g * jnp.tanh(c_new)).astype(h_sc.dtype)
        if mask_tail:
            valid = (t0 + t) < seq_len                    # freeze state on pad
            h_new = jnp.where(valid, h_new, h_t)
            c_new = jnp.where(valid, c_new, c_t)
        h_sc[...] = h_new
        c_sc[...] = c_new
        if out_ref is not None:
            out_ref[t] = h_new.astype(out_ref.dtype)
        return carry

    # h/c live in VMEM (3 vld / cycle makes the per-step reload cheap) so bt
    # can track the MXU row width without a vreg spill storm.
    lax.fori_loop(0, tt, step, 0, unroll=unroll)


def _seq_kernel(x_ref, wih_ref, whh_ref, b_ref, h0_ref, c0_ref,
                out_ref, h_sc, c_sc, xp_sc, *, seq_len, mask_tail, unroll):
    _lstm_chunk(x_ref, wih_ref, whh_ref, b_ref, h0_ref, c0_ref,
                h_sc, c_sc, xp_sc, out_ref,
                seq_len=seq_len, mask_tail=mask_tail, unroll=unroll)


def _last_kernel(x_ref, wih_ref, whh_ref, b_ref, h0_ref, c0_ref,
                 wlin_ref, blin_ref, pred_ref, h_sc, c_sc, xp_sc,
                 *, seq_len, mask_tail, unroll):
    _lstm_chunk(x_ref, wih_ref, whh_ref, b_ref, h0_ref, c0_ref,
                h_sc, c_sc, xp_sc, None,
                seq_len=seq_len, mask_tail=mask_tail, unroll=unroll)

    # Fused nn.Linear epilogue: pred = linear(output)[:, -1, :] only needs the
    # final hidden state, so the last layer never writes its (T,B,H) sequence.
    # The pred block is resident (same (b,0) index for all time chunks) and is
    # written exactly once, at the last chunk.
    @pl.when(pl.program_id(1) == pl.num_programs(1) - 1)
    def _():
        pred_ref[...] = (jnp.dot(h_sc[...], wlin_ref[...],
                                 preferred_element_type=jnp.float32)
                         + blin_ref[...]).astype(pred_ref.dtype)


def _in_specs(tt, bt, in_dim, hp):
    return [
        pl.BlockSpec((tt, bt, in_dim), lambda b, t: (t, b, 0)),   # x chunk
        pl.BlockSpec((in_dim, 4 * hp), lambda b, t: (0, 0)),      # W_ih^T
        pl.BlockSpec((hp, 4 * hp), lambda b, t: (0, 0)),          # W_hh^T
        pl.BlockSpec((1, 4 * hp), lambda b, t: (0, 0)),           # bias
        pl.BlockSpec((bt, hp), lambda b, t: (b, 0)),              # h0 tile
        pl.BlockSpec((bt, hp), lambda b, t: (b, 0)),              # c0 tile
    ]


def _scratch(tt, bt, hp):
    return [pltpu.VMEM((bt, hp), jnp.bfloat16),           # h carry
            pltpu.VMEM((bt, hp), jnp.float32),             # c carry
            pltpu.VMEM((tt, bt, 4 * hp), jnp.bfloat16)]    # hoisted x-projection


def _compiler_params(vmem_limit):
    # batch axis "parallel" (megacore shardable), time axis "arbitrary"
    # (sequential) -- the scratch carry depends on this ordering.
    return pltpu.CompilerParams(
        dimension_semantics=("parallel", "arbitrary"),
        vmem_limit_bytes=vmem_limit)


def _lstm_seq_layer(x, wih_t, whh_t, bias, h0, c0, seq_len, cfg):
    """One LSTM layer returning the full (T_pad, B_pad, Hp) bf16 hidden seq."""
    t_pad, b_pad, in_dim = x.shape
    hp = h0.shape[-1]
    tt, bt = cfg["tt"], cfg["bt"]
    kern = functools.partial(_seq_kernel, seq_len=seq_len,
                             mask_tail=(t_pad != seq_len),
                             unroll=min(tt, _UNROLL))
    return pl.pallas_call(
        kern,
        out_shape=jax.ShapeDtypeStruct((t_pad, b_pad, hp), jnp.bfloat16),
        grid=(b_pad // bt, t_pad // tt),
        in_specs=_in_specs(tt, bt, in_dim, hp),
        out_specs=pl.BlockSpec((tt, bt, hp), lambda b, t: (t, b, 0)),
        scratch_shapes=_scratch(tt, bt, hp),
        compiler_params=_compiler_params(cfg["vmem_limit"]),
        cost_estimate=_cost(t_pad, b_pad, in_dim, hp, hp, True),
    )(x, wih_t, whh_t, bias, h0, c0)


def _lstm_last_layer(x, wih_t, whh_t, bias, h0, c0, wlin_t, blin, seq_len, cfg):
    """Last LSTM layer fused with the nn.Linear head; returns (B_pad, O) f32."""
    t_pad, b_pad, in_dim = x.shape
    hp = h0.shape[-1]
    out_f = wlin_t.shape[-1]
    tt, bt = cfg["tt"], cfg["bt"]
    kern = functools.partial(_last_kernel, seq_len=seq_len,
                             mask_tail=(t_pad != seq_len),
                             unroll=min(tt, _UNROLL))
    in_specs = _in_specs(tt, bt, in_dim, hp) + [
        pl.BlockSpec((hp, out_f), lambda b, t: (0, 0)),           # W_lin^T
        pl.BlockSpec((1, out_f), lambda b, t: (0, 0)),            # b_lin
    ]
    return pl.pallas_call(
        kern,
        out_shape=jax.ShapeDtypeStruct((b_pad, out_f), jnp.float32),
        grid=(b_pad // bt, t_pad // tt),
        in_specs=in_specs,
        out_specs=pl.BlockSpec((bt, out_f), lambda b, t: (b, 0)),
        scratch_shapes=_scratch(tt, bt, hp),
        compiler_params=_compiler_params(cfg["vmem_limit"]),
        cost_estimate=_cost(t_pad, b_pad, in_dim, hp, out_f, False),
    )(x, wih_t, whh_t, bias, h0, c0, wlin_t, blin)


def _pad_gate_cols(w_t, h, hp):
    """Pad the last (4H) axis per gate to 4*Hp so gate slices are 128-aligned."""
    lead = w_t.shape[:-1]
    w = w_t.reshape(*lead, 4, h)
    w = jnp.pad(w, [(0, 0)] * len(lead) + [(0, 0), (0, hp - h)])
    return w.reshape(*lead, 4 * hp)


def prepare_params(params):
    """One-time preprocessing: transpose to matmul layout, combine biases,
    pad gates / hidden dim to 128-lane multiples, cast MXU operands to bf16."""
    lstm_raw = params["lstm"]
    h = lstm_raw[0][1].shape[-1]                      # W_hh is (4H, H)
    hp = _round_up(h, _LANE)
    lstm = []
    for layer, (wih, whh, b_ih, b_hh) in enumerate(lstm_raw):
        in_dim = wih.shape[1]
        # layer>0 consumes the padded hidden state, so pad its input rows too.
        in_pad = hp if layer > 0 else in_dim
        wih_t = _pad_gate_cols(jnp.transpose(wih), h, hp)           # (in, 4Hp)
        wih_t = jnp.pad(wih_t, ((0, in_pad - in_dim), (0, 0)))
        whh_t = _pad_gate_cols(jnp.transpose(whh), h, hp)           # (H, 4Hp)
        whh_t = jnp.pad(whh_t, ((0, hp - h), (0, 0)))               # (Hp, 4Hp)
        bias = _pad_gate_cols((b_ih + b_hh).reshape(1, -1), h, hp)  # (1, 4Hp)
        lstm.append((wih_t.astype(jnp.bfloat16),
                     whh_t.astype(jnp.bfloat16),
                     bias.astype(jnp.float32)))
    w_lin, b_lin = params["linear"]
    wlin_t = jnp.pad(jnp.transpose(w_lin), ((0, hp - h), (0, 0)))   # (Hp, O)
    return {"lstm": tuple(lstm),
            "linear": (wlin_t.astype(jnp.bfloat16),
                       b_lin.reshape(1, -1).astype(jnp.float32))}


@jax.jit
def lstm_forward(input_seq, prepared, h_0, c_0):
    """Mirrors LSTM.forward: multi-layer LSTM -> Linear -> last time step."""
    B, T, _ = input_seq.shape
    H = h_0.shape[-1]
    lstm_params = prepared["lstm"]
    w_lin, b_lin = prepared["linear"]
    hp = lstm_params[0][1].shape[0]                   # W_hh^T is (Hp, 4Hp)
    in0 = lstm_params[0][0].shape[0]
    out_f = w_lin.shape[-1]
    n_layers = len(lstm_params)

    cfg = _tile_config(T, B, max(in0, hp), hp, out_f)
    t_pad, b_pad = cfg["t_pad"], cfg["b_pad"]

    # First-layer input: time-major, padded, bf16.  Only this (B,T,I) tensor
    # pays the XLA transpose; all inter-layer activations are produced
    # time-major bf16 directly by the kernels.
    x = jnp.transpose(input_seq, (1, 0, 2)).astype(jnp.bfloat16)
    x = jnp.pad(x, ((0, t_pad - T), (0, b_pad - B), (0, 0)))

    h0p = jnp.pad(h_0.astype(jnp.float32),
                  ((0, 0), (0, b_pad - B), (0, hp - H)))
    c0p = jnp.pad(c_0.astype(jnp.float32),
                  ((0, 0), (0, b_pad - B), (0, hp - H)))

    # Structural follow-up (not done here): fuse the whole layer stack into a
    # single kernel that pushes each time chunk through all layers to avoid
    # the per-layer (T,B,H) HBM round trips for deep stacks.
    pred = None
    for layer, (wih_t, whh_t, bias) in enumerate(lstm_params):
        if layer == n_layers - 1:
            pred = _lstm_last_layer(x, wih_t, whh_t, bias, h0p[layer],
                                    c0p[layer], w_lin, b_lin, T, cfg)
        else:
            x = _lstm_seq_layer(x, wih_t, whh_t, bias, h0p[layer],
                                c0p[layer], T, cfg)
    return pred[:B]


def init_params(key, input_size, hidden_size, num_layers, output_size):
    """Deterministic uniform(-1/sqrt(H), 1/sqrt(H)) init like PyTorch."""
    bound = 1.0 / jnp.sqrt(hidden_size)
    lstm_params = []
    for layer in range(num_layers):
        in_sz = input_size if layer == 0 else hidden_size
        key, k1, k2, k3, k4 = jax.random.split(key, 5)
        wih = jax.random.uniform(k1, (4 * hidden_size, in_sz),
                                 minval=-bound, maxval=bound)
        whh = jax.random.uniform(k2, (4 * hidden_size, hidden_size),
                                 minval=-bound, maxval=bound)
        b_ih = jax.random.uniform(k3, (4 * hidden_size,),
                                  minval=-bound, maxval=bound)
        b_hh = jax.random.uniform(k4, (4 * hidden_size,),
                                  minval=-bound, maxval=bound)
        lstm_params.append((wih, whh, b_ih, b_hh))
    key, k5, k6 = jax.random.split(key, 3)
    w_lin = jax.random.uniform(k5, (output_size, hidden_size),
                               minval=-bound, maxval=bound)
    b_lin = jax.random.uniform(k6, (output_size,),
                               minval=-bound, maxval=bound)
    return {"lstm": lstm_params, "linear": (w_lin, b_lin)}, key


def reference_forward(input_seq, params, h_0, c_0):
    """Pure-JAX f32 reference for correctness checking."""
    x = input_seq.astype(jnp.float32)
    H = h_0.shape[-1]
    for layer, (wih, whh, b_ih, b_hh) in enumerate(params["lstm"]):
        h, c = h_0[layer], c_0[layer]
        outs = []
        for t in range(x.shape[1]):
            gates = x[:, t, :] @ wih.T + h @ whh.T + b_ih + b_hh
            i = jax.nn.sigmoid(gates[:, 0 * H:1 * H])
            f = jax.nn.sigmoid(gates[:, 1 * H:2 * H])
            g = jnp.tanh(gates[:, 2 * H:3 * H])
            o = jax.nn.sigmoid(gates[:, 3 * H:4 * H])
            c = f * c + i * g
            h = o * jnp.tanh(c)
            outs.append(h)
        x = jnp.stack(outs, axis=1)
    w_lin, b_lin = params["linear"]
    return x[:, -1, :] @ w_lin.T + b_lin


if __name__ == "__main__":
    batch_size = 2
    seq_len = 8
    input_size = 4
    hidden_size = 32
    num_layers = 2
    output_size = 4

    key = jax.random.PRNGKey(0)
    params, key = init_params(key, input_size, hidden_size, num_layers,
                              output_size)
    prepared = prepare_params(params)

    key, kx, kh, kc = jax.random.split(key, 4)
    input_seq = jax.random.normal(kx, (batch_size, seq_len, input_size),
                                  dtype=jnp.float32)
    # The PyTorch forward draws random h_0 / c_0 each call; keep deterministic.
    h_0 = jax.random.normal(kh, (num_layers, batch_size, hidden_size),
                            dtype=jnp.float32)
    c_0 = jax.random.normal(kc, (num_layers, batch_size, hidden_size),
                            dtype=jnp.float32)

    pred = lstm_forward(input_seq, prepared, h_0, c_0)
    pred = jax.block_until_ready(pred)

    ref = reference_forward(input_seq, params, h_0, c_0)
    assert pred.shape == (batch_size, output_size)
    # Tolerance vs the f32 reference: x / xp / h / inter-layer activations are
    # bf16 (f32 cell state + f32 MXU accumulation); observed error O(1e-2).
    assert jnp.allclose(pred, ref, atol=5e-2, rtol=5e-2)

    print("KERNEL_OK")
</pallas_src>

<mosaic_0001>
module attributes {stable_mosaic.version = 11 : i64} {
  func.func @_last_kernel(%arg0: i32, %arg1: i32, %arg2: memref<8x16x128xbf16, #tpu.memory_space<vmem>>, %arg3: memref<128x512xbf16, #tpu.memory_space<vmem>>, %arg4: memref<128x512xbf16, #tpu.memory_space<vmem>>, %arg5: memref<1x512xf32, #tpu.memory_space<vmem>>, %arg6: memref<16x128xf32, #tpu.memory_space<vmem>>, %arg7: memref<16x128xf32, #tpu.memory_space<vmem>>, %arg8: memref<128x4xbf16, #tpu.memory_space<vmem>>, %arg9: memref<1x4xf32, #tpu.memory_space<vmem>>, %arg10: memref<16x4xf32, #tpu.memory_space<vmem>>, %arg11: memref<16x128xbf16, #tpu.memory_space<vmem>>, %arg12: memref<16x128xf32, #tpu.memory_space<vmem>>, %arg13: memref<8x16x512xbf16, #tpu.memory_space<vmem>>) attributes {dimension_semantics = [#tpu.dimension_semantics<parallel>, #tpu.dimension_semantics<arbitrary>], iteration_bounds = array<i64: 1, 1>, scalar_prefetch = 0 : i64, scratch_operands = 3 : i64, tpu.core_type = #tpu.core_type<tc>, window_params = [{transform_indices = @transform_0, window_bounds = array<i64: 8, 16, 128>}, {pipeline_mode = #tpu.pipeline_mode<synchronous>, transform_indices = @transform_1, window_bounds = array<i64: 128, 512>}, {pipeline_mode = #tpu.pipeline_mode<synchronous>, transform_indices = @transform_2, window_bounds = array<i64: 128, 512>}, {pipeline_mode = #tpu.pipeline_mode<synchronous>, transform_indices = @transform_3, window_bounds = array<i64: 1, 512>}, {transform_indices = @transform_4, window_bounds = array<i64: 16, 128>}, {transform_indices = @transform_5, window_bounds = array<i64: 16, 128>}, {pipeline_mode = #tpu.pipeline_mode<synchronous>, transform_indices = @transform_6, window_bounds = array<i64: 128, 4>}, {pipeline_mode = #tpu.pipeline_mode<synchronous>, transform_indices = @transform_7, window_bounds = array<i64: 1, 4>}, {transform_indices = @transform_8, window_bounds = array<i64: 16, 4>}]} {
    %c0_i32 = arith.constant 0 : i32
    %0 = arith.cmpi eq, %arg1, %c0_i32 : i32
    %1 = arith.extui %0 : i1 to i32
    %c0_i32_0 = arith.constant 0 : i32
    %2 = arith.cmpi ne, %1, %c0_i32_0 : i32
    scf.if %2 {
      %c0_127 = arith.constant 0 : index
      %c0_128 = arith.constant 0 : index
      %305 = vector.load %arg6[%c0_127, %c0_128] : memref<16x128xf32, #tpu.memory_space<vmem>>, vector<16x128xf32>
      %306 = arith.truncf %305 : vector<16x128xf32> to vector<16x128xbf16>
      %c0_129 = arith.constant 0 : index
      %c0_130 = arith.constant 0 : index
      %307 = vector.load %arg11[%c0_129, %c0_130] : memref<16x128xbf16, #tpu.memory_space<vmem>>, vector<16x128xbf16>
      tpu.vector_store %arg11[%c0_129, %c0_130], %306 {strides = array<i32>} : memref<16x128xbf16, #tpu.memory_space<vmem>>, vector<16x128xbf16>,
      %c0_131 = arith.constant 0 : index
      %c0_132 = arith.constant 0 : index
      %308 = vector.load %arg7[%c0_131, %c0_132] : memref<16x128xf32, #tpu.memory_space<vmem>>, vector<16x128xf32>
      %c0_133 = arith.constant 0 : index
      %c0_134 = arith.constant 0 : index
      %309 = vector.load %arg12[%c0_133, %c0_134] : memref<16x128xf32, #tpu.memory_space<vmem>>, vector<16x128xf32>
      tpu.vector_store %arg12[%c0_133, %c0_134], %308 {strides = array<i32>} : memref<16x128xf32, #tpu.memory_space<vmem>>, vector<16x128xf32>,
    } else {
    }
    %c0 = arith.constant 0 : index
    %c0_1 = arith.constant 0 : index
    %3 = vector.load %arg4[%c0, %c0_1] : memref<128x512xbf16, #tpu.memory_space<vmem>>, vector<128x512xbf16>
    %c0_2 = arith.constant 0 : index
    %c0_3 = arith.constant 0 : index
    %c0_4 = arith.constant 0 : index
    %4 = vector.load %arg2[%c0_2, %c0_3, %c0_4] : memref<8x16x128xbf16, #tpu.memory_space<vmem>>, vector<8x16x128xbf16>
    %5 = vector.shape_cast %4 : vector<8x16x128xbf16> to vector<128x128xbf16>
    %c0_5 = arith.constant 0 : index
    %c0_6 = arith.constant 0 : index
    %6 = vector.load %arg3[%c0_5, %c0_6] : memref<128x512xbf16, #tpu.memory_space<vmem>>, vector<128x512xbf16>
    %cst = arith.constant dense<0.000000e+00> : vector<128x512xf32>
    %7 = tpu.matmul %5, %6, %cst {dimension_numbers = #tpu.dot_dimension_numbers<[1], [0], [0], [1], [0, 0, 1, 1], [], []>} : vector<128x128xbf16>, vector<128x512xbf16>, vector<128x512xf32> -> vector<128x512xf32>
    %c0_7 = arith.constant 0 : index
    %c0_8 = arith.constant 0 : index
    %8 = vector.load %arg5[%c0_7, %c0_8] : memref<1x512xf32, #tpu.memory_space<vmem>>, vector<1x512xf32>
    %9 = vector.broadcast %8 : vector<1x512xf32> to vector<128x512xf32>
    %10 = arith.addf %7, %9 : vector<128x512xf32>
    %11 = vector.shape_cast %10 : vector<128x512xf32> to vector<8x16x512xf32>
    %12 = arith.truncf %11 : vector<8x16x512xf32> to vector<8x16x512xbf16>
    %c0_9 = arith.constant 0 : index
    %c0_10 = arith.constant 0 : index
    %c0_11 = arith.constant 0 : index
    %13 = vector.load %arg13[%c0_9, %c0_10, %c0_11] : memref<8x16x512xbf16, #tpu.memory_space<vmem>>, vector<8x16x512xbf16>
    tpu.vector_store %arg13[%c0_9, %c0_10, %c0_11], %12 {strides = array<i32>} : memref<8x16x512xbf16, #tpu.memory_space<vmem>>, vector<8x16x512xbf16>,
    %c0_i32_12 = arith.constant 0 : i32
    %c0_13 = arith.constant 0 : index
    %c0_14 = arith.constant 0 : index
    %14 = vector.load %arg11[%c0_13, %c0_14] : memref<16x128xbf16, #tpu.memory_space<vmem>>, vector<16x128xbf16>
    %c0_15 = arith.constant 0 : index
    %c0_16 = arith.constant 0 : index
    %15 = vector.load %arg12[%c0_15, %c0_16] : memref<16x128xf32, #tpu.memory_space<vmem>>, vector<16x128xf32>
    %16 = arith.index_cast %c0_i32_12 : i32 to index
    %c0_17 = arith.constant 0 : index
    %c0_18 = arith.constant 0 : index
    %17 = vector.load %arg13[%16, %c0_17, %c0_18] : memref<8x16x512xbf16, #tpu.memory_space<vmem>>, vector<1x16x512xbf16>
    %18 = vector.shape_cast %17 : vector<1x16x512xbf16> to vector<16x512xbf16>
    %19 = arith.extf %18 : vector<16x512xbf16> to vector<16x512xf32>
    %cst_19 = arith.constant dense<0.000000e+00> : vector<16x512xf32>
    %20 = tpu.matmul %14, %3, %cst_19 {dimension_numbers = #tpu.dot_dimension_numbers<[1], [0], [0], [1], [0, 0, 1, 1], [], []>} : vector<16x128xbf16>, vector<128x512xbf16>, vector<16x512xf32> -> vector<16x512xf32>
    %21 = arith.addf %19, %20 : vector<16x512xf32>
    %22 = vector.extract_strided_slice %21 {offsets = [0, 0], sizes = [16, 128], strides = [1, 1]} : vector<16x512xf32> to vector<16x128xf32>
    %23 = arith.negf %22 : vector<16x128xf32>
    %24 = math.exp %23 : vector<16x128xf32>
    %cst_20 = arith.constant 1.000000e+00 : f32
    %25 = vector.broadcast %cst_20 : f32 to vector<16x128xf32>
    %26 = arith.addf %25, %24 : vector<16x128xf32>
    %27 = arith.divf %25, %26 : vector<16x128xf32>
    %28 = vector.extract_strided_slice %21 {offsets = [0, 128], sizes = [16, 128], strides = [1, 1]} : vector<16x512xf32> to vector<16x128xf32>
    %29 = arith.negf %28 : vector<16x128xf32>
    %30 = math.exp %29 : vector<16x128xf32>
    %cst_21 = arith.constant 1.000000e+00 : f32
    %31 = vector.broadcast %cst_21 : f32 to vector<16x128xf32>
    %32 = arith.addf %31, %30 : vector<16x128xf32>
    %33 = arith.divf %31, %32 : vector<16x128xf32>
    %34 = vector.extract_strided_slice %21 {offsets = [0, 256], sizes = [16, 128], strides = [1, 1]} : vector<16x512xf32> to vector<16x128xf32>
    %35 = math.tanh %34 : vector<16x128xf32>
    %36 = vector.extract_strided_slice %21 {offsets = [0, 384], sizes = [16, 128], strides = [1, 1]} : vector<16x512xf32> to vector<16x128xf32>
    %37 = arith.negf %36 : vector<16x128xf32>
    %38 = math.exp %37 : vector<16x128xf32>
    %cst_22 = arith.constant 1.000000e+00 : f32
    %39 = vector.broadcast %cst_22 : f32 to vector<16x128xf32>
    %40 = arith.addf %39, %38 : vector<16x128xf32>
    %41 = arith.divf %39, %40 : vector<16x128xf32>
    %42 = arith.mulf %33, %15 : vector<16x128xf32>
    %43 = arith.mulf %27, %35 : vector<16x128xf32>
    %44 = arith.addf %42, %43 : vector<16x128xf32>
    %45 = math.tanh %44 : vector<16x128xf32>
    %46 = arith.mulf %41, %45 : vector<16x128xf32>
    %47 = arith.truncf %46 : vector<16x128xf32> to vector<16x128xbf16>
    %c0_23 = arith.constant 0 : index
    %c0_24 = arith.constant 0 : index
    %48 = vector.load %arg11[%c0_23, %c0_24] : memref<16x128xbf16, #tpu.memory_space<vmem>>, vector<16x128xbf16>
    tpu.vector_store %arg11[%c0_23, %c0_24], %47 {strides = array<i32>} : memref<16x128xbf16, #tpu.memory_space<vmem>>, vector<16x128xbf16>,
    %c0_25 = arith.constant 0 : index
    %c0_26 = arith.constant 0 : index
    %49 = vector.load %arg12[%c0_25, %c0_26] : memref<16x128xf32, #tpu.memory_space<vmem>>, vector<16x128xf32>
    tpu.vector_store %arg12[%c0_25, %c0_26], %44 {strides = array<i32>} : memref<16x128xf32, #tpu.memory_space<vmem>>, vector<16x128xf32>,
    %c1_i32 = arith.constant 1 : i32
    %c0_27 = arith.constant 0 : index
    %c0_28 = arith.constant 0 : index
    %50 = vector.load %arg11[%c0_27, %c0_28] : memref<16x128xbf16, #tpu.memory_space<vmem>>, vector<16x128xbf16>
    %c0_29 = arith.constant 0 : index
    %c0_30 = arith.constant 0 : index
    %51 = vector.load %arg12[%c0_29, %c0_30] : memref<16x128xf32, #tpu.memory_space<vmem>>, vector<16x128xf32>
    %52 = arith.index_cast %c1_i32 : i32 to index
    %c0_31 = arith.constant 0 : index
    %c0_32 = arith.constant 0 : index
    %53 = vector.load %arg13[%52, %c0_31, %c0_32] : memref<8x16x512xbf16, #tpu.memory_space<vmem>>, vector<1x16x512xbf16>
    %54 = vector.shape_cast %53 : vector<1x16x512xbf16> to vector<16x512xbf16>
    %55 = arith.extf %54 : vector<16x512xbf16> to vector<16x512xf32>
    %cst_33 = arith.constant dense<0.000000e+00> : vector<16x512xf32>
    %56 = tpu.matmul %50, %3, %cst_33 {dimension_numbers = #tpu.dot_dimension_numbers<[1], [0], [0], [1], [0, 0, 1, 1], [], []>} : vector<16x128xbf16>, vector<128x512xbf16>, vector<16x512xf32> -> vector<16x512xf32>
    %57 = arith.addf %55, %56 : vector<16x512xf32>
    %58 = vector.extract_strided_slice %57 {offsets = [0, 0], sizes = [16, 128], strides = [1, 1]} : vector<16x512xf32> to vector<16x128xf32>
    %59 = arith.negf %58 : vector<16x128xf32>
    %60 = math.exp %59 : vector<16x128xf32>
    %cst_34 = arith.constant 1.000000e+00 : f32
    %61 = vector.broadcast %cst_34 : f32 to vector<16x128xf32>
    %62 = arith.addf %61, %60 : vector<16x128xf32>
    %63 = arith.divf %61, %62 : vector<16x128xf32>
    %64 = vector.extract_strided_slice %57 {offsets = [0, 128], sizes = [16, 128], strides = [1, 1]} : vector<16x512xf32> to vector<16x128xf32>
    %65 = arith.negf %64 : vector<16x128xf32>
    %66 = math.exp %65 : vector<16x128xf32>
    %cst_35 = arith.constant 1.000000e+00 : f32
    %67 = vector.broadcast %cst_35 : f32 to vector<16x128xf32>
    %68 = arith.addf %67, %66 : vector<16x128xf32>
    %69 = arith.divf %67, %68 : vector<16x128xf32>
    %70 = vector.extract_strided_slice %57 {offsets = [0, 256], sizes = [16, 128], strides = [1, 1]} : vector<16x512xf32> to vector<16x128xf32>
    %71 = math.tanh %70 : vector<16x128xf32>
    %72 = vector.extract_strided_slice %57 {offsets = [0, 384], sizes = [16, 128], strides = [1, 1]} : vector<16x512xf32> to vector<16x128xf32>
    %73 = arith.negf %72 : vector<16x128xf32>
    %74 = math.exp %73 : vector<16x128xf32>
    %cst_36 = arith.constant 1.000000e+00 : f32
    %75 = vector.broadcast %cst_36 : f32 to vector<16x128xf32>
    %76 = arith.addf %75, %74 : vector<16x128xf32>
    %77 = arith.divf %75, %76 : vector<16x128xf32>
    %78 = arith.mulf %69, %51 : vector<16x128xf32>
    %79 = arith.mulf %63, %71 : vector<16x128xf32>
    %80 = arith.addf %78, %79 : vector<16x128xf32>
    %81 = math.tanh %80 : vector<16x128xf32>
    %82 = arith.mulf %77, %81 : vector<16x128xf32>
    %83 = arith.truncf %82 : vector<16x128xf32> to vector<16x128xbf16>
    %c0_37 = arith.constant 0 : index
    %c0_38 = arith.constant 0 : index
    %84 = vector.load %arg11[%c0_37, %c0_38] : memref<16x128xbf16, #tpu.memory_space<vmem>>, vector<16x128xbf16>
    tpu.vector_store %arg11[%c0_37, %c0_38], %83 {strides = array<i32>} : memref<16x128xbf16, #tpu.memory_space<vmem>>, vector<16x128xbf16>,
    %c0_39 = arith.constant 0 : index
    %c0_40 = arith.constant 0 : index
    %85 = vector.load %arg12[%c0_39, %c0_40] : memref<16x128xf32, #tpu.memory_space<vmem>>, vector<16x128xf32>
    tpu.vector_store %arg12[%c0_39, %c0_40], %80 {strides = array<i32>} : memref<16x128xf32, #tpu.memory_space<vmem>>, vector<16x128xf32>,
    %c2_i32 = arith.constant 2 : i32
    %c0_41 = arith.constant 0 : index
    %c0_42 = arith.constant 0 : index
    %86 = vector.load %arg11[%c0_41, %c0_42] : memref<16x128xbf16, #tpu.memory_space<vmem>>, vector<16x128xbf16>
    %c0_43 = arith.constant 0 : index
    %c0_44 = arith.constant 0 : index
    %87 = vector.load %arg12[%c0_43, %c0_44] : memref<16x128xf32, #tpu.memory_space<vmem>>, vector<16x128xf32>
    %88 = arith.index_cast %c2_i32 : i32 to index
    %c0_45 = arith.constant 0 : index
    %c0_46 = arith.constant 0 : index
    %89 = vector.load %arg13[%88, %c0_45, %c0_46] : memref<8x16x512xbf16, #tpu.memory_space<vmem>>, vector<1x16x512xbf16>
    %90 = vector.shape_cast %89 : vector<1x16x512xbf16> to vector<16x512xbf16>
    %91 = arith.extf %90 : vector<16x512xbf16> to vector<16x512xf32>
    %cst_47 = arith.constant dense<0.000000e+00> : vector<16x512xf32>
    %92 = tpu.matmul %86, %3, %cst_47 {dimension_numbers = #tpu.dot_dimension_numbers<[1], [0], [0], [1], [0, 0, 1, 1], [], []>} : vector<16x128xbf16>, vector<128x512xbf16>, vector<16x512xf32> -> vector<16x512xf32>
    %93 = arith.addf %91, %92 : vector<16x512xf32>
    %94 = vector.extract_strided_slice %93 {offsets = [0, 0], sizes = [16, 128], strides = [1, 1]} : vector<16x512xf32> to vector<16x128xf32>
    %95 = arith.negf %94 : vector<16x128xf32>
    %96 = math.exp %95 : vector<16x128xf32>
    %cst_48 = arith.constant 1.000000e+00 : f32
    %97 = vector.broadcast %cst_48 : f32 to vector<16x128xf32>
    %98 = arith.addf %97, %96 : vector<16x128xf32>
    %99 = arith.divf %97, %98 : vector<16x128xf32>
    %100 = vector.extract_strided_slice %93 {offsets = [0, 128], sizes = [16, 128], strides = [1, 1]} : vector<16x512xf32> to vector<16x128xf32>
    %101 = arith.negf %100 : vector<16x128xf32>
    %102 = math.exp %101 : vector<16x128xf32>
    %cst_49 = arith.constant 1.000000e+00 : f32
    %103 = vector.broadcast %cst_49 : f32 to vector<16x128xf32>
    %104 = arith.addf %103, %102 : vector<16x128xf32>
    %105 = arith.divf %103, %104 : vector<16x128xf32>
    %106 = vector.extract_strided_slice %93 {offsets = [0, 256], sizes = [16, 128], strides = [1, 1]} : vector<16x512xf32> to vector<16x128xf32>
    %107 = math.tanh %106 : vector<16x128xf32>
    %108 = vector.extract_strided_slice %93 {offsets = [0, 384], sizes = [16, 128], strides = [1, 1]} : vector<16x512xf32> to vector<16x128xf32>
    %109 = arith.negf %108 : vector<16x128xf32>
    %110 = math.exp %109 : vector<16x128xf32>
    %cst_50 = arith.constant 1.000000e+00 : f32
    %111 = vector.broadcast %cst_50 : f32 to vector<16x128xf32>
    %112 = arith.addf %111, %110 : vector<16x128xf32>
    %113 = arith.divf %111, %112 : vector<16x128xf32>
    %114 = arith.mulf %105, %87 : vector<16x128xf32>
    %115 = arith.mulf %99, %107 : vector<16x128xf32>
    %116 = arith.addf %114, %115 : vector<16x128xf32>
    %117 = math.tanh %116 : vector<16x128xf32>
    %118 = arith.mulf %113, %117 : vector<16x128xf32>
    %119 = arith.truncf %118 : vector<16x128xf32> to vector<16x128xbf16>
    %c0_51 = arith.constant 0 : index
    %c0_52 = arith.constant 0 : index
    %120 = vector.load %arg11[%c0_51, %c0_52] : memref<16x128xbf16, #tpu.memory_space<vmem>>, vector<16x128xbf16>
    tpu.vector_store %arg11[%c0_51, %c0_52], %119 {strides = array<i32>} : memref<16x128xbf16, #tpu.memory_space<vmem>>, vector<16x128xbf16>,
    %c0_53 = arith.constant 0 : index
    %c0_54 = arith.constant 0 : index
    %121 = vector.load %arg12[%c0_53, %c0_54] : memref<16x128xf32, #tpu.memory_space<vmem>>, vector<16x128xf32>
    tpu.vector_store %arg12[%c0_53, %c0_54], %116 {strides = array<i32>} : memref<16x128xf32, #tpu.memory_space<vmem>>, vector<16x128xf32>,
    %c3_i32 = arith.constant 3 : i32
    %c0_55 = arith.constant 0 : index
    %c0_56 = arith.constant 0 : index
    %122 = vector.load %arg11[%c0_55, %c0_56] : memref<16x128xbf16, #tpu.memory_space<vmem>>, vector<16x128xbf16>
    %c0_57 = arith.constant 0 : index
    %c0_58 = arith.constant 0 : index
    %123 = vector.load %arg12[%c0_57, %c0_58] : memref<16x128xf32, #tpu.memory_space<vmem>>, vector<16x128xf32>
    %124 = arith.index_cast %c3_i32 : i32 to index
    %c0_59 = arith.constant 0 : index
    %c0_60 = arith.constant 0 : index
    %125 = vector.load %arg13[%124, %c0_59, %c0_60] : memref<8x16x512xbf16, #tpu.memory_space<vmem>>, vector<1x16x512xbf16>
    %126 = vector.shape_cast %125 : vector<1x16x512xbf16> to vector<16x512xbf16>
    %127 = arith.extf %126 : vector<16x512xbf16> to vector<16x512xf32>
    %cst_61 = arith.constant dense<0.000000e+00> : vector<16x512xf32>
    %128 = tpu.matmul %122, %3, %cst_61 {dimension_numbers = #tpu.dot_dimension_numbers<[1], [0], [0], [1], [0, 0, 1, 1], [], []>} : vector<16x128xbf16>, vector<128x512xbf16>, vector<16x512xf32> -> vector<16x512xf32>
    %129 = arith.addf %127, %128 : vector<16x512xf32>
    %130 = vector.extract_strided_slice %129 {offsets = [0, 0], sizes = [16, 128], strides = [1, 1]} : vector<16x512xf32> to vector<16x128xf32>
    %131 = arith.negf %130 : vector<16x128xf32>
    %132 = math.exp %131 : vector<16x128xf32>
    %cst_62 = arith.constant 1.000000e+00 : f32
    %133 = vector.broadcast %cst_62 : f32 to vector<16x128xf32>
    %134 = arith.addf %133, %132 : vector<16x128xf32>
    %135 = arith.divf %133, %134 : vector<16x128xf32>
    %136 = vector.extract_strided_slice %129 {offsets = [0, 128], sizes = [16, 128], strides = [1, 1]} : vector<16x512xf32> to vector<16x128xf32>
    %137 = arith.negf %136 : vector<16x128xf32>
    %138 = math.exp %137 : vector<16x128xf32>
    %cst_63 = arith.constant 1.000000e+00 : f32
    %139 = vector.broadcast %cst_63 : f32 to vector<16x128xf32>
    %140 = arith.addf %139, %138 : vector<16x128xf32>
    %141 = arith.divf %139, %140 : vector<16x128xf32>
    %142 = vector.extract_strided_slice %129 {offsets = [0, 256], sizes = [16, 128], strides = [1, 1]} : vector<16x512xf32> to vector<16x128xf32>
    %143 = math.tanh %142 : vector<16x128xf32>
    %144 = vector.extract_strided_slice %129 {offsets = [0, 384], sizes = [16, 128], strides = [1, 1]} : vector<16x512xf32> to vector<16x128xf32>
    %145 = arith.negf %144 : vector<16x128xf32>
    %146 = math.exp %145 : vector<16x128xf32>
    %cst_64 = arith.constant 1.000000e+00 : f32
    %147 = vector.broadcast %cst_64 : f32 to vector<16x128xf32>
    %148 = arith.addf %147, %146 : vector<16x128xf32>
    %149 = arith.divf %147, %148 : vector<16x128xf32>
    %150 = arith.mulf %141, %123 : vector<16x128xf32>
    %151 = arith.mulf %135, %143 : vector<16x128xf32>
    %152 = arith.addf %150, %151 : vector<16x128xf32>
    %153 = math.tanh %152 : vector<16x128xf32>
    %154 = arith.mulf %149, %153 : vector<16x128xf32>
    %155 = arith.truncf %154 : vector<16x128xf32> to vector<16x128xbf16>
    %c0_65 = arith.constant 0 : index
    %c0_66 = arith.constant 0 : index
    %156 = vector.load %arg11[%c0_65, %c0_66] : memref<16x128xbf16, #tpu.memory_space<vmem>>, vector<16x128xbf16>
    tpu.vector_store %arg11[%c0_65, %c0_66], %155 {strides = array<i32>} : memref<16x128xbf16, #tpu.memory_space<vmem>>, vector<16x128xbf16>,
    %c0_67 = arith.constant 0 : index
    %c0_68 = arith.constant 0 : index
    %157 = vector.load %arg12[%c0_67, %c0_68] : memref<16x128xf32, #tpu.memory_space<vmem>>, vector<16x128xf32>
    tpu.vector_store %arg12[%c0_67, %c0_68], %152 {strides = array<i32>} : memref<16x128xf32, #tpu.memory_space<vmem>>, vector<16x128xf32>,
    %c4_i32 = arith.constant 4 : i32
    %c0_69 = arith.constant 0 : index
    %c0_70 = arith.constant 0 : index
    %158 = vector.load %arg11[%c0_69, %c0_70] : memref<16x128xbf16, #tpu.memory_space<vmem>>, vector<16x128xbf16>
    %c0_71 = arith.constant 0 : index
    %c0_72 = arith.constant 0 : index
    %159 = vector.load %arg12[%c0_71, %c0_72] : memref<16x128xf32, #tpu.memory_space<vmem>>, vector<16x128xf32>
    %160 = arith.index_cast %c4_i32 : i32 to index
    %c0_73 = arith.constant 0 : index
    %c0_74 = arith.constant 0 : index
    %161 = vector.load %arg13[%160, %c0_73, %c0_74] : memref<8x16x512xbf16, #tpu.memory_space<vmem>>, vector<1x16x512xbf16>
    %162 = vector.shape_cast %161 : vector<1x16x512xbf16> to vector<16x512xbf16>
    %163 = arith.extf %162 : vector<16x512xbf16> to vector<16x512xf32>
    %cst_75 = arith.constant dense<0.000000e+00> : vector<16x512xf32>
    %164 = tpu.matmul %158, %3, %cst_75 {dimension_numbers = #tpu.dot_dimension_numbers<[1], [0], [0], [1], [0, 0, 1, 1], [], []>} : vector<16x128xbf16>, vector<128x512xbf16>, vector<16x512xf32> -> vector<16x512xf32>
    %165 = arith.addf %163, %164 : vector<16x512xf32>
    %166 = vector.extract_strided_slice %165 {offsets = [0, 0], sizes = [16, 128], strides = [1, 1]} : vector<16x512xf32> to vector<16x128xf32>
    %167 = arith.negf %166 : vector<16x128xf32>
    %168 = math.exp %167 : vector<16x128xf32>
    %cst_76 = arith.constant 1.000000e+00 : f32
    %169 = vector.broadcast %cst_76 : f32 to vector<16x128xf32>
    %170 = arith.addf %169, %168 : vector<16x128xf32>
    %171 = arith.divf %169, %170 : vector<16x128xf32>
    %172 = vector.extract_strided_slice %165 {offsets = [0, 128], sizes = [16, 128], strides = [1, 1]} : vector<16x512xf32> to vector<16x128xf32>
    %173 = arith.negf %172 : vector<16x128xf32>
    %174 = math.exp %173 : vector<16x128xf32>
    %cst_77 = arith.constant 1.000000e+00 : f32
    %175 = vector.broadcast %cst_77 : f32 to vector<16x128xf32>
    %176 = arith.addf %175, %174 : vector<16x128xf32>
    %177 = arith.divf %175, %176 : vector<16x128xf32>
    %178 = vector.extract_strided_slice %165 {offsets = [0, 256], sizes = [16, 128], strides = [1, 1]} : vector<16x512xf32> to vector<16x128xf32>
    %179 = math.tanh %178 : vector<16x128xf32>
    %180 = vector.extract_strided_slice %165 {offsets = [0, 384], sizes = [16, 128], strides = [1, 1]} : vector<16x512xf32> to vector<16x128xf32>
    %181 = arith.negf %180 : vector<16x128xf32>
    %182 = math.exp %181 : vector<16x128xf32>
    %cst_78 = arith.constant 1.000000e+00 : f32
    %183 = vector.broadcast %cst_78 : f32 to vector<16x128xf32>
    %184 = arith.addf %183, %182 : vector<16x128xf32>
    %185 = arith.divf %183, %184 : vector<16x128xf32>
    %186 = arith.mulf %177, %159 : vector<16x128xf32>
    %187 = arith.mulf %171, %179 : vector<16x128xf32>
    %188 = arith.addf %186, %187 : vector<16x128xf32>
    %189 = math.tanh %188 : vector<16x128xf32>
    %190 = arith.mulf %185, %189 : vector<16x128xf32>
    %191 = arith.truncf %190 : vector<16x128xf32> to vector<16x128xbf16>
    %c0_79 = arith.constant 0 : index
    %c0_80 = arith.constant 0 : index
    %192 = vector.load %arg11[%c0_79, %c0_80] : memref<16x128xbf16, #tpu.memory_space<vmem>>, vector<16x128xbf16>
    tpu.vector_store %arg11[%c0_79, %c0_80], %191 {strides = array<i32>} : memref<16x128xbf16, #tpu.memory_space<vmem>>, vector<16x128xbf16>,
    %c0_81 = arith.constant 0 : index
    %c0_82 = arith.constant 0 : index
    %193 = vector.load %arg12[%c0_81, %c0_82] : memref<16x128xf32, #tpu.memory_space<vmem>>, vector<16x128xf32>
    tpu.vector_store %arg12[%c0_81, %c0_82], %188 {strides = array<i32>} : memref<16x128xf32, #tpu.memory_space<vmem>>, vector<16x128xf32>,
    %c5_i32 = arith.constant 5 : i32
    %c0_83 = arith.constant 0 : index
    %c0_84 = arith.constant 0 : index
    %194 = vector.load %arg11[%c0_83, %c0_84] : memref<16x128xbf16, #tpu.memory_space<vmem>>, vector<16x128xbf16>
    %c0_85 = arith.constant 0 : index
    %c0_86 = arith.constant 0 : index
    %195 = vector.load %arg12[%c0_85, %c0_86] : memref<16x128xf32, #tpu.memory_space<vmem>>, vector<16x128xf32>
    %196 = arith.index_cast %c5_i32 : i32 to index
    %c0_87 = arith.constant 0 : index
    %c0_88 = arith.constant 0 : index
    %197 = vector.load %arg13[%196, %c0_87, %c0_88] : memref<8x16x512xbf16, #tpu.memory_space<vmem>>, vector<1x16x512xbf16>
    %198 = vector.shape_cast %197 : vector<1x16x512xbf16> to vector<16x512xbf16>
    %199 = arith.extf %198 : vector<16x512xbf16> to vector<16x512xf32>
    %cst_89 = arith.constant dense<0.000000e+00> : vector<16x512xf32>
    %200 = tpu.matmul %194, %3, %cst_89 {dimension_numbers = #tpu.dot_dimension_numbers<[1], [0], [0], [1], [0, 0, 1, 1], [], []>} : vector<16x128xbf16>, vector<128x512xbf16>, vector<16x512xf32> -> vector<16x512xf32>
    %201 = arith.addf %199, %200 : vector<16x512xf32>
    %202 = vector.extract_strided_slice %201 {offsets = [0, 0], sizes = [16, 128], strides = [1, 1]} : vector<16x512xf32> to vector<16x128xf32>
    %203 = arith.negf %202 : vector<16x128xf32>
    %204 = math.exp %203 : vector<16x128xf32>
    %cst_90 = arith.constant 1.000000e+00 : f32
    %205 = vector.broadcast %cst_90 : f32 to vector<16x128xf32>
    %206 = arith.addf %205, %204 : vector<16x128xf32>
    %207 = arith.divf %205, %206 : vector<16x128xf32>
    %208 = vector.extract_strided_slice %201 {offsets = [0, 128], sizes = [16, 128], strides = [1, 1]} : vector<16x512xf32> to vector<16x128xf32>
    %209 = arith.negf %208 : vector<16x128xf32>
    %210 = math.exp %209 : vector<16x128xf32>
    %cst_91 = arith.constant 1.000000e+00 : f32
    %211 = vector.broadcast %cst_91 : f32 to vector<16x128xf32>
    %212 = arith.addf %211, %210 : vector<16x128xf32>
    %213 = arith.divf %211, %212 : vector<16x128xf32>
    %214 = vector.extract_strided_slice %201 {offsets = [0, 256], sizes = [16, 128], strides = [1, 1]} : vector<16x512xf32> to vector<16x128xf32>
    %215 = math.tanh %214 : vector<16x128xf32>
    %216 = vector.extract_strided_slice %201 {offsets = [0, 384], sizes = [16, 128], strides = [1, 1]} : vector<16x512xf32> to vector<16x128xf32>
    %217 = arith.negf %216 : vector<16x128xf32>
    %218 = math.exp %217 : vector<16x128xf32>
    %cst_92 = arith.constant 1.000000e+00 : f32
    %219 = vector.broadcast %cst_92 : f32 to vector<16x128xf32>
    %220 = arith.addf %219, %218 : vector<16x128xf32>
    %221 = arith.divf %219, %220 : vector<16x128xf32>
    %222 = arith.mulf %213, %195 : vector<16x128xf32>
    %223 = arith.mulf %207, %215 : vector<16x128xf32>
    %224 = arith.addf %222, %223 : vector<16x128xf32>
    %225 = math.tanh %224 : vector<16x128xf32>
    %226 = arith.mulf %221, %225 : vector<16x128xf32>
    %227 = arith.truncf %226 : vector<16x128xf32> to vector<16x128xbf16>
    %c0_93 = arith.constant 0 : index
    %c0_94 = arith.constant 0 : index
    %228 = vector.load %arg11[%c0_93, %c0_94] : memref<16x128xbf16, #tpu.memory_space<vmem>>, vector<16x128xbf16>
    tpu.vector_store %arg11[%c0_93, %c0_94], %227 {strides = array<i32>} : memref<16x128xbf16, #tpu.memory_space<vmem>>, vector<16x128xbf16>,
    %c0_95 = arith.constant 0 : index
    %c0_96 = arith.constant 0 : index
    %229 = vector.load %arg12[%c0_95, %c0_96] : memref<16x128xf32, #tpu.memory_space<vmem>>, vector<16x128xf32>
    tpu.vector_store %arg12[%c0_95, %c0_96], %224 {strides = array<i32>} : memref<16x128xf32, #tpu.memory_space<vmem>>, vector<16x128xf32>,
    %c6_i32 = arith.constant 6 : i32
    %c0_97 = arith.constant 0 : index
    %c0_98 = arith.constant 0 : index
    %230 = vector.load %arg11[%c0_97, %c0_98] : memref<16x128xbf16, #tpu.memory_space<vmem>>, vector<16x128xbf16>
    %c0_99 = arith.constant 0 : index
    %c0_100 = arith.constant 0 : index
    %231 = vector.load %arg12[%c0_99, %c0_100] : memref<16x128xf32, #tpu.memory_space<vmem>>, vector<16x128xf32>
    %232 = arith.index_cast %c6_i32 : i32 to index
    %c0_101 = arith.constant 0 : index
    %c0_102 = arith.constant 0 : index
    %233 = vector.load %arg13[%232, %c0_101, %c0_102] : memref<8x16x512xbf16, #tpu.memory_space<vmem>>, vector<1x16x512xbf16>
    %234 = vector.shape_cast %233 : vector<1x16x512xbf16> to vector<16x512xbf16>
    %235 = arith.extf %234 : vector<16x512xbf16> to vector<16x512xf32>
    %cst_103 = arith.constant dense<0.000000e+00> : vector<16x512xf32>
    %236 = tpu.matmul %230, %3, %cst_103 {dimension_numbers = #tpu.dot_dimension_numbers<[1], [0], [0], [1], [0, 0, 1, 1], [], []>} : vector<16x128xbf16>, vector<128x512xbf16>, vector<16x512xf32> -> vector<16x512xf32>
    %237 = arith.addf %235, %236 : vector<16x512xf32>
    %238 = vector.extract_strided_slice %237 {offsets = [0, 0], sizes = [16, 128], strides = [1, 1]} : vector<16x512xf32> to vector<16x128xf32>
    %239 = arith.negf %238 : vector<16x128xf32>
    %240 = math.exp %239 : vector<16x128xf32>
    %cst_104 = arith.constant 1.000000e+00 : f32
    %241 = vector.broadcast %cst_104 : f32 to vector<16x128xf32>
    %242 = arith.addf %241, %240 : vector<16x128xf32>
    %243 = arith.divf %241, %242 : vector<16x128xf32>
    %244 = vector.extract_strided_slice %237 {offsets = [0, 128], sizes = [16, 128], strides = [1, 1]} : vector<16x512xf32> to vector<16x128xf32>
    %245 = arith.negf %244 : vector<16x128xf32>
    %246 = math.exp %245 : vector<16x128xf32>
    %cst_105 = arith.constant 1.000000e+00 : f32
    %247 = vector.broadcast %cst_105 : f32 to vector<16x128xf32>
    %248 = arith.addf %247, %246 : vector<16x128xf32>
    %249 = arith.divf %247, %248 : vector<16x128xf32>
    %250 = vector.extract_strided_slice %237 {offsets = [0, 256], sizes = [16, 128], strides = [1, 1]} : vector<16x512xf32> to vector<16x128xf32>
    %251 = math.tanh %250 : vector<16x128xf32>
    %252 = vector.extract_strided_slice %237 {offsets = [0, 384], sizes = [16, 128], strides = [1, 1]} : vector<16x512xf32> to vector<16x128xf32>
    %253 = arith.negf %252 : vector<16x128xf32>
    %254 = math.exp %253 : vector<16x128xf32>
    %cst_106 = arith.constant 1.000000e+00 : f32
    %255 = vector.broadcast %cst_106 : f32 to vector<16x128xf32>
    %256 = arith.addf %255, %254 : vector<16x128xf32>
    %257 = arith.divf %255, %256 : vector<16x128xf32>
    %258 = arith.mulf %249, %231 : vector<16x128xf32>
    %259 = arith.mulf %243, %251 : vector<16x128xf32>
    %260 = arith.addf %258, %259 : vector<16x128xf32>
    %261 = math.tanh %260 : vector<16x128xf32>
    %262 = arith.mulf %257, %261 : vector<16x128xf32>
    %263 = arith.truncf %262 : vector<16x128xf32> to vector<16x128xbf16>
    %c0_107 = arith.constant 0 : index
    %c0_108 = arith.constant 0 : index
    %264 = vector.load %arg11[%c0_107, %c0_108] : memref<16x128xbf16, #tpu.memory_space<vmem>>, vector<16x128xbf16>
    tpu.vector_store %arg11[%c0_107, %c0_108], %263 {strides = array<i32>} : memref<16x128xbf16, #tpu.memory_space<vmem>>, vector<16x128xbf16>,
    %c0_109 = arith.constant 0 : index
    %c0_110 = arith.constant 0 : index
    %265 = vector.load %arg12[%c0_109, %c0_110] : memref<16x128xf32, #tpu.memory_space<vmem>>, vector<16x128xf32>
    tpu.vector_store %arg12[%c0_109, %c0_110], %260 {strides = array<i32>} : memref<16x128xf32, #tpu.memory_space<vmem>>, vector<16x128xf32>,
    %c7_i32 = arith.constant 7 : i32
    %c0_111 = arith.constant 0 : index
    %c0_112 = arith.constant 0 : index
    %266 = vector.load %arg11[%c0_111, %c0_112] : memref<16x128xbf16, #tpu.memory_space<vmem>>, vector<16x128xbf16>
    %c0_113 = arith.constant 0 : index
    %c0_114 = arith.constant 0 : index
    %267 = vector.load %arg12[%c0_113, %c0_114] : memref<16x128xf32, #tpu.memory_space<vmem>>, vector<16x128xf32>
    %268 = arith.index_cast %c7_i32 : i32 to index
    %c0_115 = arith.constant 0 : index
    %c0_116 = arith.constant 0 : index
    %269 = vector.load %arg13[%268, %c0_115, %c0_116] : memref<8x16x512xbf16, #tpu.memory_space<vmem>>, vector<1x16x512xbf16>
    %270 = vector.shape_cast %269 : vector<1x16x512xbf16> to vector<16x512xbf16>
    %271 = arith.extf %270 : vector<16x512xbf16> to vector<16x512xf32>
    %cst_117 = arith.constant dense<0.000000e+00> : vector<16x512xf32>
    %272 = tpu.matmul %266, %3, %cst_117 {dimension_numbers = #tpu.dot_dimension_numbers<[1], [0], [0], [1], [0, 0, 1, 1], [], []>} : vector<16x128xbf16>, vector<128x512xbf16>, vector<16x512xf32> -> vector<16x512xf32>
    %273 = arith.addf %271, %272 : vector<16x512xf32>
    %274 = vector.extract_strided_slice %273 {offsets = [0, 0], sizes = [16, 128], strides = [1, 1]} : vector<16x512xf32> to vector<16x128xf32>
    %275 = arith.negf %274 : vector<16x128xf32>
    %276 = math.exp %275 : vector<16x128xf32>
    %cst_118 = arith.constant 1.000000e+00 : f32
    %277 = vector.broadcast %cst_118 : f32 to vector<16x128xf32>
    %278 = arith.addf %277, %276 : vector<16x128xf32>
    %279 = arith.divf %277, %278 : vector<16x128xf32>
    %280 = vector.extract_strided_slice %273 {offsets = [0, 128], sizes = [16, 128], strides = [1, 1]} : vector<16x512xf32> to vector<16x128xf32>
    %281 = arith.negf %280 : vector<16x128xf32>
    %282 = math.exp %281 : vector<16x128xf32>
    %cst_119 = arith.constant 1.000000e+00 : f32
    %283 = vector.broadcast %cst_119 : f32 to vector<16x128xf32>
    %284 = arith.addf %283, %282 : vector<16x128xf32>
    %285 = arith.divf %283, %284 : vector<16x128xf32>
    %286 = vector.extract_strided_slice %273 {offsets = [0, 256], sizes = [16, 128], strides = [1, 1]} : vector<16x512xf32> to vector<16x128xf32>
    %287 = math.tanh %286 : vector<16x128xf32>
    %288 = vector.extract_strided_slice %273 {offsets = [0, 384], sizes = [16, 128], strides = [1, 1]} : vector<16x512xf32> to vector<16x128xf32>
    %289 = arith.negf %288 : vector<16x128xf32>
    %290 = math.exp %289 : vector<16x128xf32>
    %cst_120 = arith.constant 1.000000e+00 : f32
    %291 = vector.broadcast %cst_120 : f32 to vector<16x128xf32>
    %292 = arith.addf %291, %290 : vector<16x128xf32>
    %293 = arith.divf %291, %292 : vector<16x128xf32>
    %294 = arith.mulf %285, %267 : vector<16x128xf32>
    %295 = arith.mulf %279, %287 : vector<16x128xf32>
    %296 = arith.addf %294, %295 : vector<16x128xf32>
    %297 = math.tanh %296 : vector<16x128xf32>
    %298 = arith.mulf %293, %297 : vector<16x128xf32>
    %299 = arith.truncf %298 : vector<16x128xf32> to vector<16x128xbf16>
    %c0_121 = arith.constant 0 : index
    %c0_122 = arith.constant 0 : index
    %300 = vector.load %arg11[%c0_121, %c0_122] : memref<16x128xbf16, #tpu.memory_space<vmem>>, vector<16x128xbf16>
    tpu.vector_store %arg11[%c0_121, %c0_122], %299 {strides = array<i32>} : memref<16x128xbf16, #tpu.memory_space<vmem>>, vector<16x128xbf16>,
    %c0_123 = arith.constant 0 : index
    %c0_124 = arith.constant 0 : index
    %301 = vector.load %arg12[%c0_123, %c0_124] : memref<16x128xf32, #tpu.memory_space<vmem>>, vector<16x128xf32>
    tpu.vector_store %arg12[%c0_123, %c0_124], %296 {strides = array<i32>} : memref<16x128xf32, #tpu.memory_space<vmem>>, vector<16x128xf32>,
    %c8_i32 = arith.constant 8 : i32
    %c0_i32_125 = arith.constant 0 : i32
    %302 = arith.cmpi eq, %arg1, %c0_i32_125 : i32
    %303 = arith.extui %302 : i1 to i32
    %c0_i32_126 = arith.constant 0 : i32
    %304 = arith.cmpi ne, %303, %c0_i32_126 : i32
    scf.if %304 {
      %c0_127 = arith.constant 0 : index
      %c0_128 = arith.constant 0 : index
      %305 = vector.load %arg11[%c0_127, %c0_128] : memref<16x128xbf16, #tpu.memory_space<vmem>>, vector<16x128xbf16>
      %c0_129 = arith.constant 0 : index
      %c0_130 = arith.constant 0 : index
      %306 = vector.load %arg8[%c0_129, %c0_130] : memref<128x4xbf16, #tpu.memory_space<vmem>>, vector<128x4xbf16>
      %cst_131 = arith.constant dense<0.000000e+00> : vector<16x4xf32>
      %307 = tpu.matmul %305, %306, %cst_131 {dimension_numbers = #tpu.dot_dimension_numbers<[1], [0], [0], [1], [0, 0, 1, 1], [], []>} : vector<16x128xbf16>, vector<128x4xbf16>, vector<16x4xf32> -> vector<16x4xf32>
      %c0_132 = arith.constant 0 : index
      %c0_133 = arith.constant 0 : index
      %308 = vector.load %arg9[%c0_132, %c0_133] : memref<1x4xf32, #tpu.memory_space<vmem>>, vector<1x4xf32>
      %309 = vector.broadcast %308 : vector<1x4xf32> to vector<16x4xf32>
      %310 = arith.addf %307, %309 : vector<16x4xf32>
      %c0_134 = arith.constant 0 : index
      %c0_135 = arith.constant 0 : index
      %311 = vector.load %arg10[%c0_134, %c0_135] : memref<16x4xf32, #tpu.memory_space<vmem>>, vector<16x4xf32>
      tpu.vector_store %arg10[%c0_134, %c0_135], %310 {strides = array<i32>} : memref<16x4xf32, #tpu.memory_space<vmem>>, vector<16x4xf32>,
    } else {
    }
    return
  }
  func.func @transform_0(%arg0: i32, %arg1: i32) -> (i32, i32, i32) {
    %c0_i32 = arith.constant 0 : i32
    %c0_i32_0 = arith.constant 0 : i32
    return %arg1, %arg0, %c0_i32 : i32, i32, i32
  }
  func.func @transform_1(%arg0: i32, %arg1: i32) -> (i32, i32) {
    %c0_i32 = arith.constant 0 : i32
    %c0_i32_0 = arith.constant 0 : i32
    %c0_i32_1 = arith.constant 0 : i32
    return %c0_i32, %c0_i32_0 : i32, i32
  }
  func.func @transform_2(%arg0: i32, %arg1: i32) -> (i32, i32) {
    %c0_i32 = arith.constant 0 : i32
    %c0_i32_0 = arith.constant 0 : i32
    %c0_i32_1 = arith.constant 0 : i32
    return %c0_i32, %c0_i32_0 : i32, i32
  }
  func.func @transform_3(%arg0: i32, %arg1: i32) -> (i32, i32) {
    %c0_i32 = arith.constant 0 : i32
    %c0_i32_0 = arith.constant 0 : i32
    %c0_i32_1 = arith.constant 0 : i32
    return %c0_i32, %c0_i32_0 : i32, i32
  }
  func.func @transform_4(%arg0: i32, %arg1: i32) -> (i32, i32) {
    %c0_i32 = arith.constant 0 : i32
    %c0_i32_0 = arith.constant 0 : i32
    return %arg0, %c0_i32 : i32, i32
  }
  func.func @transform_5(%arg0: i32, %arg1: i32) -> (i32, i32) {
    %c0_i32 = arith.constant 0 : i32
    %c0_i32_0 = arith.constant 0 : i32
    return %arg0, %c0_i32 : i32, i32
  }
  func.func @transform_6(%arg0: i32, %arg1: i32) -> (i32, i32) {
    %c0_i32 = arith.constant 0 : i32
    %c0_i32_0 = arith.constant 0 : i32
    %c0_i32_1 = arith.constant 0 : i32
    return %c0_i32, %c0_i32_0 : i32, i32
  }
  func.func @transform_7(%arg0: i32, %arg1: i32) -> (i32, i32) {
    %c0_i32 = arith.constant 0 : i32
    %c0_i32_0 = arith.constant 0 : i32
    %c0_i32_1 = arith.constant 0 : i32
    return %c0_i32, %c0_i32_0 : i32, i32
  }
  func.func @transform_8(%arg0: i32, %arg1: i32) -> (i32, i32) {
    %c0_i32 = arith.constant 0 : i32
    %c0_i32_0 = arith.constant 0 : i32
    return %arg0, %c0_i32 : i32, i32
  }
}

module attributes {stable_mosaic.version = 11 : i64} {
  func.func @_seq_kernel(%arg0: i32, %arg1: i32, %arg2: memref<8x16x4xbf16, #tpu.memory_space<vmem>>, %arg3: memref<4x512xbf16, #tpu.memory_space<vmem>>, %arg4: memref<128x512xbf16, #tpu.memory_space<vmem>>, %arg5: memref<1x512xf32, #tpu.memory_space<vmem>>, %arg6: memref<16x128xf32, #tpu.memory_space<vmem>>, %arg7: memref<16x128xf32, #tpu.memory_space<vmem>>, %arg8: memref<8x16x128xbf16, #tpu.memory_space<vmem>>, %arg9: memref<16x128xbf16, #tpu.memory_space<vmem>>, %arg10: memref<16x128xf32, #tpu.memory_space<vmem>>, %arg11: memref<8x16x512xbf16, #tpu.memory_space<vmem>>) attributes {dimension_semantics = [#tpu.dimension_semantics<parallel>, #tpu.dimension_semantics<arbitrary>], iteration_bounds = array<i64: 1, 1>, scalar_prefetch = 0 : i64, scratch_operands = 3 : i64, tpu.core_type = #tpu.core_type<tc>, window_params = [{transform_indices = @transform_0, window_bounds = array<i64: 8, 16, 4>}, {pipeline_mode = #tpu.pipeline_mode<synchronous>, transform_indices = @transform_1, window_bounds = array<i64: 4, 512>}, {pipeline_mode = #tpu.pipeline_mode<synchronous>, transform_indices = @transform_2, window_bounds = array<i64: 128, 512>}, {pipeline_mode = #tpu.pipeline_mode<synchronous>, transform_indices = @transform_3, window_bounds = array<i64: 1, 512>}, {transform_indices = @transform_4, window_bounds = array<i64: 16, 128>}, {transform_indices = @transform_5, window_bounds = array<i64: 16, 128>}, {transform_indices = @transform_6, window_bounds = array<i64: 8, 16, 128>}]} {
    %c0_i32 = arith.constant 0 : i32
    %0 = arith.cmpi eq, %arg1, %c0_i32 : i32
    %1 = arith.extui %0 : i1 to i32
    %c0_i32_0 = arith.constant 0 : i32
    %2 = arith.cmpi ne, %1, %c0_i32_0 : i32
    scf.if %2 {
      %c0_141 = arith.constant 0 : index
      %c0_142 = arith.constant 0 : index
      %334 = vector.load %arg6[%c0_141, %c0_142] : memref<16x128xf32, #tpu.memory_space<vmem>>, vector<16x128xf32>
      %335 = arith.truncf %334 : vector<16x128xf32> to vector<16x128xbf16>
      %c0_143 = arith.constant 0 : index
      %c0_144 = arith.constant 0 : index
      %336 = vector.load %arg9[%c0_143, %c0_144] : memref<16x128xbf16, #tpu.memory_space<vmem>>, vector<16x128xbf16>
      tpu.vector_store %arg9[%c0_143, %c0_144], %335 {strides = array<i32>} : memref<16x128xbf16, #tpu.memory_space<vmem>>, vector<16x128xbf16>,
      %c0_145 = arith.constant 0 : index
      %c0_146 = arith.constant 0 : index
      %337 = vector.load %arg7[%c0_145, %c0_146] : memref<16x128xf32, #tpu.memory_space<vmem>>, vector<16x128xf32>
      %c0_147 = arith.constant 0 : index
      %c0_148 = arith.constant 0 : index
      %338 = vector.load %arg10[%c0_147, %c0_148] : memref<16x128xf32, #tpu.memory_space<vmem>>, vector<16x128xf32>
      tpu.vector_store %arg10[%c0_147, %c0_148], %337 {strides = array<i32>} : memref<16x128xf32, #tpu.memory_space<vmem>>, vector<16x128xf32>,
    } else {
    }
    %c0 = arith.constant 0 : index
    %c0_1 = arith.constant 0 : index
    %3 = vector.load %arg4[%c0, %c0_1] : memref<128x512xbf16, #tpu.memory_space<vmem>>, vector<128x512xbf16>
    %c0_2 = arith.constant 0 : index
    %c0_3 = arith.constant 0 : index
    %c0_4 = arith.constant 0 : index
    %4 = vector.load %arg2[%c0_2, %c0_3, %c0_4] : memref<8x16x4xbf16, #tpu.memory_space<vmem>>, vector<8x16x4xbf16>
    %5 = vector.shape_cast %4 : vector<8x16x4xbf16> to vector<128x4xbf16>
    %c0_5 = arith.constant 0 : index
    %c0_6 = arith.constant 0 : index
    %6 = vector.load %arg3[%c0_5, %c0_6] : memref<4x512xbf16, #tpu.memory_space<vmem>>, vector<4x512xbf16>
    %cst = arith.constant dense<0.000000e+00> : vector<128x512xf32>
    %7 = tpu.matmul %5, %6, %cst {dimension_numbers = #tpu.dot_dimension_numbers<[1], [0], [0], [1], [0, 0, 1, 1], [], []>} : vector<128x4xbf16>, vector<4x512xbf16>, vector<128x512xf32> -> vector<128x512xf32>
    %c0_7 = arith.constant 0 : index
    %c0_8 = arith.constant 0 : index
    %8 = vector.load %arg5[%c0_7, %c0_8] : memref<1x512xf32, #tpu.memory_space<vmem>>, vector<1x512xf32>
    %9 = vector.broadcast %8 : vector<1x512xf32> to vector<128x512xf32>
    %10 = arith.addf %7, %9 : vector<128x512xf32>
    %11 = vector.shape_cast %10 : vector<128x512xf32> to vector<8x16x512xf32>
    %12 = arith.truncf %11 : vector<8x16x512xf32> to vector<8x16x512xbf16>
    %c0_9 = arith.constant 0 : index
    %c0_10 = arith.constant 0 : index
    %c0_11 = arith.constant 0 : index
    %13 = vector.load %arg11[%c0_9, %c0_10, %c0_11] : memref<8x16x512xbf16, #tpu.memory_space<vmem>>, vector<8x16x512xbf16>
    tpu.vector_store %arg11[%c0_9, %c0_10, %c0_11], %12 {strides = array<i32>} : memref<8x16x512xbf16, #tpu.memory_space<vmem>>, vector<8x16x512xbf16>,
    %c0_i32_12 = arith.constant 0 : i32
    %c0_13 = arith.constant 0 : index
    %c0_14 = arith.constant 0 : index
    %14 = vector.load %arg9[%c0_13, %c0_14] : memref<16x128xbf16, #tpu.memory_space<vmem>>, vector<16x128xbf16>
    %c0_15 = arith.constant 0 : index
    %c0_16 = arith.constant 0 : index
    %15 = vector.load %arg10[%c0_15, %c0_16] : memref<16x128xf32, #tpu.memory_space<vmem>>, vector<16x128xf32>
    %16 = arith.index_cast %c0_i32_12 : i32 to index
    %c0_17 = arith.constant 0 : index
    %c0_18 = arith.constant 0 : index
    %17 = vector.load %arg11[%16, %c0_17, %c0_18] : memref<8x16x512xbf16, #tpu.memory_space<vmem>>, vector<1x16x512xbf16>
    %18 = vector.shape_cast %17 : vector<1x16x512xbf16> to vector<16x512xbf16>
    %19 = arith.extf %18 : vector<16x512xbf16> to vector<16x512xf32>
    %cst_19 = arith.constant dense<0.000000e+00> : vector<16x512xf32>
    %20 = tpu.matmul %14, %3, %cst_19 {dimension_numbers = #tpu.dot_dimension_numbers<[1], [0], [0], [1], [0, 0, 1, 1], [], []>} : vector<16x128xbf16>, vector<128x512xbf16>, vector<16x512xf32> -> vector<16x512xf32>
    %21 = arith.addf %19, %20 : vector<16x512xf32>
    %22 = vector.extract_strided_slice %21 {offsets = [0, 0], sizes = [16, 128], strides = [1, 1]} : vector<16x512xf32> to vector<16x128xf32>
    %23 = arith.negf %22 : vector<16x128xf32>
    %24 = math.exp %23 : vector<16x128xf32>
    %cst_20 = arith.constant 1.000000e+00 : f32
    %25 = vector.broadcast %cst_20 : f32 to vector<16x128xf32>
    %26 = arith.addf %25, %24 : vector<16x128xf32>
    %27 = arith.divf %25, %26 : vector<16x128xf32>
    %28 = vector.extract_strided_slice %21 {offsets = [0, 128], sizes = [16, 128], strides = [1, 1]} : vector<16x512xf32> to vector<16x128xf32>
    %29 = arith.negf %28 : vector<16x128xf32>
    %30 = math.exp %29 : vector<16x128xf32>
    %cst_21 = arith.constant 1.000000e+00 : f32
    %31 = vector.broadcast %cst_21 : f32 to vector<16x128xf32>
    %32 = arith.addf %31, %30 : vector<16x128xf32>
    %33 = arith.divf %31, %32 : vector<16x128xf32>
    %34 = vector.extract_strided_slice %21 {offsets = [0, 256], sizes = [16, 128], strides = [1, 1]} : vector<16x512xf32> to vector<16x128xf32>
    %35 = math.tanh %34 : vector<16x128xf32>
    %36 = vector.extract_strided_slice %21 {offsets = [0, 384], sizes = [16, 128], strides = [1, 1]} : vector<16x512xf32> to vector<16x128xf32>
    %37 = arith.negf %36 : vector<16x128xf32>
    %38 = math.exp %37 : vector<16x128xf32>
    %cst_22 = arith.constant 1.000000e+00 : f32
    %39 = vector.broadcast %cst_22 : f32 to vector<16x128xf32>
    %40 = arith.addf %39, %38 : vector<16x128xf32>
    %41 = arith.divf %39, %40 : vector<16x128xf32>
    %42 = arith.mulf %33, %15 : vector<16x128xf32>
    %43 = arith.mulf %27, %35 : vector<16x128xf32>
    %44 = arith.addf %42, %43 : vector<16x128xf32>
    %45 = math.tanh %44 : vector<16x128xf32>
    %46 = arith.mulf %41, %45 : vector<16x128xf32>
    %47 = arith.truncf %46 : vector<16x128xf32> to vector<16x128xbf16>
    %c0_23 = arith.constant 0 : index
    %c0_24 = arith.constant 0 : index
    %48 = vector.load %arg9[%c0_23, %c0_24] : memref<16x128xbf16, #tpu.memory_space<vmem>>, vector<16x128xbf16>
    tpu.vector_store %arg9[%c0_23, %c0_24], %47 {strides = array<i32>} : memref<16x128xbf16, #tpu.memory_space<vmem>>, vector<16x128xbf16>,
    %c0_25 = arith.constant 0 : index
    %c0_26 = arith.constant 0 : index
    %49 = vector.load %arg10[%c0_25, %c0_26] : memref<16x128xf32, #tpu.memory_space<vmem>>, vector<16x128xf32>
    tpu.vector_store %arg10[%c0_25, %c0_26], %44 {strides = array<i32>} : memref<16x128xf32, #tpu.memory_space<vmem>>, vector<16x128xf32>,
    %50 = arith.index_cast %c0_i32_12 : i32 to index
    %c0_27 = arith.constant 0 : index
    %c0_28 = arith.constant 0 : index
    %51 = vector.load %arg8[%50, %c0_27, %c0_28] : memref<8x16x128xbf16, #tpu.memory_space<vmem>>, vector<1x16x128xbf16>
    %52 = vector.shape_cast %51 : vector<1x16x128xbf16> to vector<16x128xbf16>
    %53 = vector.shape_cast %47 : vector<16x128xbf16> to vector<1x16x128xbf16>
    tpu.vector_store %arg8[%50, %c0_27, %c0_28], %53 {strides = array<i32>} : memref<8x16x128xbf16, #tpu.memory_space<vmem>>, vector<1x16x128xbf16>,
    %c1_i32 = arith.constant 1 : i32
    %c0_29 = arith.constant 0 : index
    %c0_30 = arith.constant 0 : index
    %54 = vector.load %arg9[%c0_29, %c0_30] : memref<16x128xbf16, #tpu.memory_space<vmem>>, vector<16x128xbf16>
    %c0_31 = arith.constant 0 : index
    %c0_32 = arith.constant 0 : index
    %55 = vector.load %arg10[%c0_31, %c0_32] : memref<16x128xf32, #tpu.memory_space<vmem>>, vector<16x128xf32>
    %56 = arith.index_cast %c1_i32 : i32 to index
    %c0_33 = arith.constant 0 : index
    %c0_34 = arith.constant 0 : index
    %57 = vector.load %arg11[%56, %c0_33, %c0_34] : memref<8x16x512xbf16, #tpu.memory_space<vmem>>, vector<1x16x512xbf16>
    %58 = vector.shape_cast %57 : vector<1x16x512xbf16> to vector<16x512xbf16>
    %59 = arith.extf %58 : vector<16x512xbf16> to vector<16x512xf32>
    %cst_35 = arith.constant dense<0.000000e+00> : vector<16x512xf32>
    %60 = tpu.matmul %54, %3, %cst_35 {dimension_numbers = #tpu.dot_dimension_numbers<[1], [0], [0], [1], [0, 0, 1, 1], [], []>} : vector<16x128xbf16>, vector<128x512xbf16>, vector<16x512xf32> -> vector<16x512xf32>
    %61 = arith.addf %59, %60 : vector<16x512xf32>
    %62 = vector.extract_strided_slice %61 {offsets = [0, 0], sizes = [16, 128], strides = [1, 1]} : vector<16x512xf32> to vector<16x128xf32>
    %63 = arith.negf %62 : vector<16x128xf32>
    %64 = math.exp %63 : vector<16x128xf32>
    %cst_36 = arith.constant 1.000000e+00 : f32
    %65 = vector.broadcast %cst_36 : f32 to vector<16x128xf32>
    %66 = arith.addf %65, %64 : vector<16x128xf32>
    %67 = arith.divf %65, %66 : vector<16x128xf32>
    %68 = vector.extract_strided_slice %61 {offsets = [0, 128], sizes = [16, 128], strides = [1, 1]} : vector<16x512xf32> to vector<16x128xf32>
    %69 = arith.negf %68 : vector<16x128xf32>
    %70 = math.exp %69 : vector<16x128xf32>
    %cst_37 = arith.constant 1.000000e+00 : f32
    %71 = vector.broadcast %cst_37 : f32 to vector<16x128xf32>
    %72 = arith.addf %71, %70 : vector<16x128xf32>
    %73 = arith.divf %71, %72 : vector<16x128xf32>
    %74 = vector.extract_strided_slice %61 {offsets = [0, 256], sizes = [16, 128], strides = [1, 1]} : vector<16x512xf32> to vector<16x128xf32>
    %75 = math.tanh %74 : vector<16x128xf32>
    %76 = vector.extract_strided_slice %61 {offsets = [0, 384], sizes = [16, 128], strides = [1, 1]} : vector<16x512xf32> to vector<16x128xf32>
    %77 = arith.negf %76 : vector<16x128xf32>
    %78 = math.exp %77 : vector<16x128xf32>
    %cst_38 = arith.constant 1.000000e+00 : f32
    %79 = vector.broadcast %cst_38 : f32 to vector<16x128xf32>
    %80 = arith.addf %79, %78 : vector<16x128xf32>
    %81 = arith.divf %79, %80 : vector<16x128xf32>
    %82 = arith.mulf %73, %55 : vector<16x128xf32>
    %83 = arith.mulf %67, %75 : vector<16x128xf32>
    %84 = arith.addf %82, %83 : vector<16x128xf32>
    %85 = math.tanh %84 : vector<16x128xf32>
    %86 = arith.mulf %81, %85 : vector<16x128xf32>
    %87 = arith.truncf %86 : vector<16x128xf32> to vector<16x128xbf16>
    %c0_39 = arith.constant 0 : index
    %c0_40 = arith.constant 0 : index
    %88 = vector.load %arg9[%c0_39, %c0_40] : memref<16x128xbf16, #tpu.memory_space<vmem>>, vector<16x128xbf16>
    tpu.vector_store %arg9[%c0_39, %c0_40], %87 {strides = array<i32>} : memref<16x128xbf16, #tpu.memory_space<vmem>>, vector<16x128xbf16>,
    %c0_41 = arith.constant 0 : index
    %c0_42 = arith.constant 0 : index
    %89 = vector.load %arg10[%c0_41, %c0_42] : memref<16x128xf32, #tpu.memory_space<vmem>>, vector<16x128xf32>
    tpu.vector_store %arg10[%c0_41, %c0_42], %84 {strides = array<i32>} : memref<16x128xf32, #tpu.memory_space<vmem>>, vector<16x128xf32>,
    %90 = arith.index_cast %c1_i32 : i32 to index
    %c0_43 = arith.constant 0 : index
    %c0_44 = arith.constant 0 : index
    %91 = vector.load %arg8[%90, %c0_43, %c0_44] : memref<8x16x128xbf16, #tpu.memory_space<vmem>>, vector<1x16x128xbf16>
    %92 = vector.shape_cast %91 : vector<1x16x128xbf16> to vector<16x128xbf16>
    %93 = vector.shape_cast %87 : vector<16x128xbf16> to vector<1x16x128xbf16>
    tpu.vector_store %arg8[%90, %c0_43, %c0_44], %93 {strides = array<i32>} : memref<8x16x128xbf16, #tpu.memory_space<vmem>>, vector<1x16x128xbf16>,
    %c2_i32 = arith.constant 2 : i32
    %c0_45 = arith.constant 0 : index
    %c0_46 = arith.constant 0 : index
    %94 = vector.load %arg9[%c0_45, %c0_46] : memref<16x128xbf16, #tpu.memory_space<vmem>>, vector<16x128xbf16>
    %c0_47 = arith.constant 0 : index
    %c0_48 = arith.constant 0 : index
    %95 = vector.load %arg10[%c0_47, %c0_48] : memref<16x128xf32, #tpu.memory_space<vmem>>, vector<16x128xf32>
    %96 = arith.index_cast %c2_i32 : i32 to index
    %c0_49 = arith.constant 0 : index
    %c0_50 = arith.constant 0 : index
    %97 = vector.load %arg11[%96, %c0_49, %c0_50] : memref<8x16x512xbf16, #tpu.memory_space<vmem>>, vector<1x16x512xbf16>
    %98 = vector.shape_cast %97 : vector<1x16x512xbf16> to vector<16x512xbf16>
    %99 = arith.extf %98 : vector<16x512xbf16> to vector<16x512xf32>
    %cst_51 = arith.constant dense<0.000000e+00> : vector<16x512xf32>
    %100 = tpu.matmul %94, %3, %cst_51 {dimension_numbers = #tpu.dot_dimension_numbers<[1], [0], [0], [1], [0, 0, 1, 1], [], []>} : vector<16x128xbf16>, vector<128x512xbf16>, vector<16x512xf32> -> vector<16x512xf32>
    %101 = arith.addf %99, %100 : vector<16x512xf32>
    %102 = vector.extract_strided_slice %101 {offsets = [0, 0], sizes = [16, 128], strides = [1, 1]} : vector<16x512xf32> to vector<16x128xf32>
    %103 = arith.negf %102 : vector<16x128xf32>
    %104 = math.exp %103 : vector<16x128xf32>
    %cst_52 = arith.constant 1.000000e+00 : f32
    %105 = vector.broadcast %cst_52 : f32 to vector<16x128xf32>
    %106 = arith.addf %105, %104 : vector<16x128xf32>
    %107 = arith.divf %105, %106 : vector<16x128xf32>
    %108 = vector.extract_strided_slice %101 {offsets = [0, 128], sizes = [16, 128], strides = [1, 1]} : vector<16x512xf32> to vector<16x128xf32>
    %109 = arith.negf %108 : vector<16x128xf32>
    %110 = math.exp %109 : vector<16x128xf32>
    %cst_53 = arith.constant 1.000000e+00 : f32
    %111 = vector.broadcast %cst_53 : f32 to vector<16x128xf32>
    %112 = arith.addf %111, %110 : vector<16x128xf32>
    %113 = arith.divf %111, %112 : vector<16x128xf32>
    %114 = vector.extract_strided_slice %101 {offsets = [0, 256], sizes = [16, 128], strides = [1, 1]} : vector<16x512xf32> to vector<16x128xf32>
    %115 = math.tanh %114 : vector<16x128xf32>
    %116 = vector.extract_strided_slice %101 {offsets = [0, 384], sizes = [16, 128], strides = [1, 1]} : vector<16x512xf32> to vector<16x128xf32>
    %117 = arith.negf %116 : vector<16x128xf32>
    %118 = math.exp %117 : vector<16x128xf32>
    %cst_54 = arith.constant 1.000000e+00 : f32
    %119 = vector.broadcast %cst_54 : f32 to vector<16x128xf32>
    %120 = arith.addf %119, %118 : vector<16x128xf32>
    %121 = arith.divf %119, %120 : vector<16x128xf32>
    %122 = arith.mulf %113, %95 : vector<16x128xf32>
    %123 = arith.mulf %107, %115 : vector<16x128xf32>
    %124 = arith.addf %122, %123 : vector<16x128xf32>
    %125 = math.tanh %124 : vector<16x128xf32>
    %126 = arith.mulf %121, %125 : vector<16x128xf32>
    %127 = arith.truncf %126 : vector<16x128xf32> to vector<16x128xbf16>
    %c0_55 = arith.constant 0 : index
    %c0_56 = arith.constant 0 : index
    %128 = vector.load %arg9[%c0_55, %c0_56] : memref<16x128xbf16, #tpu.memory_space<vmem>>, vector<16x128xbf16>
    tpu.vector_store %arg9[%c0_55, %c0_56], %127 {strides = array<i32>} : memref<16x128xbf16, #tpu.memory_space<vmem>>, vector<16x128xbf16>,
    %c0_57 = arith.constant 0 : index
    %c0_58 = arith.constant 0 : index
    %129 = vector.load %arg10[%c0_57, %c0_58] : memref<16x128xf32, #tpu.memory_space<vmem>>, vector<16x128xf32>
    tpu.vector_store %arg10[%c0_57, %c0_58], %124 {strides = array<i32>} : memref<16x128xf32, #tpu.memory_space<vmem>>, vector<16x128xf32>,
    %130 = arith.index_cast %c2_i32 : i32 to index
    %c0_59 = arith.constant 0 : index
    %c0_60 = arith.constant 0 : index
    %131 = vector.load %arg8[%130, %c0_59, %c0_60] : memref<8x16x128xbf16, #tpu.memory_space<vmem>>, vector<1x16x128xbf16>
    %132 = vector.shape_cast %131 : vector<1x16x128xbf16> to vector<16x128xbf16>
    %133 = vector.shape_cast %127 : vector<16x128xbf16> to vector<1x16x128xbf16>
    tpu.vector_store %arg8[%130, %c0_59, %c0_60], %133 {strides = array<i32>} : memref<8x16x128xbf16, #tpu.memory_space<vmem>>, vector<1x16x128xbf16>,
    %c3_i32 = arith.constant 3 : i32
    %c0_61 = arith.constant 0 : index
    %c0_62 = arith.constant 0 : index
    %134 = vector.load %arg9[%c0_61, %c0_62] : memref<16x128xbf16, #tpu.memory_space<vmem>>, vector<16x128xbf16>
    %c0_63 = arith.constant 0 : index
    %c0_64 = arith.constant 0 : index
    %135 = vector.load %arg10[%c0_63, %c0_64] : memref<16x128xf32, #tpu.memory_space<vmem>>, vector<16x128xf32>
    %136 = arith.index_cast %c3_i32 : i32 to index
    %c0_65 = arith.constant 0 : index
    %c0_66 = arith.constant 0 : index
    %137 = vector.load %arg11[%136, %c0_65, %c0_66] : memref<8x16x512xbf16, #tpu.memory_space<vmem>>, vector<1x16x512xbf16>
    %138 = vector.shape_cast %137 : vector<1x16x512xbf16> to vector<16x512xbf16>
    %139 = arith.extf %138 : vector<16x512xbf16> to vector<16x512xf32>
    %cst_67 = arith.constant dense<0.000000e+00> : vector<16x512xf32>
    %140 = tpu.matmul %134, %3, %cst_67 {dimension_numbers = #tpu.dot_dimension_numbers<[1], [0], [0], [1], [0, 0, 1, 1], [], []>} : vector<16x128xbf16>, vector<128x512xbf16>, vector<16x512xf32> -> vector<16x512xf32>
    %141 = arith.addf %139, %140 : vector<16x512xf32>
    %142 = vector.extract_strided_slice %141 {offsets = [0, 0], sizes = [16, 128], strides = [1, 1]} : vector<16x512xf32> to vector<16x128xf32>
    %143 = arith.negf %142 : vector<16x128xf32>
    %144 = math.exp %143 : vector<16x128xf32>
    %cst_68 = arith.constant 1.000000e+00 : f32
    %145 = vector.broadcast %cst_68 : f32 to vector<16x128xf32>
    %146 = arith.addf %145, %144 : vector<16x128xf32>
    %147 = arith.divf %145, %146 : vector<16x128xf32>
    %148 = vector.extract_strided_slice %141 {offsets = [0, 128], sizes = [16, 128], strides = [1, 1]} : vector<16x512xf32> to vector<16x128xf32>
    %149 = arith.negf %148 : vector<16x128xf32>
    %150 = math.exp %149 : vector<16x128xf32>
    %cst_69 = arith.constant 1.000000e+00 : f32
    %151 = vector.broadcast %cst_69 : f32 to vector<16x128xf32>
    %152 = arith.addf %151, %150 : vector<16x128xf32>
    %153 = arith.divf %151, %152 : vector<16x128xf32>
    %154 = vector.extract_strided_slice %141 {offsets = [0, 256], sizes = [16, 128], strides = [1, 1]} : vector<16x512xf32> to vector<16x128xf32>
    %155 = math.tanh %154 : vector<16x128xf32>
    %156 = vector.extract_strided_slice %141 {offsets = [0, 384], sizes = [16, 128], strides = [1, 1]} : vector<16x512xf32> to vector<16x128xf32>
    %157 = arith.negf %156 : vector<16x128xf32>
    %158 = math.exp %157 : vector<16x128xf32>
    %cst_70 = arith.constant 1.000000e+00 : f32
    %159 = vector.broadcast %cst_70 : f32 to vector<16x128xf32>
    %160 = arith.addf %159, %158 : vector<16x128xf32>
    %161 = arith.divf %159, %160 : vector<16x128xf32>
    %162 = arith.mulf %153, %135 : vector<16x128xf32>
    %163 = arith.mulf %147, %155 : vector<16x128xf32>
    %164 = arith.addf %162, %163 : vector<16x128xf32>
    %165 = math.tanh %164 : vector<16x128xf32>
    %166 = arith.mulf %161, %165 : vector<16x128xf32>
    %167 = arith.truncf %166 : vector<16x128xf32> to vector<16x128xbf16>
    %c0_71 = arith.constant 0 : index
    %c0_72 = arith.constant 0 : index
    %168 = vector.load %arg9[%c0_71, %c0_72] : memref<16x128xbf16, #tpu.memory_space<vmem>>, vector<16x128xbf16>
    tpu.vector_store %arg9[%c0_71, %c0_72], %167 {strides = array<i32>} : memref<16x128xbf16, #tpu.memory_space<vmem>>, vector<16x128xbf16>,
    %c0_73 = arith.constant 0 : index
    %c0_74 = arith.constant 0 : index
    %169 = vector.load %arg10[%c0_73, %c0_74] : memref<16x128xf32, #tpu.memory_space<vmem>>, vector<16x128xf32>
    tpu.vector_store %arg10[%c0_73, %c0_74], %164 {strides = array<i32>} : memref<16x128xf32, #tpu.memory_space<vmem>>, vector<16x128xf32>,
    %170 = arith.index_cast %c3_i32 : i32 to index
    %c0_75 = arith.constant 0 : index
    %c0_76 = arith.constant 0 : index
    %171 = vector.load %arg8[%170, %c0_75, %c0_76] : memref<8x16x128xbf16, #tpu.memory_space<vmem>>, vector<1x16x128xbf16>
    %172 = vector.shape_cast %171 : vector<1x16x128xbf16> to vector<16x128xbf16>
    %173 = vector.shape_cast %167 : vector<16x128xbf16> to vector<1x16x128xbf16>
    tpu.vector_store %arg8[%170, %c0_75, %c0_76], %173 {strides = array<i32>} : memref<8x16x128xbf16, #tpu.memory_space<vmem>>, vector<1x16x128xbf16>,
    %c4_i32 = arith.constant 4 : i32
    %c0_77 = arith.constant 0 : index
    %c0_78 = arith.constant 0 : index
    %174 = vector.load %arg9[%c0_77, %c0_78] : memref<16x128xbf16, #tpu.memory_space<vmem>>, vector<16x128xbf16>
    %c0_79 = arith.constant 0 : index
    %c0_80 = arith.constant 0 : index
    %175 = vector.load %arg10[%c0_79, %c0_80] : memref<16x128xf32, #tpu.memory_space<vmem>>, vector<16x128xf32>
    %176 = arith.index_cast %c4_i32 : i32 to index
    %c0_81 = arith.constant 0 : index
    %c0_82 = arith.constant 0 : index
    %177 = vector.load %arg11[%176, %c0_81, %c0_82] : memref<8x16x512xbf16, #tpu.memory_space<vmem>>, vector<1x16x512xbf16>
    %178 = vector.shape_cast %177 : vector<1x16x512xbf16> to vector<16x512xbf16>
    %179 = arith.extf %178 : vector<16x512xbf16> to vector<16x512xf32>
    %cst_83 = arith.constant dense<0.000000e+00> : vector<16x512xf32>
    %180 = tpu.matmul %174, %3, %cst_83 {dimension_numbers = #tpu.dot_dimension_numbers<[1], [0], [0], [1], [0, 0, 1, 1], [], []>} : vector<16x128xbf16>, vector<128x512xbf16>, vector<16x512xf32> -> vector<16x512xf32>
    %181 = arith.addf %179, %180 : vector<16x512xf32>
    %182 = vector.extract_strided_slice %181 {offsets = [0, 0], sizes = [16, 128], strides = [1, 1]} : vector<16x512xf32> to vector<16x128xf32>
    %183 = arith.negf %182 : vector<16x128xf32>
    %184 = math.exp %183 : vector<16x128xf32>
    %cst_84 = arith.constant 1.000000e+00 : f32
    %185 = vector.broadcast %cst_84 : f32 to vector<16x128xf32>
    %186 = arith.addf %185, %184 : vector<16x128xf32>
    %187 = arith.divf %185, %186 : vector<16x128xf32>
    %188 = vector.extract_strided_slice %181 {offsets = [0, 128], sizes = [16, 128], strides = [1, 1]} : vector<16x512xf32> to vector<16x128xf32>
    %189 = arith.negf %188 : vector<16x128xf32>
    %190 = math.exp %189 : vector<16x128xf32>
    %cst_85 = arith.constant 1.000000e+00 : f32
    %191 = vector.broadcast %cst_85 : f32 to vector<16x128xf32>
    %192 = arith.addf %191, %190 : vector<16x128xf32>
    %193 = arith.divf %191, %192 : vector<16x128xf32>
    %194 = vector.extract_strided_slice %181 {offsets = [0, 256], sizes = [16, 128], strides = [1, 1]} : vector<16x512xf32> to vector<16x128xf32>
    %195 = math.tanh %194 : vector<16x128xf32>
    %196 = vector.extract_strided_slice %181 {offsets = [0, 384], sizes = [16, 128], strides = [1, 1]} : vector<16x512xf32> to vector<16x128xf32>
    %197 = arith.negf %196 : vector<16x128xf32>
    %198 = math.exp %197 : vector<16x128xf32>
    %cst_86 = arith.constant 1.000000e+00 : f32
    %199 = vector.broadcast %cst_86 : f32 to vector<16x128xf32>
    %200 = arith.addf %199, %198 : vector<16x128xf32>
    %201 = arith.divf %199, %200 : vector<16x128xf32>
    %202 = arith.mulf %193, %175 : vector<16x128xf32>
    %203 = arith.mulf %187, %195 : vector<16x128xf32>
    %204 = arith.addf %202, %203 : vector<16x128xf32>
    %205 = math.tanh %204 : vector<16x128xf32>
    %206 = arith.mulf %201, %205 : vector<16x128xf32>
    %207 = arith.truncf %206 : vector<16x128xf32> to vector<16x128xbf16>
    %c0_87 = arith.constant 0 : index
    %c0_88 = arith.constant 0 : index
    %208 = vector.load %arg9[%c0_87, %c0_88] : memref<16x128xbf16, #tpu.memory_space<vmem>>, vector<16x128xbf16>
    tpu.vector_store %arg9[%c0_87, %c0_88], %207 {strides = array<i32>} : memref<16x128xbf16, #tpu.memory_space<vmem>>, vector<16x128xbf16>,
    %c0_89 = arith.constant 0 : index
    %c0_90 = arith.constant 0 : index
    %209 = vector.load %arg10[%c0_89, %c0_90] : memref<16x128xf32, #tpu.memory_space<vmem>>, vector<16x128xf32>
    tpu.vector_store %arg10[%c0_89, %c0_90], %204 {strides = array<i32>} : memref<16x128xf32, #tpu.memory_space<vmem>>, vector<16x128xf32>,
    %210 = arith.index_cast %c4_i32 : i32 to index
    %c0_91 = arith.constant 0 : index
    %c0_92 = arith.constant 0 : index
    %211 = vector.load %arg8[%210, %c0_91, %c0_92] : memref<8x16x128xbf16, #tpu.memory_space<vmem>>, vector<1x16x128xbf16>
    %212 = vector.shape_cast %211 : vector<1x16x128xbf16> to vector<16x128xbf16>
    %213 = vector.shape_cast %207 : vector<16x128xbf16> to vector<1x16x128xbf16>
    tpu.vector_store %arg8[%210, %c0_91, %c0_92], %213 {strides = array<i32>} : memref<8x16x128xbf16, #tpu.memory_space<vmem>>, vector<1x16x128xbf16>,
    %c5_i32 = arith.constant 5 : i32
    %c0_93 = arith.constant 0 : index
    %c0_94 = arith.constant 0 : index
    %214 = vector.load %arg9[%c0_93, %c0_94] : memref<16x128xbf16, #tpu.memory_space<vmem>>, vector<16x128xbf16>
    %c0_95 = arith.constant 0 : index
    %c0_96 = arith.constant 0 : index
    %215 = vector.load %arg10[%c0_95, %c0_96] : memref<16x128xf32, #tpu.memory_space<vmem>>, vector<16x128xf32>
    %216 = arith.index_cast %c5_i32 : i32 to index
    %c0_97 = arith.constant 0 : index
    %c0_98 = arith.constant 0 : index
    %217 = vector.load %arg11[%216, %c0_97, %c0_98] : memref<8x16x512xbf16, #tpu.memory_space<vmem>>, vector<1x16x512xbf16>
    %218 = vector.shape_cast %217 : vector<1x16x512xbf16> to vector<16x512xbf16>
    %219 = arith.extf %218 : vector<16x512xbf16> to vector<16x512xf32>
    %cst_99 = arith.constant dense<0.000000e+00> : vector<16x512xf32>
    %220 = tpu.matmul %214, %3, %cst_99 {dimension_numbers = #tpu.dot_dimension_numbers<[1], [0], [0], [1], [0, 0, 1, 1], [], []>} : vector<16x128xbf16>, vector<128x512xbf16>, vector<16x512xf32> -> vector<16x512xf32>
    %221 = arith.addf %219, %220 : vector<16x512xf32>
    %222 = vector.extract_strided_slice %221 {offsets = [0, 0], sizes = [16, 128], strides = [1, 1]} : vector<16x512xf32> to vector<16x128xf32>
    %223 = arith.negf %222 : vector<16x128xf32>
    %224 = math.exp %223 : vector<16x128xf32>
    %cst_100 = arith.constant 1.000000e+00 : f32
    %225 = vector.broadcast %cst_100 : f32 to vector<16x128xf32>
    %226 = arith.addf %225, %224 : vector<16x128xf32>
    %227 = arith.divf %225, %226 : vector<16x128xf32>
    %228 = vector.extract_strided_slice %221 {offsets = [0, 128], sizes = [16, 128], strides = [1, 1]} : vector<16x512xf32> to vector<16x128xf32>
    %229 = arith.negf %228 : vector<16x128xf32>
    %230 = math.exp %229 : vector<16x128xf32>
    %cst_101 = arith.constant 1.000000e+00 : f32
    %231 = vector.broadcast %cst_101 : f32 to vector<16x128xf32>
    %232 = arith.addf %231, %230 : vector<16x128xf32>
    %233 = arith.divf %231, %232 : vector<16x128xf32>
    %234 = vector.extract_strided_slice %221 {offsets = [0, 256], sizes = [16, 128], strides = [1, 1]} : vector<16x512xf32> to vector<16x128xf32>
    %235 = math.tanh %234 : vector<16x128xf32>
    %236 = vector.extract_strided_slice %221 {offsets = [0, 384], sizes = [16, 128], strides = [1, 1]} : vector<16x512xf32> to vector<16x128xf32>
    %237 = arith.negf %236 : vector<16x128xf32>
    %238 = math.exp %237 : vector<16x128xf32>
    %cst_102 = arith.constant 1.000000e+00 : f32
    %239 = vector.broadcast %cst_102 : f32 to vector<16x128xf32>
    %240 = arith.addf %239, %238 : vector<16x128xf32>
    %241 = arith.divf %239, %240 : vector<16x128xf32>
    %242 = arith.mulf %233, %215 : vector<16x128xf32>
    %243 = arith.mulf %227, %235 : vector<16x128xf32>
    %244 = arith.addf %242, %243 : vector<16x128xf32>
    %245 = math.tanh %244 : vector<16x128xf32>
    %246 = arith.mulf %241, %245 : vector<16x128xf32>
    %247 = arith.truncf %246 : vector<16x128xf32> to vector<16x128xbf16>
    %c0_103 = arith.constant 0 : index
    %c0_104 = arith.constant 0 : index
    %248 = vector.load %arg9[%c0_103, %c0_104] : memref<16x128xbf16, #tpu.memory_space<vmem>>, vector<16x128xbf16>
    tpu.vector_store %arg9[%c0_103, %c0_104], %247 {strides = array<i32>} : memref<16x128xbf16, #tpu.memory_space<vmem>>, vector<16x128xbf16>,
    %c0_105 = arith.constant 0 : index
    %c0_106 = arith.constant 0 : index
    %249 = vector.load %arg10[%c0_105, %c0_106] : memref<16x128xf32, #tpu.memory_space<vmem>>, vector<16x128xf32>
    tpu.vector_store %arg10[%c0_105, %c0_106], %244 {strides = array<i32>} : memref<16x128xf32, #tpu.memory_space<vmem>>, vector<16x128xf32>,
    %250 = arith.index_cast %c5_i32 : i32 to index
    %c0_107 = arith.constant 0 : index
    %c0_108 = arith.constant 0 : index
    %251 = vector.load %arg8[%250, %c0_107, %c0_108] : memref<8x16x128xbf16, #tpu.memory_space<vmem>>, vector<1x16x128xbf16>
    %252 = vector.shape_cast %251 : vector<1x16x128xbf16> to vector<16x128xbf16>
    %253 = vector.shape_cast %247 : vector<16x128xbf16> to vector<1x16x128xbf16>
    tpu.vector_store %arg8[%250, %c0_107, %c0_108], %253 {strides = array<i32>} : memref<8x16x128xbf16, #tpu.memory_space<vmem>>, vector<1x16x128xbf16>,
    %c6_i32 = arith.constant 6 : i32
    %c0_109 = arith.constant 0 : index
    %c0_110 = arith.constant 0 : index
    %254 = vector.load %arg9[%c0_109, %c0_110] : memref<16x128xbf16, #tpu.memory_space<vmem>>, vector<16x128xbf16>
    %c0_111 = arith.constant 0 : index
    %c0_112 = arith.constant 0 : index
    %255 = vector.load %arg10[%c0_111, %c0_112] : memref<16x128xf32, #tpu.memory_space<vmem>>, vector<16x128xf32>
    %256 = arith.index_cast %c6_i32 : i32 to index
    %c0_113 = arith.constant 0 : index
    %c0_114 = arith.constant 0 : index
    %257 = vector.load %arg11[%256, %c0_113, %c0_114] : memref<8x16x512xbf16, #tpu.memory_space<vmem>>, vector<1x16x512xbf16>
    %258 = vector.shape_cast %257 : vector<1x16x512xbf16> to vector<16x512xbf16>
    %259 = arith.extf %258 : vector<16x512xbf16> to vector<16x512xf32>
    %cst_115 = arith.constant dense<0.000000e+00> : vector<16x512xf32>
    %260 = tpu.matmul %254, %3, %cst_115 {dimension_numbers = #tpu.dot_dimension_numbers<[1], [0], [0], [1], [0, 0, 1, 1], [], []>} : vector<16x128xbf16>, vector<128x512xbf16>, vector<16x512xf32> -> vector<16x512xf32>
    %261 = arith.addf %259, %260 : vector<16x512xf32>
    %262 = vector.extract_strided_slice %261 {offsets = [0, 0], sizes = [16, 128], strides = [1, 1]} : vector<16x512xf32> to vector<16x128xf32>
    %263 = arith.negf %262 : vector<16x128xf32>
    %264 = math.exp %263 : vector<16x128xf32>
    %cst_116 = arith.constant 1.000000e+00 : f32
    %265 = vector.broadcast %cst_116 : f32 to vector<16x128xf32>
    %266 = arith.addf %265, %264 : vector<16x128xf32>
    %267 = arith.divf %265, %266 : vector<16x128xf32>
    %268 = vector.extract_strided_slice %261 {offsets = [0, 128], sizes = [16, 128], strides = [1, 1]} : vector<16x512xf32> to vector<16x128xf32>
    %269 = arith.negf %268 : vector<16x128xf32>
    %270 = math.exp %269 : vector<16x128xf32>
    %cst_117 = arith.constant 1.000000e+00 : f32
    %271 = vector.broadcast %cst_117 : f32 to vector<16x128xf32>
    %272 = arith.addf %271, %270 : vector<16x128xf32>
    %273 = arith.divf %271, %272 : vector<16x128xf32>
    %274 = vector.extract_strided_slice %261 {offsets = [0, 256], sizes = [16, 128], strides = [1, 1]} : vector<16x512xf32> to vector<16x128xf32>
    %275 = math.tanh %274 : vector<16x128xf32>
    %276 = vector.extract_strided_slice %261 {offsets = [0, 384], sizes = [16, 128], strides = [1, 1]} : vector<16x512xf32> to vector<16x128xf32>
    %277 = arith.negf %276 : vector<16x128xf32>
    %278 = math.exp %277 : vector<16x128xf32>
    %cst_118 = arith.constant 1.000000e+00 : f32
    %279 = vector.broadcast %cst_118 : f32 to vector<16x128xf32>
    %280 = arith.addf %279, %278 : vector<16x128xf32>
    %281 = arith.divf %279, %280 : vector<16x128xf32>
    %282 = arith.mulf %273, %255 : vector<16x128xf32>
    %283 = arith.mulf %267, %275 : vector<16x128xf32>
    %284 = arith.addf %282, %283 : vector<16x128xf32>
    %285 = math.tanh %284 : vector<16x128xf32>
    %286 = arith.mulf %281, %285 : vector<16x128xf32>
    %287 = arith.truncf %286 : vector<16x128xf32> to vector<16x128xbf16>
    %c0_119 = arith.constant 0 : index
    %c0_120 = arith.constant 0 : index
    %288 = vector.load %arg9[%c0_119, %c0_120] : memref<16x128xbf16, #tpu.memory_space<vmem>>, vector<16x128xbf16>
    tpu.vector_store %arg9[%c0_119, %c0_120], %287 {strides = array<i32>} : memref<16x128xbf16, #tpu.memory_space<vmem>>, vector<16x128xbf16>,
    %c0_121 = arith.constant 0 : index
    %c0_122 = arith.constant 0 : index
    %289 = vector.load %arg10[%c0_121, %c0_122] : memref<16x128xf32, #tpu.memory_space<vmem>>, vector<16x128xf32>
    tpu.vector_store %arg10[%c0_121, %c0_122], %284 {strides = array<i32>} : memref<16x128xf32, #tpu.memory_space<vmem>>, vector<16x128xf32>,
    %290 = arith.index_cast %c6_i32 : i32 to index
    %c0_123 = arith.constant 0 : index
    %c0_124 = arith.constant 0 : index
    %291 = vector.load %arg8[%290, %c0_123, %c0_124] : memref<8x16x128xbf16, #tpu.memory_space<vmem>>, vector<1x16x128xbf16>
    %292 = vector.shape_cast %291 : vector<1x16x128xbf16> to vector<16x128xbf16>
    %293 = vector.shape_cast %287 : vector<16x128xbf16> to vector<1x16x128xbf16>
    tpu.vector_store %arg8[%290, %c0_123, %c0_124], %293 {strides = array<i32>} : memref<8x16x128xbf16, #tpu.memory_space<vmem>>, vector<1x16x128xbf16>,
    %c7_i32 = arith.constant 7 : i32
    %c0_125 = arith.constant 0 : index
    %c0_126 = arith.constant 0 : index
    %294 = vector.load %arg9[%c0_125, %c0_126] : memref<16x128xbf16, #tpu.memory_space<vmem>>, vector<16x128xbf16>
    %c0_127 = arith.constant 0 : index
    %c0_128 = arith.constant 0 : index
    %295 = vector.load %arg10[%c0_127, %c0_128] : memref<16x128xf32, #tpu.memory_space<vmem>>, vector<16x128xf32>
    %296 = arith.index_cast %c7_i32 : i32 to index
    %c0_129 = arith.constant 0 : index
    %c0_130 = arith.constant 0 : index
    %297 = vector.load %arg11[%296, %c0_129, %c0_130] : memref<8x16x512xbf16, #tpu.memory_space<vmem>>, vector<1x16x512xbf16>
    %298 = vector.shape_cast %297 : vector<1x16x512xbf16> to vector<16x512xbf16>
    %299 = arith.extf %298 : vector<16x512xbf16> to vector<16x512xf32>
    %cst_131 = arith.constant dense<0.000000e+00> : vector<16x512xf32>
    %300 = tpu.matmul %294, %3, %cst_131 {dimension_numbers = #tpu.dot_dimension_numbers<[1], [0], [0], [1], [0, 0, 1, 1], [], []>} : vector<16x128xbf16>, vector<128x512xbf16>, vector<16x512xf32> -> vector<16x512xf32>
    %301 = arith.addf %299, %300 : vector<16x512xf32>
    %302 = vector.extract_strided_slice %301 {offsets = [0, 0], sizes = [16, 128], strides = [1, 1]} : vector<16x512xf32> to vector<16x128xf32>
    %303 = arith.negf %302 : vector<16x128xf32>
    %304 = math.exp %303 : vector<16x128xf32>
    %cst_132 = arith.constant 1.000000e+00 : f32
    %305 = vector.broadcast %cst_132 : f32 to vector<16x128xf32>
    %306 = arith.addf %305, %304 : vector<16x128xf32>
    %307 = arith.divf %305, %306 : vector<16x128xf32>
    %308 = vector.extract_strided_slice %301 {offsets = [0, 128], sizes = [16, 128], strides = [1, 1]} : vector<16x512xf32> to vector<16x128xf32>
    %309 = arith.negf %308 : vector<16x128xf32>
    %310 = math.exp %309 : vector<16x128xf32>
    %cst_133 = arith.constant 1.000000e+00 : f32
    %311 = vector.broadcast %cst_133 : f32 to vector<16x128xf32>
    %312 = arith.addf %311, %310 : vector<16x128xf32>
    %313 = arith.divf %311, %312 : vector<16x128xf32>
    %314 = vector.extract_strided_slice %301 {offsets = [0, 256], sizes = [16, 128], strides = [1, 1]} : vector<16x512xf32> to vector<16x128xf32>
    %315 = math.tanh %314 : vector<16x128xf32>
    %316 = vector.extract_strided_slice %301 {offsets = [0, 384], sizes = [16, 128], strides = [1, 1]} : vector<16x512xf32> to vector<16x128xf32>
    %317 = arith.negf %316 : vector<16x128xf32>
    %318 = math.exp %317 : vector<16x128xf32>
    %cst_134 = arith.constant 1.000000e+00 : f32
    %319 = vector.broadcast %cst_134 : f32 to vector<16x128xf32>
    %320 = arith.addf %319, %318 : vector<16x128xf32>
    %321 = arith.divf %319, %320 : vector<16x128xf32>
    %322 = arith.mulf %313, %295 : vector<16x128xf32>
    %323 = arith.mulf %307, %315 : vector<16x128xf32>
    %324 = arith.addf %322, %323 : vector<16x128xf32>
    %325 = math.tanh %324 : vector<16x128xf32>
    %326 = arith.mulf %321, %325 : vector<16x128xf32>
    %327 = arith.truncf %326 : vector<16x128xf32> to vector<16x128xbf16>
    %c0_135 = arith.constant 0 : index
    %c0_136 = arith.constant 0 : index
    %328 = vector.load %arg9[%c0_135, %c0_136] : memref<16x128xbf16, #tpu.memory_space<vmem>>, vector<16x128xbf16>
    tpu.vector_store %arg9[%c0_135, %c0_136], %327 {strides = array<i32>} : memref<16x128xbf16, #tpu.memory_space<vmem>>, vector<16x128xbf16>,
    %c0_137 = arith.constant 0 : index
    %c0_138 = arith.constant 0 : index
    %329 = vector.load %arg10[%c0_137, %c0_138] : memref<16x128xf32, #tpu.memory_space<vmem>>, vector<16x128xf32>
    tpu.vector_store %arg10[%c0_137, %c0_138], %324 {strides = array<i32>} : memref<16x128xf32, #tpu.memory_space<vmem>>, vector<16x128xf32>,
    %330 = arith.index_cast %c7_i32 : i32 to index
    %c0_139 = arith.constant 0 : index
    %c0_140 = arith.constant 0 : index
    %331 = vector.load %arg8[%330, %c0_139, %c0_140] : memref<8x16x128xbf16, #tpu.memory_space<vmem>>, vector<1x16x128xbf16>
    %332 = vector.shape_cast %331 : vector<1x16x128xbf16> to vector<16x128xbf16>
    %333 = vector.shape_cast %327 : vector<16x128xbf16> to vector<1x16x128xbf16>
    tpu.vector_store %arg8[%330, %c0_139, %c0_140], %333 {strides = array<i32>} : memref<8x16x128xbf16, #tpu.memory_space<vmem>>, vector<1x16x128xbf16>,
    %c8_i32 = arith.constant 8 : i32
    return
  }
  func.func @transform_0(%arg0: i32, %arg1: i32) -> (i32, i32, i32) {
    %c0_i32 = arith.constant 0 : i32
    %c0_i32_0 = arith.constant 0 : i32
    return %arg1, %arg0, %c0_i32 : i32, i32, i32
  }
  func.func @transform_1(%arg0: i32, %arg1: i32) -> (i32, i32) {
    %c0_i32 = arith.constant 0 : i32
    %c0_i32_0 = arith.constant 0 : i32
    %c0_i32_1 = arith.constant 0 : i32
    return %c0_i32, %c0_i32_0 : i32, i32
  }
  func.func @transform_2(%arg0: i32, %arg1: i32) -> (i32, i32) {
    %c0_i32 = arith.constant 0 : i32
    %c0_i32_0 = arith.constant 0 : i32
    %c0_i32_1 = arith.constant 0 : i32
    return %c0_i32, %c0_i32_0 : i32, i32
  }
  func.func @transform_3(%arg0: i32, %arg1: i32) -> (i32, i32) {
    %c0_i32 = arith.constant 0 : i32
    %c0_i32_0 = arith.constant 0 : i32
    %c0_i32_1 = arith.constant 0 : i32
    return %c0_i32, %c0_i32_0 : i32, i32
  }
  func.func @transform_4(%arg0: i32, %arg1: i32) -> (i32, i32) {
    %c0_i32 = arith.constant 0 : i32
    %c0_i32_0 = arith.constant 0 : i32
    return %arg0, %c0_i32 : i32, i32
  }
  func.func @transform_5(%arg0: i32, %arg1: i32) -> (i32, i32) {
    %c0_i32 = arith.constant 0 : i32
    %c0_i32_0 = arith.constant 0 : i32
    return %arg0, %c0_i32 : i32, i32
  }
  func.func @transform_6(%arg0: i32, %arg1: i32) -> (i32, i32, i32) {
    %c0_i32 = arith.constant 0 : i32
    %c0_i32_0 = arith.constant 0 : i32
    return %arg1, %arg0, %c0_i32 : i32, i32, i32
  }
}

</mosaic_0001>

<bundles_post_ra>
// kernel: lstm_forward.2
= control target key start
LH: loop header
LB: loop body
LE: loop exit
PB: predicated region body
PF: predicated region fallthrough
CT: control target
= control target key end

     0   :  { %11 = vsyncpa [#allocation6], 0  ;;  %s2619_s21 = smov [#allocation5]   ;;  %s3432_s0 = inlined_call_operand.vmem [shape: bf16[8,16,4], index: 0, kind: input, shape index: {}]   ;;  %s3433_s1 = inlined_call_operand.vmem [shape: bf16[4,512], index: 1, kind: input, shape index: {}]   ;;  %s3434_s2 = inlined_call_operand.hbm [shape: bf16[128,512], index: 2, kind: input, shape index: {}]   ;;  %s3435_s3 = inlined_call_operand.vmem [shape: f32[1,512], index: 3, kind: input, shape index: {}]   ;;  %s3436_s4 = inlined_call_operand.vmem [shape: f32[16,128], index: 4, kind: input, shape index: {}]   ;;  %s3437_s5 = inlined_call_operand.vmem [shape: f32[16,128], index: 5, kind: input, shape index: {}]   ;;  %s3438_s6 = inlined_call_operand.vmem [shape: bf16[8,16,128], index: 6, kind: output, shape index: {}]  }
   0x1   :  { %s21_s22 = sshll.u32 %s2619_s21, 4  ;;  %s2595_s25 = scalar_lea.hbm %s3434_s2, 4096  ;;  %s22_s22 = int_to_ptr.vmem [resolvable:$true] %s21_s22 }
   0x2   :  { %p2596_p0 = scmp.ne.s32.totalorder %s3434_s2, %s2595_s25  ;;  %p2599_p1 = scmp.lt.u32.totalorder %s2595_s25, %s3434_s2 }
   0x4   :  { %p2601_p2 = pnand %p2599_p1, %p2596_p0 }
   0x6   :  { %2604 = shalt.err (!%p2601_p2)
}
   0x7   :  { %s2605_s30 = scalar_lea.vmem %s22_s22, 4096  ;;  %p2610_p4 = scmp.lt.s32.totalorder %s22_s22, %s22_s22 }
   0x8   :  { %p2606_p3 = scmp.ne.s32.totalorder %s22_s22, %s2605_s30  ;;  %p2611_p5 = scmp.lt.s32.totalorder %s2605_s30, %s2605_s30 }
   0xa   :  { %p2612_p6 = por %p2611_p5, %p2610_p4 }
   0xc   :  { %p2613_p7 = pnand %p2612_p6, %p2606_p3 }
   0xe   :  { %2616 = shalt.err (!%p2613_p7)
}
   0xf   :  { %s2620_s7 = smov 256   ;;  %s2621_s8 = smov 16  }
  0x10   :  { %27 = dma.hbm_to_vmem [thread:$0]  %s3434_s2, 4096, %s22_s22, [#allocation6], %s2620_s7, %s2620_s7, %s2621_s8  }
  0x11   :  { %2617 = dma.done.wait [#allocation6], 4096  }
  0x12   :  { %2618 = vsyncadd [#allocation6], 4294963200  ;;  %v101_v0 = vlaneseq  ;;  %v2622_v1 = vmov 1983009808   ;;  %v3439_v3 = vmov 0   ;;  %v98_v7 = vld [vmem:[%s3433_s1] sm:$0xff] }
  0x13   :  { %v164_v2 = vunpack.c.l.s4 %v2622_v1  ;;  %249 = vmatprep.mubr.bf16.mxu0 %v3439_v3  ;;  %362 = vmatprep.mubr.bf16.mxu1 %v3439_v3  ;;  %vm204_vm0 = vcmask 1041408   ;;  %v162_v9 = vcombine.high %v98_v7, %v98_v7  ;;  %v2679_v13 = vld [vmem:[#allocation5 + $0x4] ss:$16 sps:$4 sm:$0xff]   ;;  %v2681_v14 = vld [vmem:[#allocation5] ss:$16 sps:$4 sm:$0xff]   ;;  %vm179_vm1 = vcmask 31744  }
  0x14   :  { %v2673_v4 = vshrl.u32 %v101_v0, 7  ;;  %v2251_v17 = vld [vmem:[%s3432_s0] sm:$0xff]   ;;  %v2686_v18 = vld [vmem:[#allocation5 + $0xc] ss:$16 sps:$4 sm:$0xff]   ;;  %v2691_v20 = vld [vmem:[#allocation5 + $0x8] ss:$16 sps:$4 sm:$0xff]  }
  0x15   :  { %v165_v5 = vunpack.c.0.s8 %v164_v2  ;;  %v2689_v19 = vld [vmem:[#allocation5 + $0x24] ss:$16 sps:$4 sm:$0xff]   ;;  %v2695_v21 = vld [vmem:[#allocation5 + $0x2c] ss:$16 sps:$4 sm:$0xff]   ;;  %v2699_v22 = vld [vmem:[#allocation5 + $0x20] ss:$16 sps:$4 sm:$0xff]  }
  0x16   :  { %v2255_v23 = vld [vmem:[%s3432_s0 + $0x8] sm:$0xff]   ;;  %v2706_v24 = vld [vmem:[#allocation5 + $0x44] ss:$16 sps:$4 sm:$0xff]   ;;  %v2716_v27 = vld [vmem:[#allocation5 + $0x40] ss:$16 sps:$4 sm:$0xff]   ;;  %v103_v58 = vsub.s32 0, %v2673_v4 }
  0x17   :  { %v168_v6 = vsub.s32 %v165_v5, %v2673_v4  ;;  %v2710_v25 = vld [vmem:[#allocation5 + $0x28] ss:$16 sps:$4 sm:$0xff]   ;;  %v2713_v26 = vld [vmem:[#allocation5 + $0x4c] ss:$16 sps:$4 sm:$0xff]   ;;  %v2719_v28 = vld [vmem:[#allocation5 + $0x64] ss:$16 sps:$4 sm:$0xff]  }
  0x18   :  { %v2722_v29 = vld [vmem:[#allocation5 + $0x48] ss:$16 sps:$4 sm:$0xff]   ;;  %v2726_v30 = vld [vmem:[#allocation5 + $0x6c] ss:$16 sps:$4 sm:$0xff]   ;;  %v2730_v31 = vld [vmem:[#allocation5 + $0x60] ss:$16 sps:$4 sm:$0xff]  }
  0x19   :  { %v169_v8 = vrot.slane %v98_v7, %v168_v6  ;;  %v176_v12 = vrot.slane %v162_v9, %v168_v6  ;;  %v2261_v32 = vld [vmem:[%s3432_s0 + $0x10] sm:$0xff]   ;;  %v2741_v34 = vld [vmem:[#allocation5 + $0x68] ss:$16 sps:$4 sm:$0xff]   ;;  %v2744_v35 = vld [vmem:[#allocation5 + $0x8c] ss:$16 sps:$4 sm:$0xff]   ;;  %v107_v60 = vsub.s32 1, %v2673_v4 }
  0x1a   :  { %v2737_v33 = vld [vmem:[#allocation5 + $0x84] ss:$16 sps:$4 sm:$0xff]   ;;  %v2747_v36 = vld [vmem:[#allocation5 + $0x80] ss:$16 sps:$4 sm:$0xff]   ;;  %v2753_v38 = vld [vmem:[#allocation5 + $0x88] ss:$16 sps:$4 sm:$0xff]  }
  0x1b   :  { %v177_v10 = vcombine.high %v169_v8, %v169_v8  ;;  %v206_v11 = vsel %vm204_vm0, %v169_v8, 0  ;;  %v178_v15 = vcombine.high %v176_v12, %v176_v12  ;;  %v212_v16 = vsel %vm204_vm0, %v176_v12, 0  ;;  %v2750_v37 = vld [vmem:[#allocation5 + $0xa4] ss:$16 sps:$4 sm:$0xff]   ;;  %v2757_v39 = vld [vmem:[#allocation5 + $0xac] ss:$16 sps:$4 sm:$0xff]  }
  0x1c   :  { %v2761_v40 = vld [vmem:[#allocation5 + $0xa0] ss:$16 sps:$4 sm:$0xff]   ;;  %v2765_v41 = vld [vmem:[#allocation5 + $0xc4] ss:$16 sps:$4 sm:$0xff]   ;;  %v2769_v42 = vld [vmem:[#allocation5 + $0xa8] ss:$16 sps:$4 sm:$0xff]  }
  0x1d   :  { %2054 = vmatprep.subr.msk.bf16.mxu0 %vm204_vm0, %v177_v10  ;;  %2063 = vmatprep.subr.msk.bf16.mxu1 %vm204_vm0, %v178_v15  ;;  %v2268_v43 = vld [vmem:[%s3432_s0 + $0x18] sm:$0xff]   ;;  %v2778_v45 = vld [vmem:[#allocation5 + $0xc0] ss:$16 sps:$4 sm:$0xff]   ;;  %v2781_v46 = vld [vmem:[#allocation5 + $0xe4] ss:$16 sps:$4 sm:$0xff]   ;;  %v111_v61 = vsub.s32 2, %v2673_v4 }
  0x1e   :  { %218 = vmatpush1.bf16.msra.mxu0 %v206_v11  ;;  %331 = vmatpush1.bf16.msra.mxu1 %v212_v16  ;;  %v2775_v44 = vld [vmem:[#allocation5 + $0xcc] ss:$16 sps:$4 sm:$0xff]   ;;  %v2784_v47 = vld [vmem:[#allocation5 + $0xc8] ss:$16 sps:$4 sm:$0xff]   ;;  %v2792_v49 = vld [vmem:[#allocation5 + $0xe0] ss:$16 sps:$4 sm:$0xff]  }
  0x1f   :  { %682 = vmatprep.subr.bf16.mxu0 %v2679_v13  ;;  %725 = vmatprep.subr.bf16.mxu1 %v2686_v18  ;;  %v2788_v48 = vld [vmem:[#allocation5 + $0xec] ss:$16 sps:$4 sm:$0xff]   ;;  %v2798_v50 = vld [vmem:[#allocation5 + $0xe8] ss:$16 sps:$4 sm:$0xff]   ;;  %v2275_v51 = vld [vmem:[%s3432_s0 + $0x20] sm:$0xff]   ;;  %v115_v62 = vsub.s32 3, %v2673_v4 }
  0x20   :  { %v2282_v52 = vld [vmem:[%s3432_s0 + $0x28] sm:$0xff]   ;;  %v2289_v53 = vld [vmem:[%s3432_s0 + $0x30] sm:$0xff]   ;;  %v2297_v54 = vld [vmem:[%s3432_s0 + $0x38] sm:$0xff]  }
  0x21   :  { %2055 = vmatmul.mubr.msk.bf16.vlgmr.msra.gmra.mrb[0].mxu0 %vm179_vm1, %v2251_v17  ;;  %2064 = vmatmul.mubr.msk.bf16.vlgmr.msra.gmra.mrb[0].mxu1 %vm179_vm1, %v2251_v17  ;;  %v42_v55 = vld [vmem:[%s3436_s4] sm:$0xff]  ;;  %v43_v56 = vld [vmem:[%s3436_s4 + $0x8] sm:$0xff] }
  0x22   :  { %683 = vmatpush1.bf16.msra.mxu0 %v2681_v14  ;;  %259 = vmatprep.mubr.bf16.mxu0 %v3439_v3  ;;  %v44_v57 = vpack.c.bf16 %v43_v56, %v42_v55  ;;  %v99_v59 = vld [vmem:[%s3435_s3] sm:$0xf] }
  0x23   :  { %684 = vmatprep.subr.bf16.mxu0 %v2689_v19  ;;  %372 = vmatprep.mubr.bf16.mxu1 %v3439_v3  ;;  %v2880_v63 = vrot.slane %v99_v59, %v103_v58  ;;  %v2882_v0 = vrot.slane %v99_v59, %v107_v60  ;;  %v2884_v1 = vrot.slane %v99_v59, %v111_v61 }
  0x24   :  { %726 = vmatpush1.bf16.msra.mxu1 %v2691_v20  ;;  %v2886_v2 = vrot.slane %v99_v59, %v115_v62 }
  0x25   :  { %727 = vmatprep.subr.bf16.mxu1 %v2695_v21 }
  0x26   :  { %685 = vmatpush1.bf16.msra.mxu0 %v2699_v22 }
  0x27   :  { %686 = vmatprep.subr.bf16.mxu0 %v2706_v24 }
  0x28   :  { %728 = vmatpush1.bf16.msra.mxu1 %v2710_v25 }
  0x29   :  { %2056 = vmatmul.mubr.msk.bf16.gmra.mrb[4].mxu0 %vm179_vm1, %v2255_v23  ;;  %729 = vmatprep.subr.bf16.mxu1 %v2713_v26 }
  0x2a   :  { %269 = vmatprep.mubr.bf16.mxu0 %v3439_v3  ;;  %687 = vmatpush1.bf16.msra.mxu0 %v2716_v27 }
  0x2b   :  { %2065 = vmatmul.mubr.msk.bf16.gmra.mrb[4].mxu1 %vm179_vm1, %v2255_v23  ;;  %688 = vmatprep.subr.bf16.mxu0 %v2719_v28 }
  0x2c   :  { %382 = vmatprep.mubr.bf16.mxu1 %v3439_v3  ;;  %730 = vmatpush1.bf16.msra.mxu1 %v2722_v29 }
  0x2d   :  { %731 = vmatprep.subr.bf16.mxu1 %v2726_v30 }
  0x2e   :  { %689 = vmatpush1.bf16.msra.mxu0 %v2730_v31 }
  0x2f   :  { %690 = vmatprep.subr.bf16.mxu0 %v2737_v33 }
  0x30   :  { %732 = vmatpush1.bf16.msra.mxu1 %v2741_v34 }
  0x31   :  { %2057 = vmatmul.mubr.msk.bf16.gmra.mrb[8].mxu0 %vm179_vm1, %v2261_v32  ;;  %733 = vmatprep.subr.bf16.mxu1 %v2744_v35 }
  0x32   :  { %279 = vmatprep.mubr.bf16.mxu0 %v3439_v3  ;;  %691 = vmatpush1.bf16.msra.mxu0 %v2747_v36 }
  0x33   :  { %2066 = vmatmul.mubr.msk.bf16.gmra.mrb[8].mxu1 %vm179_vm1, %v2261_v32  ;;  %692 = vmatprep.subr.bf16.mxu0 %v2750_v37 }
  0x34   :  { %392 = vmatprep.mubr.bf16.mxu1 %v3439_v3  ;;  %734 = vmatpush1.bf16.msra.mxu1 %v2753_v38 }
  0x35   :  { %735 = vmatprep.subr.bf16.mxu1 %v2757_v39 }
  0x36   :  { %693 = vmatpush1.bf16.msra.mxu0 %v2761_v40 }
  0x37   :  { %694 = vmatprep.subr.bf16.mxu0 %v2765_v41 }
  0x38   :  { %736 = vmatpush1.bf16.msra.mxu1 %v2769_v42 }
  0x39   :  { %2058 = vmatmul.mubr.msk.bf16.gmra.mrb[12].mxu0 %vm179_vm1, %v2268_v43  ;;  %737 = vmatprep.subr.bf16.mxu1 %v2775_v44 }
  0x3a   :  { %289 = vmatprep.mubr.bf16.mxu0 %v3439_v3  ;;  %695 = vmatpush1.bf16.msra.mxu0 %v2778_v45 }
  0x3b   :  { %2067 = vmatmul.mubr.msk.bf16.gmra.mrb[12].mxu1 %vm179_vm1, %v2268_v43  ;;  %696 = vmatprep.subr.bf16.mxu0 %v2781_v46 }
  0x3c   :  { %402 = vmatprep.mubr.bf16.mxu1 %v3439_v3  ;;  %738 = vmatpush1.bf16.msra.mxu1 %v2784_v47 }
  0x3d   :  { %739 = vmatprep.subr.bf16.mxu1 %v2788_v48 }
  0x3e   :  { %697 = vmatpush1.bf16.msra.mxu0 %v2792_v49 }
  0x3f   :  { %853 = vmatprep.subr.bf16.mxu0 %v2679_v13 }
  0x40   :  { %740 = vmatpush1.bf16.msra.mxu1 %v2798_v50 }
  0x41   :  { %2059 = vmatmul.mubr.msk.bf16.gmra.mrb[16].mxu0 %vm179_vm1, %v2275_v51  ;;  %896 = vmatprep.subr.bf16.mxu1 %v2686_v18 }
  0x42   :  { %299 = vmatprep.mubr.bf16.mxu0 %v3439_v3 }
  0x43   :  { %2068 = vmatmul.mubr.msk.bf16.gmra.mrb[16].mxu1 %vm179_vm1, %v2275_v51 }
  0x44   :  { %412 = vmatprep.mubr.bf16.mxu1 %v3439_v3 }
  0x49   :  { %2060 = vmatmul.mubr.msk.bf16.gmra.mrb[20].mxu0 %vm179_vm1, %v2282_v52 }
  0x4a   :  { %309 = vmatprep.mubr.bf16.mxu0 %v3439_v3 }
  0x4b   :  { %2069 = vmatmul.mubr.msk.bf16.gmra.mrb[20].mxu1 %vm179_vm1, %v2282_v52 }
  0x4c   :  { %422 = vmatprep.mubr.bf16.mxu1 %v3439_v3 }
  0x51   :  { %2061 = vmatmul.mubr.msk.bf16.gmra.mrb[24].mxu0 %vm179_vm1, %v2289_v53 }
  0x52   :  { %319 = vmatprep.mubr.bf16.mxu0 %v3439_v3 }
  0x53   :  { %2070 = vmatmul.mubr.msk.bf16.gmra.mrb[24].mxu1 %vm179_vm1, %v2289_v53 }
  0x54   :  { %432 = vmatprep.mubr.bf16.mxu1 %v3439_v3 }
  0x59   :  { %2062 = vmatmul.mubr.msk.bf16.gmra.mrb[28].mxu0 %vm179_vm1, %v2297_v54 }
  0x5a   :  { %714 = vmatprep.mubr.bf16.mxu0 %v3439_v3 }
  0x5b   :  { %2071 = vmatmul.mubr.msk.bf16.gmra.mrb[28].mxu1 %vm179_vm1, %v2297_v54 }
  0x5c   :  { %757 = vmatprep.mubr.bf16.mxu1 %v3439_v3 }
  0x61   :  { %715 = vmatmul.mubr.bf16.vlgmr.msra.gmra.mrb[32].mxu0 %v44_v57 }
  0x62   :  { %854 = vmatpush1.bf16.msra.mxu0 %v2681_v14  ;;  %885 = vmatprep.mubr.bf16.mxu0 %v3439_v3 }
  0x63   :  { %758 = vmatmul.mubr.bf16.vlgmr.msra.gmra.mrb[32].mxu1 %v44_v57  ;;  %855 = vmatprep.subr.bf16.mxu0 %v2689_v19 }
  0x64   :  { %897 = vmatpush1.bf16.msra.mxu1 %v2691_v20  ;;  %928 = vmatprep.mubr.bf16.mxu1 %v3439_v3 }
  0x65   :  { %898 = vmatprep.subr.bf16.mxu1 %v2695_v21 }
  0x66   :  { %856 = vmatpush1.bf16.msra.mxu0 %v2699_v22 }
  0x67   :  { %857 = vmatprep.subr.bf16.mxu0 %v2706_v24 }
  0x68   :  { %899 = vmatpush1.bf16.msra.mxu1 %v2710_v25 }
  0x69   :  { %900 = vmatprep.subr.bf16.mxu1 %v2713_v26 }
  0x6a   :  { %858 = vmatpush1.bf16.msra.mxu0 %v2716_v27 }
  0x6b   :  { %859 = vmatprep.subr.bf16.mxu0 %v2719_v28 }
  0x6c   :  { %901 = vmatpush1.bf16.msra.mxu1 %v2722_v29 }
  0x6d   :  { %902 = vmatprep.subr.bf16.mxu1 %v2726_v30 }
  0x6e   :  { %860 = vmatpush1.bf16.msra.mxu0 %v2730_v31 }
  0x6f   :  { %861 = vmatprep.subr.bf16.mxu0 %v2737_v33 }
  0x70   :  { %903 = vmatpush1.bf16.msra.mxu1 %v2741_v34 }
  0x71   :  { %904 = vmatprep.subr.bf16.mxu1 %v2744_v35 }
  0x72   :  { %862 = vmatpush1.bf16.msra.mxu0 %v2747_v36 }
  0x73   :  { %863 = vmatprep.subr.bf16.mxu0 %v2750_v37 }
  0x74   :  { %905 = vmatpush1.bf16.msra.mxu1 %v2753_v38 }
  0x75   :  { %906 = vmatprep.subr.bf16.mxu1 %v2757_v39 }
  0x76   :  { %864 = vmatpush1.bf16.msra.mxu0 %v2761_v40 }
  0x77   :  { %865 = vmatprep.subr.bf16.mxu0 %v2765_v41 }
  0x78   :  { %907 = vmatpush1.bf16.msra.mxu1 %v2769_v42 }
  0x79   :  { %908 = vmatprep.subr.bf16.mxu1 %v2775_v44 }
  0x7a   :  { %866 = vmatpush1.bf16.msra.mxu0 %v2778_v45 }
  0x7b   :  { %867 = vmatprep.subr.bf16.mxu0 %v2781_v46 }
  0x7c   :  { %909 = vmatpush1.bf16.msra.mxu1 %v2784_v47 }
  0x7d   :  { %910 = vmatprep.subr.bf16.mxu1 %v2788_v48 }
  0x7e   :  { %868 = vmatpush1.bf16.msra.mxu0 %v2792_v49 }
  0x7f   :  { %1025 = vmatprep.subr.bf16.mxu0 %v2679_v13 }
  0x80   :  { %911 = vmatpush1.bf16.msra.mxu1 %v2798_v50 }
  0x81   :  { %1068 = vmatprep.subr.bf16.mxu1 %v2686_v18 }
  0xf4   :  { %v251_v5 = vpop.f32.mrb[0].mxu0  ;;  %v364_v10 = vpop.f32.mrb[0].mxu1 }
  0xf5   :  { %v252_v6 = vadd.f32 %v251_v5, %v2880_v63  ;;  %v253_v7 = vpop.f32.mrb[1].mxu0  ;;  %v365_v4 = vadd.f32 %v364_v10, %v2884_v1  ;;  %v366_v15 = vpop.f32.mrb[1].mxu1 }
  0xf6   :  { %v254_v8 = vadd.f32 %v253_v7, %v2882_v0  ;;  %v255_v9 = vpop.f32.mrb[2].mxu0  ;;  %v367_v17 = vadd.f32 %v366_v15, %v2886_v2  ;;  %v368_v23 = vpop.f32.mrb[2].mxu1 }
  0xf7   :  { %v256_v11 = vadd.f32 %v255_v9, %v2880_v63  ;;  %v257_v12 = vpop.f32.mrb[3].mxu0  ;;  %v369_v43 = vadd.f32 %v368_v23, %v2884_v1  ;;  %v370_v51 = vpop.f32.mrb[3].mxu1 }
  0xf8   :  { %v258_v16 = vadd.f32 %v257_v12, %v2882_v0  ;;  %v371_v53 = vadd.f32 %v370_v51, %v2886_v2 }
  0xf9   :  { %v2894_v32 = vpack.c.bf16 %v256_v11, %v252_v6  ;;  %v2900_v54 = vpack.c.bf16 %v369_v43, %v365_v4 }
  0xfa   :  { %v2897_v52 = vpack.c.bf16 %v258_v16, %v254_v8  ;;  %v2902_v56 = vpack.c.bf16 %v371_v53, %v367_v17 }
  0xfc   :  { %v261_v55 = vpop.f32.mrb[4].mxu0 }
  0xfd   :  { %v262_v57 = vadd.f32 %v261_v55, %v2880_v63  ;;  %v263_v58 = vpop.f32.mrb[5].mxu0 }
  0xfe   :  { %v264_v59 = vadd.f32 %v263_v58, %v2882_v0  ;;  %v265_v60 = vpop.f32.mrb[6].mxu0  ;;  %v374_v61 = vpop.f32.mrb[4].mxu1 }
  0xff   :  { %v266_v62 = vadd.f32 %v265_v60, %v2880_v63  ;;  %v267_v5 = vpop.f32.mrb[7].mxu0  ;;  %v375_v6 = vadd.f32 %v374_v61, %v2884_v1  ;;  %v376_v7 = vpop.f32.mrb[5].mxu1 }
 0x100   :  { %v268_v8 = vadd.f32 %v267_v5, %v2882_v0  ;;  %v377_v9 = vadd.f32 %v376_v7, %v2886_v2  ;;  %v378_v10 = vpop.f32.mrb[6].mxu1 }
 0x101   :  { %v2910_v11 = vpack.c.bf16 %v266_v62, %v262_v57  ;;  %v379_v12 = vadd.f32 %v378_v10, %v2884_v1  ;;  %v380_v4 = vpop.f32.mrb[7].mxu1 }
 0x102   :  { %v2913_v15 = vpack.c.bf16 %v268_v8, %v264_v59  ;;  %v381_v16 = vadd.f32 %v380_v4, %v2886_v2 }
 0x103   :  { %v2916_v17 = vpack.c.bf16 %v379_v12, %v375_v6 }
 0x104   :  { %v271_v23 = vpop.f32.mrb[8].mxu0  ;;  %v2918_v43 = vpack.c.bf16 %v381_v16, %v377_v9 }
 0x105   :  { %v272_v51 = vadd.f32 %v271_v23, %v2880_v63  ;;  %v273_v53 = vpop.f32.mrb[9].mxu0 }
 0x106   :  { %v274_v55 = vadd.f32 %v273_v53, %v2882_v0  ;;  %v275_v58 = vpop.f32.mrb[10].mxu0  ;;  %v384_v57 = vpop.f32.mrb[8].mxu1 }
 0x107   :  { %v276_v60 = vadd.f32 %v275_v58, %v2880_v63  ;;  %v277_v61 = vpop.f32.mrb[11].mxu0  ;;  %v385_v59 = vadd.f32 %v384_v57, %v2884_v1  ;;  %v386_v62 = vpop.f32.mrb[9].mxu1 }
 0x108   :  { %v278_v5 = vadd.f32 %v277_v61, %v2882_v0  ;;  %v387_v6 = vadd.f32 %v386_v62, %v2886_v2  ;;  %v388_v7 = vpop.f32.mrb[10].mxu1 }
 0x109   :  { %v2926_v8 = vpack.c.bf16 %v276_v60, %v272_v51  ;;  %v389_v9 = vadd.f32 %v388_v7, %v2884_v1  ;;  %v390_v10 = vpop.f32.mrb[11].mxu1 }
 0x10a   :  { %v2929_v12 = vpack.c.bf16 %v278_v5, %v274_v55  ;;  %v391_v4 = vadd.f32 %v390_v10, %v2886_v2 }
 0x10b   :  { %v2932_v16 = vpack.c.bf16 %v389_v9, %v385_v59 }
 0x10c   :  { %3463 = vst [vmem:[#allocation8_spill] sm:$0xff] %v2929_v12  ;;  %v281_v23 = vpop.f32.mrb[12].mxu0  ;;  %v2934_v53 = vpack.c.bf16 %v391_v4, %v387_v6 }
 0x10d   :  { %3464 = vst [vmem:[#allocation9_spill] sm:$0xff] %v2932_v16  ;;  %v282_v58 = vadd.f32 %v281_v23, %v2880_v63  ;;  %v283_v57 = vpop.f32.mrb[13].mxu0 }
 0x10e   :  { %3465 = vst [vmem:[#allocation10_spill] sm:$0xff] %v2934_v53  ;;  %v284_v61 = vadd.f32 %v283_v57, %v2882_v0  ;;  %v285_v62 = vpop.f32.mrb[14].mxu0  ;;  %v394_v51 = vpop.f32.mrb[12].mxu1 }
 0x10f   :  { %v286_v60 = vadd.f32 %v285_v62, %v2880_v63  ;;  %v287_v7 = vpop.f32.mrb[15].mxu0  ;;  %v395_v55 = vadd.f32 %v394_v51, %v2884_v1  ;;  %v396_v5 = vpop.f32.mrb[13].mxu1 }
 0x110   :  { %v288_v10 = vadd.f32 %v287_v7, %v2882_v0  ;;  %v397_v59 = vadd.f32 %v396_v5, %v2886_v2  ;;  %v398_v9 = vpop.f32.mrb[14].mxu1 }
 0x111   :  { %v2942_v6 = vpack.c.bf16 %v286_v60, %v282_v58  ;;  %v399_v4 = vadd.f32 %v398_v9, %v2884_v1  ;;  %v400_v23 = vpop.f32.mrb[15].mxu1 }
 0x112   :  { %v2945_v3 = vpack.c.bf16 %v288_v10, %v284_v61  ;;  %v401_v57 = vadd.f32 %v400_v23, %v2886_v2 }
 0x113   :  { %3466 = vst [vmem:[#allocation11_spill] sm:$0xff] %v2942_v6  ;;  %v2948_v53 = vpack.c.bf16 %v399_v4, %v395_v55 }
 0x114   :  { %3467 = vst [vmem:[#allocation12_spill] sm:$0xff] %v2945_v3  ;;  %v291_v62 = vpop.f32.mrb[16].mxu0  ;;  %v2950_v12 = vpack.c.bf16 %v401_v57, %v397_v59 }
 0x115   :  { %3468 = vst [vmem:[#allocation13_spill] sm:$0xff] %v2948_v53  ;;  %v292_v51 = vadd.f32 %v291_v62, %v2880_v63  ;;  %v293_v7 = vpop.f32.mrb[17].mxu0 }
 0x116   :  { %3469 = vst [vmem:[#allocation14_spill] sm:$0xff] %v2950_v12  ;;  %v294_v5 = vadd.f32 %v293_v7, %v2882_v0  ;;  %v295_v16 = vpop.f32.mrb[18].mxu0  ;;  %v404_v58 = vpop.f32.mrb[16].mxu1 }
 0x117   :  { %v296_v60 = vadd.f32 %v295_v16, %v2880_v63  ;;  %v297_v9 = vpop.f32.mrb[19].mxu0  ;;  %v405_v61 = vadd.f32 %v404_v58, %v2884_v1  ;;  %v406_v10 = vpop.f32.mrb[17].mxu1 }
 0x118   :  { %v298_v23 = vadd.f32 %v297_v9, %v2882_v0  ;;  %v407_v55 = vadd.f32 %v406_v10, %v2886_v2  ;;  %v408_v4 = vpop.f32.mrb[18].mxu1 }
 0x119   :  { %v2958_v59 = vpack.c.bf16 %v296_v60, %v292_v51  ;;  %v409_v57 = vadd.f32 %v408_v4, %v2884_v1  ;;  %v410_v62 = vpop.f32.mrb[19].mxu1 }
 0x11a   :  { %v2961_v12 = vpack.c.bf16 %v298_v23, %v294_v5  ;;  %v411_v7 = vadd.f32 %v410_v62, %v2886_v2 }
 0x11b   :  { %3470 = vst [vmem:[#allocation15_spill] sm:$0xff] %v2958_v59  ;;  %v2964_v3 = vpack.c.bf16 %v409_v57, %v405_v61 }
 0x11c   :  { %3471 = vst [vmem:[#allocation16_spill] sm:$0xff] %v2961_v12  ;;  %v301_v16 = vpop.f32.mrb[20].mxu0  ;;  %v2966_v53 = vpack.c.bf16 %v411_v7, %v407_v55 }
 0x11d   :  { %3472 = vst [vmem:[#allocation17_spill] sm:$0xff] %v2964_v3  ;;  %v302_v58 = vadd.f32 %v301_v16, %v2880_v63  ;;  %v303_v9 = vpop.f32.mrb[21].mxu0 }
 0x11e   :  { %3473 = vst [vmem:[#allocation18_spill] sm:$0xff] %v2966_v53  ;;  %v304_v10 = vadd.f32 %v303_v9, %v2882_v0  ;;  %v305_v6 = vpop.f32.mrb[22].mxu0  ;;  %v414_v51 = vpop.f32.mrb[20].mxu1 }
 0x11f   :  { %v306_v60 = vadd.f32 %v305_v6, %v2880_v63  ;;  %v307_v4 = vpop.f32.mrb[23].mxu0  ;;  %v415_v5 = vadd.f32 %v414_v51, %v2884_v1  ;;  %v416_v23 = vpop.f32.mrb[21].mxu1 }
 0x120   :  { %v308_v62 = vadd.f32 %v307_v4, %v2882_v0  ;;  %v417_v61 = vadd.f32 %v416_v23, %v2886_v2  ;;  %v418_v57 = vpop.f32.mrb[22].mxu1 }
 0x121   :  { %v2974_v55 = vpack.c.bf16 %v306_v60, %v302_v58  ;;  %v419_v7 = vadd.f32 %v418_v57, %v2884_v1  ;;  %v420_v16 = vpop.f32.mrb[23].mxu1 }
 0x122   :  { %v2977_v53 = vpack.c.bf16 %v308_v62, %v304_v10  ;;  %v421_v9 = vadd.f32 %v420_v16, %v2886_v2 }
 0x123   :  { %3474 = vst [vmem:[#allocation19_spill] sm:$0xff] %v2974_v55  ;;  %v2980_v12 = vpack.c.bf16 %v419_v7, %v415_v5 }
 0x124   :  { %3475 = vst [vmem:[#allocation20_spill] sm:$0xff] %v2977_v53  ;;  %v311_v6 = vpop.f32.mrb[24].mxu0  ;;  %v2982_v3 = vpack.c.bf16 %v421_v9, %v417_v61 }
 0x125   :  { %3476 = vst [vmem:[#allocation21_spill] sm:$0xff] %v2980_v12  ;;  %v312_v51 = vadd.f32 %v311_v6, %v2880_v63  ;;  %v313_v4 = vpop.f32.mrb[25].mxu0 }
 0x126   :  { %3477 = vst [vmem:[#allocation22_spill] sm:$0xff] %v2982_v3  ;;  %v314_v23 = vadd.f32 %v313_v4, %v2882_v0  ;;  %v315_v59 = vpop.f32.mrb[26].mxu0  ;;  %v424_v58 = vpop.f32.mrb[24].mxu1 }
 0x127   :  { %v316_v60 = vadd.f32 %v315_v59, %v2880_v63  ;;  %v317_v57 = vpop.f32.mrb[27].mxu0  ;;  %v425_v10 = vadd.f32 %v424_v58, %v2884_v1  ;;  %v426_v62 = vpop.f32.mrb[25].mxu1 }
 0x128   :  { %v318_v16 = vadd.f32 %v317_v57, %v2882_v0  ;;  %v427_v5 = vadd.f32 %v426_v62, %v2886_v2  ;;  %v428_v7 = vpop.f32.mrb[26].mxu1 }
 0x129   :  { %v2990_v61 = vpack.c.bf16 %v316_v60, %v312_v51  ;;  %v429_v9 = vadd.f32 %v428_v7, %v2884_v1  ;;  %v430_v6 = vpop.f32.mrb[27].mxu1 }
 0x12a   :  { %v2993_v3 = vpack.c.bf16 %v318_v16, %v314_v23  ;;  %v431_v4 = vadd.f32 %v430_v6, %v2886_v2 }
 0x12b   :  { %v2996_v53 = vpack.c.bf16 %v429_v9, %v425_v10 }
 0x12c   :  { %3478 = vst [vmem:[#allocation23_spill] sm:$0xff] %v2993_v3  ;;  %v321_v59 = vpop.f32.mrb[28].mxu0  ;;  %v2998_v12 = vpack.c.bf16 %v431_v4, %v427_v5 }
 0x12d   :  { %3479 = vst [vmem:[#allocation24_spill] sm:$0xff] %v2996_v53  ;;  %v322_v58 = vadd.f32 %v321_v59, %v2880_v63  ;;  %v323_v57 = vpop.f32.mrb[29].mxu0 }
 0x12e   :  { %3480 = vst [vmem:[#allocation25_spill] sm:$0xff] %v2998_v12  ;;  %v324_v62 = vadd.f32 %v323_v57, %v2882_v0  ;;  %v325_v55 = vpop.f32.mrb[30].mxu0  ;;  %v434_v51 = vpop.f32.mrb[28].mxu1 }
 0x12f   :  { %v326_v60 = vadd.f32 %v325_v55, %v2880_v63  ;;  %v327_v7 = vpop.f32.mrb[31].mxu0  ;;  %v435_v23 = vadd.f32 %v434_v51, %v2884_v1  ;;  %v436_v16 = vpop.f32.mrb[29].mxu1  ;;  %v514_v63 = vunpack.c.l.bf16 %v2894_v32 }
 0x130   :  { %v328_v6 = vadd.f32 %v327_v7, %v2882_v0  ;;  %v437_v10 = vadd.f32 %v436_v16, %v2886_v2  ;;  %v438_v9 = vpop.f32.mrb[30].mxu1  ;;  %v515_v0 = vunpack.c.l.bf16 %v2897_v52 }
 0x131   :  { %v3006_v5 = vpack.c.bf16 %v326_v60, %v322_v58  ;;  %v439_v4 = vadd.f32 %v438_v9, %v2884_v1  ;;  %v440_v59 = vpop.f32.mrb[31].mxu1  ;;  %v518_v58 = vunpack.c.h.bf16 %v2894_v32  ;;  %v516_v1 = vunpack.c.l.bf16 %v2900_v54 }
 0x132   :  { %v3009_v12 = vpack.c.bf16 %v328_v6, %v324_v62  ;;  %v441_v57 = vadd.f32 %v440_v59, %v2886_v2  ;;  %v519_v2 = vunpack.c.h.bf16 %v2897_v52 }
 0x133   :  { %3481 = vst [vmem:[#allocation26_spill] sm:$0xff] %v3006_v5  ;;  %v3012_v3 = vpack.c.bf16 %v439_v4, %v435_v23  ;;  %v517_v23 = vunpack.c.l.bf16 %v2902_v56 }
 0x134   :  { %3482 = vst [vmem:[#allocation27_spill] sm:$0xff] %v3009_v12  ;;  %v716_v55 = vpop.f32.mrb[32].mxu0  ;;  %v3015_v51 = vpack.c.bf16 %v441_v57, %v437_v10 }
 0x135   :  { %3483 = vst [vmem:[#allocation28_spill] sm:$0xff] %v3012_v3  ;;  %v768_v7 = vadd.f32 %v716_v55, %v514_v63  ;;  %v718_v16 = vpop.f32.mrb[33].mxu0  ;;  %v521_v3 = vunpack.c.h.bf16 %v2902_v56 }
 0x136   :  { %3484 = vst [vmem:[#allocation29_spill] sm:$0xff] %v3015_v51  ;;  %v769_v60 = vadd.f32 %v718_v16, %v515_v0  ;;  %v720_v62 = vpop.f32.mrb[34].mxu0  ;;  %v759_v6 = vpop.f32.mrb[32].mxu1  ;;  %v520_v51 = vunpack.c.h.bf16 %v2900_v54 }
 0x137   :  { %v2104_v9 = vmul.f32 -1.442695, %v768_v7  ;;  %v772_v4 = vadd.f32 %v720_v62, %v518_v58  ;;  %v770_v59 = vadd.f32 %v759_v6, %v516_v1  ;;  %v722_v10 = vpop.f32.mrb[35].mxu0  ;;  %v761_v57 = vpop.f32.mrb[33].mxu1 }
 0x138   :  { %v2106_v63 = vmul.f32 -1.442695, %v769_v60  ;;  %v773_v55 = vadd.f32 %v722_v10, %v519_v2  ;;  %v771_v12 = vadd.f32 %v761_v57, %v517_v23  ;;  %v763_v32 = vpop.f32.mrb[34].mxu1  ;;  %v46_v23 = vld [vmem:[%s3437_s5] sm:$0xff] }
 0x139   :  { %2307 = vpow2.f32 %v2104_v9  ;;  %v2105_v0 = vmul.f32 -1.442695, %v772_v4  ;;  %v774_v16 = vadd.f32 %v763_v32, %v520_v51  ;;  %v765_v5 = vpop.f32.mrb[35].mxu1 }
 0x13a   :  { %2309 = vpow2.f32 %v2106_v63  ;;  %v2107_v52 = vmul.f32 -1.442695, %v773_v55  ;;  %v775_v53 = vadd.f32 %v765_v5, %v521_v3  ;;  %v2108_v7 = vmul.f32 -1.442695, %v771_v12  ;;  %v47_v63 = vld [vmem:[%s3437_s5 + $0x8] sm:$0xff] }
 0x13b   :  { %2311 = vpow2.f32 %v2105_v0 }
 0x13c   :  { %2313 = vpow2.f32 %v2107_v52  ;;  %v2109_v58 = vmul.f32 -1.442695, %v775_v53 }
 0x13d   :  { %2315 = vtanh.f32 %v770_v59 }
 0x13e   :  { %2317 = vpow2.f32 %v2108_v7 }
 0x13f   :  { %2319 = vtanh.f32 %v774_v16 }
 0x140   :  { %2321 = vpow2.f32 %v2109_v58 }
 0x143   :  { %v2308_v1 = vpop.eup %2307 }
 0x144   :  { %v2310_v54 = vpop.eup %2309  ;;  %v782_v60 = vadd.f32 1.0, %v2308_v1 }
 0x145   :  { %v2312_v62 = vpop.eup %2311  ;;  %v794_v6 = vadd.f32 1.0, %v2310_v54 }
 0x146   :  { %2323 = vrcp.f32 %v782_v60  ;;  %v783_v56 = vadd.f32 1.0, %v2312_v62  ;;  %v2314_v51 = vpop.eup %2313 }
 0x147   :  { %2325 = vrcp.f32 %v794_v6  ;;  %v795_v2 = vadd.f32 1.0, %v2314_v51  ;;  %v2316_v3 = vpop.eup %2315 }
 0x148   :  { %2327 = vrcp.f32 %v783_v56  ;;  %v2318_v5 = vpop.eup %2317 }
 0x149   :  { %2329 = vrcp.f32 %v795_v2  ;;  %v2320_v12 = vpop.eup %2319  ;;  %v808_v55 = vadd.f32 1.0, %v2318_v5  ;;  %v3485_v2 = vmov 0  }
 0x14a   :  { %v2322_v53 = vpop.eup %2321 }
 0x14b   :  { %v809_v52 = vadd.f32 1.0, %v2322_v53  ;;  %2331 = vrcp.f32 %v808_v55  ;;  %v850_v53 = vunpack.c.h.bf16 %v2913_v15 }
 0x150   :  { %v2324_v9 = vpop.eup %2323 }
 0x151   :  { %v2326_v4 = vpop.eup %2325  ;;  %v816_v59 = vmul.f32 %v2324_v9, %v2316_v3 }
 0x152   :  { %v2328_v10 = vpop.eup %2327  ;;  %v814_v57 = vmul.f32 %v2326_v4, %v46_v23  ;;  %v852_v23 = vunpack.c.h.bf16 %v2918_v43 }
 0x153   :  { %v817_v32 = vmul.f32 %v2328_v10, %v2320_v12  ;;  %v2330_v0 = vpop.eup %2329 }
 0x154   :  { %v3030_v16 = vadd.f32 %v816_v59, %v814_v57  ;;  %v815_v7 = vmul.f32 %v2330_v0, %v47_v63 }
 0x155   :  { %v2332_v1 = vpop.eup %2331 }
 0x156   :  { %2333 = vtanh.f32 %v3030_v16  ;;  %v3033_v58 = vadd.f32 %v817_v32, %v815_v7 }
 0x157   :  { %2335 = vrcp.f32 %v809_v52 }
 0x158   :  { %2337 = vtanh.f32 %v3033_v58 }
 0x160   :  { %v2334_v54 = vpop.eup %2333 }
 0x161   :  { %v2336_v60 = vpop.eup %2335  ;;  %v822_v6 = vmul.f32 %v2334_v54, %v2332_v1 }
 0x162   :  { %v2338_v62 = vpop.eup %2337 }
 0x163   :  { %v823_v56 = vmul.f32 %v2338_v62, %v2336_v60 }
 0x165   :  { %v824_v51 = vpack.c.bf16 %v823_v56, %v822_v6 }
 0x167   :  { %2202 = vst [vmem:[%s3438_s6] sm:$0xff] %v824_v51   ;;  %886 = vmatmul.mubr.bf16.vlgmr.msra.gmra.mrb[36].mxu0 %v824_v51  ;;  %929 = vmatmul.mubr.bf16.vlgmr.msra.gmra.mrb[36].mxu1 %v824_v51 }
 0x168   :  { %1026 = vmatpush1.bf16.msra.mxu0 %v2681_v14  ;;  %1069 = vmatpush1.bf16.msra.mxu1 %v2691_v20  ;;  %v845_v14 = vunpack.c.l.bf16 %v2910_v11 }
 0x169   :  { %1027 = vmatprep.subr.bf16.mxu0 %v2689_v19  ;;  %1070 = vmatprep.subr.bf16.mxu1 %v2695_v21  ;;  %v847_v19 = vunpack.c.l.bf16 %v2916_v17 }
 0x16a   :  { %1057 = vmatprep.mubr.bf16.mxu0 %v3485_v2  ;;  %1100 = vmatprep.mubr.bf16.mxu1 %v3485_v2 }
 0x16c   :  { %1028 = vmatpush1.bf16.msra.mxu0 %v2699_v22  ;;  %1071 = vmatpush1.bf16.msra.mxu1 %v2710_v25  ;;  %v846_v22 = vunpack.c.l.bf16 %v2913_v15 }
 0x16d   :  { %1029 = vmatprep.subr.bf16.mxu0 %v2706_v24  ;;  %1072 = vmatprep.subr.bf16.mxu1 %v2713_v26  ;;  %v848_v24 = vunpack.c.l.bf16 %v2918_v43 }
 0x170   :  { %1030 = vmatpush1.bf16.msra.mxu0 %v2716_v27  ;;  %1073 = vmatpush1.bf16.msra.mxu1 %v2722_v29  ;;  %v849_v29 = vunpack.c.h.bf16 %v2910_v11 }
 0x171   :  { %1031 = vmatprep.subr.bf16.mxu0 %v2719_v28  ;;  %1074 = vmatprep.subr.bf16.mxu1 %v2726_v30 }
 0x174   :  { %1032 = vmatpush1.bf16.msra.mxu0 %v2730_v31  ;;  %1075 = vmatpush1.bf16.msra.mxu1 %v2741_v34 }
 0x175   :  { %1033 = vmatprep.subr.bf16.mxu0 %v2737_v33  ;;  %1076 = vmatprep.subr.bf16.mxu1 %v2744_v35 }
 0x178   :  { %1034 = vmatpush1.bf16.msra.mxu0 %v2747_v36  ;;  %1077 = vmatpush1.bf16.msra.mxu1 %v2753_v38 }
 0x179   :  { %1035 = vmatprep.subr.bf16.mxu0 %v2750_v37  ;;  %1078 = vmatprep.subr.bf16.mxu1 %v2757_v39 }
 0x17c   :  { %1036 = vmatpush1.bf16.msra.mxu0 %v2761_v40  ;;  %1079 = vmatpush1.bf16.msra.mxu1 %v2769_v42 }
 0x17d   :  { %1037 = vmatprep.subr.bf16.mxu0 %v2765_v41  ;;  %1080 = vmatprep.subr.bf16.mxu1 %v2775_v44 }
 0x180   :  { %1038 = vmatpush1.bf16.msra.mxu0 %v2778_v45  ;;  %1081 = vmatpush1.bf16.msra.mxu1 %v2784_v47 }
 0x181   :  { %1039 = vmatprep.subr.bf16.mxu0 %v2781_v46  ;;  %1082 = vmatprep.subr.bf16.mxu1 %v2788_v48 }
 0x184   :  { %1040 = vmatpush1.bf16.msra.mxu0 %v2792_v49  ;;  %1083 = vmatpush1.bf16.msra.mxu1 %v2798_v50 }
 0x185   :  { %1197 = vmatprep.subr.bf16.mxu0 %v2679_v13  ;;  %1240 = vmatprep.subr.bf16.mxu1 %v2686_v18  ;;  %v851_v13 = vunpack.c.h.bf16 %v2916_v17 }
 0x23a   :  { %v887_v20 = vpop.f32.mrb[36].mxu0  ;;  %v930_v21 = vpop.f32.mrb[36].mxu1 }
 0x23b   :  { %v939_v25 = vadd.f32 %v887_v20, %v845_v14  ;;  %v941_v26 = vadd.f32 %v930_v21, %v847_v19  ;;  %v889_v27 = vpop.f32.mrb[37].mxu0  ;;  %v932_v28 = vpop.f32.mrb[37].mxu1 }
 0x23c   :  { %v940_v3 = vadd.f32 %v889_v27, %v846_v22  ;;  %v942_v18 = vadd.f32 %v932_v28, %v848_v24  ;;  %v891_v5 = vpop.f32.mrb[38].mxu0  ;;  %v934_v12 = vpop.f32.mrb[38].mxu1 }
 0x23d   :  { %v2112_v9 = vmul.f32 -1.442695, %v939_v25  ;;  %v943_v4 = vadd.f32 %v891_v5, %v849_v29  ;;  %v945_v59 = vadd.f32 %v934_v12, %v851_v13  ;;  %v893_v10 = vpop.f32.mrb[39].mxu0  ;;  %v936_v57 = vpop.f32.mrb[39].mxu1 }
 0x23e   :  { %v2114_v63 = vmul.f32 -1.442695, %v940_v3  ;;  %v944_v55 = vadd.f32 %v893_v10, %v850_v53  ;;  %v946_v32 = vadd.f32 %v936_v57, %v852_v23  ;;  %v2116_v0 = vmul.f32 -1.442695, %v942_v18  ;;  %v3098_v10 = vld [vmem:[#allocation5 + $0x24] ss:$16 sps:$4 sm:$0xff]  }
 0x23f   :  { %2339 = vpow2.f32 %v2112_v9  ;;  %v2113_v11 = vmul.f32 -1.442695, %v943_v4  ;;  %v3101_v57 = vld [vmem:[#allocation5 + $0x2c] ss:$16 sps:$4 sm:$0xff]  }
 0x240   :  { %2341 = vpow2.f32 %v2114_v63  ;;  %v2115_v17 = vmul.f32 -1.442695, %v944_v55  ;;  %v2117_v43 = vmul.f32 -1.442695, %v946_v32  ;;  %v3106_v63 = vld [vmem:[#allocation5 + $0x20] ss:$16 sps:$4 sm:$0xff]  }
 0x241   :  { %2343 = vpow2.f32 %v2113_v11  ;;  %v3109_v55 = vld [vmem:[#allocation5 + $0x28] ss:$16 sps:$4 sm:$0xff]   ;;  %v3112_v32 = vld [vmem:[#allocation5 + $0x44] ss:$16 sps:$4 sm:$0xff]   ;;  %v3115_v11 = vld [vmem:[#allocation5 + $0x4c] ss:$16 sps:$4 sm:$0xff]  }
 0x242   :  { %2345 = vpow2.f32 %v2115_v17  ;;  %v3118_v17 = vld [vmem:[#allocation5 + $0x40] ss:$16 sps:$4 sm:$0xff]  }
 0x243   :  { %2347 = vtanh.f32 %v941_v26 }
 0x244   :  { %2349 = vpow2.f32 %v2116_v0  ;;  %v3121_v0 = vld [vmem:[#allocation5 + $0x48] ss:$16 sps:$4 sm:$0xff]  }
 0x245   :  { %2351 = vtanh.f32 %v945_v59  ;;  %v3095_v59 = vld [vmem:[#allocation5 + $0x8] ss:$16 sps:$4 sm:$0xff]  }
 0x249   :  { %v2340_v52 = vpop.eup %2339 }
 0x24a   :  { %v2342_v15 = vpop.eup %2341  ;;  %v953_v7 = vadd.f32 1.0, %v2340_v52  ;;  %v3124_v52 = vld [vmem:[#allocation5 + $0x64] ss:$16 sps:$4 sm:$0xff]  }
 0x24b   :  { %v965_v1 = vadd.f32 1.0, %v2342_v15  ;;  %v2344_v54 = vpop.eup %2343 }
 0x24c   :  { %2353 = vrcp.f32 %v953_v7  ;;  %v954_v60 = vadd.f32 1.0, %v2344_v54  ;;  %v2346_v62 = vpop.eup %2345 }
 0x24d   :  { %2355 = vrcp.f32 %v965_v1  ;;  %v966_v6 = vadd.f32 1.0, %v2346_v62  ;;  %v2348_v56 = vpop.eup %2347 }
 0x24e   :  { %2357 = vpow2.f32 %v2117_v43  ;;  %v2350_v51 = vpop.eup %2349 }
 0x24f   :  { %2359 = vrcp.f32 %v954_v60  ;;  %v2352_v14 = vpop.eup %2351  ;;  %v979_v26 = vadd.f32 1.0, %v2350_v51 }
 0x250   :  { %2361 = vrcp.f32 %v966_v6 }
 0x251   :  { %2363 = vrcp.f32 %v979_v26 }
 0x256   :  { %v2354_v19 = vpop.eup %2353 }
 0x257   :  { %v2356_v20 = vpop.eup %2355  ;;  %v987_v21 = vmul.f32 %v2354_v19, %v2348_v56 }
 0x258   :  { %v2358_v22 = vpop.eup %2357  ;;  %v985_v24 = vmul.f32 %v2356_v20, %v3030_v16 }
 0x259   :  { %v2360_v25 = vpop.eup %2359  ;;  %v980_v13 = vadd.f32 1.0, %v2358_v22 }
 0x25a   :  { %v3082_v27 = vadd.f32 %v987_v21, %v985_v24  ;;  %v988_v28 = vmul.f32 %v2360_v25, %v2352_v14  ;;  %v2362_v29 = vpop.eup %2361 }
 0x25b   :  { %v986_v3 = vmul.f32 %v2362_v29, %v3033_v58  ;;  %v2364_v5 = vpop.eup %2363  ;;  %v3092_v58 = vld [vmem:[#allocation5] ss:$16 sps:$4 sm:$0xff]  }
 0x25c   :  { %2365 = vtanh.f32 %v3082_v27 }
 0x25d   :  { %v3086_v18 = vadd.f32 %v988_v28, %v986_v3  ;;  %2367 = vrcp.f32 %v980_v13 }
 0x25f   :  { %2369 = vtanh.f32 %v3086_v18 }
 0x266   :  { %v2366_v12 = vpop.eup %2365 }
 0x267   :  { %v2368_v16 = vpop.eup %2367  ;;  %v993_v23 = vmul.f32 %v2366_v12, %v2364_v5 }
 0x269   :  { %v2370_v53 = vpop.eup %2369 }
 0x26a   :  { %v994_v9 = vmul.f32 %v2370_v53, %v2368_v16 }
 0x26c   :  { %v995_v4 = vpack.c.bf16 %v994_v9, %v993_v23 }
 0x26e   :  { %2238 = vst [vmem:[%s3438_s6 + $0x8] sm:$0xff] %v995_v4   ;;  %1058 = vmatmul.mubr.bf16.vlgmr.msra.gmra.mrb[40].mxu0 %v995_v4  ;;  %1101 = vmatmul.mubr.bf16.vlgmr.msra.gmra.mrb[40].mxu1 %v995_v4 }
 0x26f   :  { %1198 = vmatpush1.bf16.msra.mxu0 %v3092_v58  ;;  %1241 = vmatpush1.bf16.msra.mxu1 %v3095_v59 }
 0x270   :  { %1199 = vmatprep.subr.bf16.mxu0 %v3098_v10  ;;  %1242 = vmatprep.subr.bf16.mxu1 %v3101_v57 }
 0x271   :  { %1229 = vmatprep.mubr.bf16.mxu0 %v3485_v2  ;;  %1272 = vmatprep.mubr.bf16.mxu1 %v3485_v2 }
 0x273   :  { %1200 = vmatpush1.bf16.msra.mxu0 %v3106_v63  ;;  %1243 = vmatpush1.bf16.msra.mxu1 %v3109_v55 }
 0x274   :  { %1201 = vmatprep.subr.bf16.mxu0 %v3112_v32  ;;  %1244 = vmatprep.subr.bf16.mxu1 %v3115_v11 }
 0x277   :  { %1202 = vmatpush1.bf16.msra.mxu0 %v3118_v17  ;;  %1245 = vmatpush1.bf16.msra.mxu1 %v3121_v0 }
 0x278   :  { %1203 = vmatprep.subr.bf16.mxu0 %v3124_v52  ;;  %1246 = vmatprep.subr.bf16.mxu1 %v2726_v30  ;;  %v3146_v30 = vld [vmem:[#allocation5 + $0x4] ss:$16 sps:$4 sm:$0xff]  }
 0x27b   :  { %1204 = vmatpush1.bf16.msra.mxu0 %v2730_v31  ;;  %1247 = vmatpush1.bf16.msra.mxu1 %v2741_v34  ;;  %v3149_v31 = vld [vmem:[#allocation5 + $0xc] ss:$16 sps:$4 sm:$0xff]  }
 0x27c   :  { %1205 = vmatprep.subr.bf16.mxu0 %v2737_v33  ;;  %1248 = vmatprep.subr.bf16.mxu1 %v2744_v35  ;;  %v1017_v33 = vunpack.c.l.bf16 %v2926_v8  ;;  %v3486_v34 = vld [vmem:[#allocation9_spill] sm:$0xff] }
 0x27d   :  { %v1019_v35 = vunpack.c.l.bf16 %v3486_v34 }
 0x27f   :  { %1206 = vmatpush1.bf16.msra.mxu0 %v2747_v36  ;;  %1249 = vmatpush1.bf16.msra.mxu1 %v2753_v38  ;;  %v3487_v38 = vld [vmem:[#allocation8_spill] sm:$0xff] }
 0x280   :  { %1207 = vmatprep.subr.bf16.mxu0 %v2750_v37  ;;  %1250 = vmatprep.subr.bf16.mxu1 %v2757_v39  ;;  %v1018_v39 = vunpack.c.l.bf16 %v3487_v38  ;;  %v1022_v43 = vunpack.c.h.bf16 %v3487_v38 }
 0x283   :  { %1208 = vmatpush1.bf16.msra.mxu0 %v2761_v40  ;;  %1251 = vmatpush1.bf16.msra.mxu1 %v2769_v42  ;;  %v3488_v40 = vld [vmem:[#allocation10_spill] sm:$0xff] }
 0x284   :  { %1209 = vmatprep.subr.bf16.mxu0 %v2765_v41  ;;  %1252 = vmatprep.subr.bf16.mxu1 %v2775_v44  ;;  %v1020_v41 = vunpack.c.l.bf16 %v3488_v40  ;;  %v1024_v1 = vunpack.c.h.bf16 %v3488_v40 }
 0x287   :  { %1210 = vmatpush1.bf16.msra.mxu0 %v2778_v45  ;;  %1253 = vmatpush1.bf16.msra.mxu1 %v2784_v47  ;;  %v1021_v47 = vunpack.c.h.bf16 %v2926_v8 }
 0x288   :  { %1211 = vmatprep.subr.bf16.mxu0 %v2781_v46  ;;  %1254 = vmatprep.subr.bf16.mxu1 %v2788_v48  ;;  %v1023_v48 = vunpack.c.h.bf16 %v3486_v34 }
 0x28b   :  { %1212 = vmatpush1.bf16.msra.mxu0 %v2792_v49  ;;  %1255 = vmatpush1.bf16.msra.mxu1 %v2798_v50 }
 0x28c   :  { %1369 = vmatprep.subr.bf16.mxu0 %v3146_v30  ;;  %1412 = vmatprep.subr.bf16.mxu1 %v3149_v31 }
 0x341   :  { %v1059_v36 = vpop.f32.mrb[40].mxu0  ;;  %v1102_v37 = vpop.f32.mrb[40].mxu1 }
 0x342   :  { %v1111_v42 = vadd.f32 %v1059_v36, %v1017_v33  ;;  %v1113_v44 = vadd.f32 %v1102_v37, %v1019_v35  ;;  %v1061_v45 = vpop.f32.mrb[41].mxu0  ;;  %v1104_v46 = vpop.f32.mrb[41].mxu1 }
 0x343   :  { %v1112_v49 = vadd.f32 %v1061_v45, %v1018_v39  ;;  %v1114_v50 = vadd.f32 %v1104_v46, %v1020_v41  ;;  %v1063_v15 = vpop.f32.mrb[42].mxu0  ;;  %v1106_v7 = vpop.f32.mrb[42].mxu1 }
 0x344   :  { %v2122_v54 = vmul.f32 -1.442695, %v1111_v42  ;;  %v1115_v60 = vadd.f32 %v1063_v15, %v1021_v47  ;;  %v1117_v62 = vadd.f32 %v1106_v7, %v1023_v48  ;;  %v1065_v6 = vpop.f32.mrb[43].mxu0  ;;  %v1108_v56 = vpop.f32.mrb[43].mxu1  ;;  %v3190_v15 = vld [vmem:[#allocation5 + $0x68] ss:$16 sps:$4 sm:$0xff]  }
 0x345   :  { %v2124_v51 = vmul.f32 -1.442695, %v1112_v49  ;;  %v1116_v14 = vadd.f32 %v1065_v6, %v1022_v43  ;;  %v1118_v19 = vadd.f32 %v1108_v56, %v1024_v1  ;;  %v2126_v21 = vmul.f32 -1.442695, %v1114_v50  ;;  %v3187_v50 = vld [vmem:[#allocation5 + $0x60] ss:$16 sps:$4 sm:$0xff]  }
 0x346   :  { %2371 = vpow2.f32 %v2122_v54  ;;  %v2123_v8 = vmul.f32 -1.442695, %v1115_v60  ;;  %v3193_v7 = vld [vmem:[#allocation5 + $0x84] ss:$16 sps:$4 sm:$0xff]   ;;  %v3196_v43 = vld [vmem:[#allocation5 + $0x8c] ss:$16 sps:$4 sm:$0xff]  }
 0x347   :  { %2373 = vpow2.f32 %v2124_v51  ;;  %v2125_v20 = vmul.f32 -1.442695, %v1116_v14  ;;  %v2127_v26 = vmul.f32 -1.442695, %v1118_v19  ;;  %v3199_v1 = vld [vmem:[#allocation5 + $0x80] ss:$16 sps:$4 sm:$0xff]  }
 0x348   :  { %2375 = vpow2.f32 %v2123_v8  ;;  %v3202_v54 = vld [vmem:[#allocation5 + $0x88] ss:$16 sps:$4 sm:$0xff]   ;;  %v3205_v60 = vld [vmem:[#allocation5 + $0xa4] ss:$16 sps:$4 sm:$0xff]   ;;  %v3211_v6 = vld [vmem:[#allocation5 + $0xa0] ss:$16 sps:$4 sm:$0xff]  }
 0x349   :  { %2377 = vpow2.f32 %v2125_v20  ;;  %v3214_v56 = vld [vmem:[#allocation5 + $0xa8] ss:$16 sps:$4 sm:$0xff]   ;;  %v3217_v51 = vld [vmem:[#allocation5 + $0xc4] ss:$16 sps:$4 sm:$0xff]   ;;  %v3220_v14 = vld [vmem:[#allocation5 + $0xcc] ss:$16 sps:$4 sm:$0xff]  }
 0x34a   :  { %2379 = vtanh.f32 %v1113_v44  ;;  %v3223_v19 = vld [vmem:[#allocation5 + $0xc0] ss:$16 sps:$4 sm:$0xff]   ;;  %v3226_v8 = vld [vmem:[#allocation5 + $0xc8] ss:$16 sps:$4 sm:$0xff]   ;;  %v3229_v20 = vld [vmem:[#allocation5 + $0xe4] ss:$16 sps:$4 sm:$0xff]  }
 0x34b   :  { %2381 = vpow2.f32 %v2126_v21  ;;  %v3232_v21 = vld [vmem:[#allocation5 + $0xec] ss:$16 sps:$4 sm:$0xff]  }
 0x34c   :  { %2383 = vtanh.f32 %v1117_v62  ;;  %v3208_v62 = vld [vmem:[#allocation5 + $0xac] ss:$16 sps:$4 sm:$0xff]  }
 0x350   :  { %v2372_v22 = vpop.eup %2371 }
 0x351   :  { %v2374_v24 = vpop.eup %2373  ;;  %v1125_v25 = vadd.f32 1.0, %v2372_v22  ;;  %v3235_v22 = vld [vmem:[#allocation5 + $0xe0] ss:$16 sps:$4 sm:$0xff]  }
 0x352   :  { %v1137_v28 = vadd.f32 1.0, %v2374_v24  ;;  %v2376_v29 = vpop.eup %2375  ;;  %v3238_v24 = vld [vmem:[#allocation5 + $0xe8] ss:$16 sps:$4 sm:$0xff]  }
 0x353   :  { %2385 = vrcp.f32 %v1125_v25  ;;  %v1126_v13 = vadd.f32 1.0, %v2376_v29  ;;  %v2378_v3 = vpop.eup %2377  ;;  %v3489_v25 = vld [vmem:[#allocation11_spill] sm:$0xff] }
 0x354   :  { %2387 = vrcp.f32 %v1137_v28  ;;  %v1138_v5 = vadd.f32 1.0, %v2378_v3  ;;  %v2380_v12 = vpop.eup %2379  ;;  %v3490_v28 = vld [vmem:[#allocation13_spill] sm:$0xff] }
 0x355   :  { %2389 = vpow2.f32 %v2127_v26  ;;  %v2382_v16 = vpop.eup %2381  ;;  %v1189_v26 = vunpack.c.l.bf16 %v3489_v25  ;;  %v1191_v29 = vunpack.c.l.bf16 %v3490_v28 }
 0x356   :  { %2391 = vrcp.f32 %v1126_v13  ;;  %v2384_v53 = vpop.eup %2383  ;;  %v1151_v36 = vadd.f32 1.0, %v2382_v16  ;;  %v3492_v16 = vld [vmem:[#allocation14_spill] sm:$0xff] }
 0x357   :  { %2393 = vrcp.f32 %v1138_v5  ;;  %v3491_v5 = vld [vmem:[#allocation12_spill] sm:$0xff] }
 0x358   :  { %2395 = vrcp.f32 %v1151_v36 }
 0x35d   :  { %v2386_v23 = vpop.eup %2385 }
 0x35e   :  { %v2388_v9 = vpop.eup %2387  ;;  %v1159_v4 = vmul.f32 %v2386_v23, %v2380_v12  ;;  %v1190_v12 = vunpack.c.l.bf16 %v3491_v5 }
 0x35f   :  { %v2390_v33 = vpop.eup %2389  ;;  %v1157_v34 = vmul.f32 %v2388_v9, %v3082_v27 }
 0x360   :  { %v2392_v35 = vpop.eup %2391  ;;  %v1152_v40 = vadd.f32 1.0, %v2390_v33 }
 0x361   :  { %v3161_v37 = vadd.f32 %v1159_v4, %v1157_v34  ;;  %v1160_v38 = vmul.f32 %v2392_v35, %v2384_v53  ;;  %v2394_v39 = vpop.eup %2393  ;;  %v1192_v53 = vunpack.c.l.bf16 %v3492_v16  ;;  %v1193_v34 = vunpack.c.h.bf16 %v3489_v25 }
 0x362   :  { %v1158_v41 = vmul.f32 %v2394_v39, %v3086_v18  ;;  %v2396_v44 = vpop.eup %2395  ;;  %v3184_v18 = vld [vmem:[#allocation5 + $0x6c] ss:$16 sps:$4 sm:$0xff]   ;;  %v1195_v35 = vunpack.c.h.bf16 %v3490_v28 }
 0x363   :  { %2397 = vtanh.f32 %v3161_v37 }
 0x364   :  { %v3165_v42 = vadd.f32 %v1160_v38, %v1158_v41  ;;  %2399 = vrcp.f32 %v1152_v40  ;;  %v1194_v41 = vunpack.c.h.bf16 %v3491_v5 }
 0x366   :  { %2401 = vtanh.f32 %v3165_v42 }
 0x36d   :  { %v2398_v45 = vpop.eup %2397 }
 0x36e   :  { %v2400_v27 = vpop.eup %2399  ;;  %v1165_v47 = vmul.f32 %v2398_v45, %v2396_v44  ;;  %v1196_v44 = vunpack.c.h.bf16 %v3492_v16 }
 0x370   :  { %v2402_v46 = vpop.eup %2401 }
 0x371   :  { %v1166_v48 = vmul.f32 %v2402_v46, %v2400_v27 }
 0x373   :  { %v1167_v49 = vpack.c.bf16 %v1166_v48, %v1165_v47 }
 0x375   :  { %2239 = vst [vmem:[%s3438_s6 + $0x10] sm:$0xff] %v1167_v49   ;;  %1230 = vmatmul.mubr.bf16.vlgmr.msra.gmra.mrb[44].mxu0 %v1167_v49  ;;  %1273 = vmatmul.mubr.bf16.vlgmr.msra.gmra.mrb[44].mxu1 %v1167_v49 }
 0x376   :  { %1370 = vmatpush1.bf16.msra.mxu0 %v3092_v58  ;;  %1413 = vmatpush1.bf16.msra.mxu1 %v3095_v59 }
 0x377   :  { %1371 = vmatprep.subr.bf16.mxu0 %v3098_v10  ;;  %1414 = vmatprep.subr.bf16.mxu1 %v3101_v57 }
 0x378   :  { %1401 = vmatprep.mubr.bf16.mxu0 %v3485_v2  ;;  %1444 = vmatprep.mubr.bf16.mxu1 %v3485_v2 }
 0x37a   :  { %1372 = vmatpush1.bf16.msra.mxu0 %v3106_v63  ;;  %1415 = vmatpush1.bf16.msra.mxu1 %v3109_v55 }
 0x37b   :  { %1373 = vmatprep.subr.bf16.mxu0 %v3112_v32  ;;  %1416 = vmatprep.subr.bf16.mxu1 %v3115_v11 }
 0x37e   :  { %1374 = vmatpush1.bf16.msra.mxu0 %v3118_v17  ;;  %1417 = vmatpush1.bf16.msra.mxu1 %v3121_v0 }
 0x37f   :  { %1375 = vmatprep.subr.bf16.mxu0 %v3124_v52  ;;  %1418 = vmatprep.subr.bf16.mxu1 %v3184_v18 }
 0x382   :  { %1376 = vmatpush1.bf16.msra.mxu0 %v3187_v50  ;;  %1419 = vmatpush1.bf16.msra.mxu1 %v3190_v15 }
 0x383   :  { %1377 = vmatprep.subr.bf16.mxu0 %v3193_v7  ;;  %1420 = vmatprep.subr.bf16.mxu1 %v3196_v43 }
 0x386   :  { %1378 = vmatpush1.bf16.msra.mxu0 %v3199_v1  ;;  %1421 = vmatpush1.bf16.msra.mxu1 %v3202_v54 }
 0x387   :  { %1379 = vmatprep.subr.bf16.mxu0 %v3205_v60  ;;  %1422 = vmatprep.subr.bf16.mxu1 %v3208_v62 }
 0x38a   :  { %1380 = vmatpush1.bf16.msra.mxu0 %v3211_v6  ;;  %1423 = vmatpush1.bf16.msra.mxu1 %v3214_v56 }
 0x38b   :  { %1381 = vmatprep.subr.bf16.mxu0 %v3217_v51  ;;  %1424 = vmatprep.subr.bf16.mxu1 %v3220_v14 }
 0x38e   :  { %1382 = vmatpush1.bf16.msra.mxu0 %v3223_v19  ;;  %1425 = vmatpush1.bf16.msra.mxu1 %v3226_v8 }
 0x38f   :  { %1383 = vmatprep.subr.bf16.mxu0 %v3229_v20  ;;  %1426 = vmatprep.subr.bf16.mxu1 %v3232_v21 }
 0x392   :  { %1384 = vmatpush1.bf16.msra.mxu0 %v3235_v22  ;;  %1427 = vmatpush1.bf16.msra.mxu1 %v3238_v24 }
 0x393   :  { %1541 = vmatprep.subr.bf16.mxu0 %v3146_v30  ;;  %1584 = vmatprep.subr.bf16.mxu1 %v3149_v31 }
 0x448   :  { %v1231_v13 = vpop.f32.mrb[44].mxu0  ;;  %v1274_v3 = vpop.f32.mrb[44].mxu1 }
 0x449   :  { %v1283_v23 = vadd.f32 %v1231_v13, %v1189_v26  ;;  %v1285_v9 = vadd.f32 %v1274_v3, %v1191_v29  ;;  %v1233_v4 = vpop.f32.mrb[45].mxu0  ;;  %v1276_v33 = vpop.f32.mrb[45].mxu1 }
 0x44a   :  { %v1284_v36 = vadd.f32 %v1233_v4, %v1190_v12  ;;  %v1286_v38 = vadd.f32 %v1276_v33, %v1192_v53  ;;  %v1235_v39 = vpop.f32.mrb[46].mxu0  ;;  %v1278_v40 = vpop.f32.mrb[46].mxu1 }
 0x44b   :  { %v2132_v45 = vmul.f32 -1.442695, %v1283_v23  ;;  %v1287_v27 = vadd.f32 %v1235_v39, %v1193_v34  ;;  %v1289_v46 = vadd.f32 %v1278_v40, %v1195_v35  ;;  %v1237_v47 = vpop.f32.mrb[47].mxu0  ;;  %v1280_v48 = vpop.f32.mrb[47].mxu1 }
 0x44c   :  { %v2134_v49 = vmul.f32 -1.442695, %v1284_v36  ;;  %v1288_v26 = vadd.f32 %v1237_v47, %v1194_v41  ;;  %v1290_v29 = vadd.f32 %v1280_v48, %v1196_v44  ;;  %v2136_v13 = vmul.f32 -1.442695, %v1286_v38 }
 0x44d   :  { %2403 = vpow2.f32 %v2132_v45  ;;  %v2133_v25 = vmul.f32 -1.442695, %v1287_v27 }
 0x44e   :  { %2405 = vpow2.f32 %v2134_v49  ;;  %v2135_v28 = vmul.f32 -1.442695, %v1288_v26  ;;  %v2137_v16 = vmul.f32 -1.442695, %v1290_v29 }
 0x44f   :  { %2407 = vpow2.f32 %v2133_v25 }
 0x450   :  { %2409 = vpow2.f32 %v2135_v28 }
 0x451   :  { %2411 = vtanh.f32 %v1285_v9 }
 0x452   :  { %2413 = vpow2.f32 %v2136_v13 }
 0x453   :  { %2415 = vtanh.f32 %v1289_v46 }
 0x457   :  { %v2404_v3 = vpop.eup %2403 }
 0x458   :  { %v2406_v5 = vpop.eup %2405  ;;  %v1297_v12 = vadd.f32 1.0, %v2404_v3 }
 0x459   :  { %v1309_v53 = vadd.f32 1.0, %v2406_v5  ;;  %v2408_v23 = vpop.eup %2407 }
 0x45a   :  { %2417 = vrcp.f32 %v1297_v12  ;;  %v1298_v4 = vadd.f32 1.0, %v2408_v23  ;;  %v2410_v33 = vpop.eup %2409 }
 0x45b   :  { %2419 = vrcp.f32 %v1309_v53  ;;  %v1310_v34 = vadd.f32 1.0, %v2410_v33  ;;  %v2412_v35 = vpop.eup %2411  ;;  %v3494_v53 = vld [vmem:[#allocation17_spill] sm:$0xff] }
 0x45c   :  { %2421 = vpow2.f32 %v2137_v16  ;;  %v2414_v36 = vpop.eup %2413  ;;  %v1363_v23 = vunpack.c.l.bf16 %v3494_v53 }
 0x45d   :  { %2423 = vrcp.f32 %v1298_v4  ;;  %v2416_v38 = vpop.eup %2415  ;;  %v1323_v27 = vadd.f32 1.0, %v2414_v36  ;;  %v3496_v36 = vld [vmem:[#allocation18_spill] sm:$0xff] }
 0x45e   :  { %2425 = vrcp.f32 %v1310_v34  ;;  %v3495_v34 = vld [vmem:[#allocation16_spill] sm:$0xff] }
 0x45f   :  { %2427 = vrcp.f32 %v1323_v27 }
 0x464   :  { %v2418_v39 = vpop.eup %2417 }
 0x465   :  { %v2420_v9 = vpop.eup %2419  ;;  %v1331_v40 = vmul.f32 %v2418_v39, %v2412_v35  ;;  %v1362_v35 = vunpack.c.l.bf16 %v3495_v34 }
 0x466   :  { %v2422_v41 = vpop.eup %2421  ;;  %v1329_v44 = vmul.f32 %v2420_v9, %v3161_v37 }
 0x467   :  { %v2424_v45 = vpop.eup %2423  ;;  %v1324_v49 = vadd.f32 1.0, %v2422_v41 }
 0x468   :  { %v3252_v46 = vadd.f32 %v1331_v40, %v1329_v44  ;;  %v1332_v47 = vmul.f32 %v2424_v45, %v2416_v38  ;;  %v2426_v48 = vpop.eup %2425  ;;  %v1364_v38 = vunpack.c.l.bf16 %v3496_v36  ;;  %v1367_v45 = vunpack.c.h.bf16 %v3494_v53 }
 0x469   :  { %v1330_v26 = vmul.f32 %v2426_v48, %v3165_v42  ;;  %v2428_v25 = vpop.eup %2427  ;;  %v3493_v42 = vld [vmem:[#allocation15_spill] sm:$0xff] }
 0x46a   :  { %2429 = vtanh.f32 %v3252_v46  ;;  %v1361_v16 = vunpack.c.l.bf16 %v3493_v42  ;;  %v1365_v44 = vunpack.c.h.bf16 %v3493_v42 }
 0x46b   :  { %v3256_v29 = vadd.f32 %v1332_v47, %v1330_v26  ;;  %2431 = vrcp.f32 %v1324_v49  ;;  %v1366_v26 = vunpack.c.h.bf16 %v3495_v34 }
 0x46d   :  { %2433 = vtanh.f32 %v3256_v29 }
 0x474   :  { %v2430_v28 = vpop.eup %2429 }
 0x475   :  { %v2432_v37 = vpop.eup %2431  ;;  %v1337_v3 = vmul.f32 %v2430_v28, %v2428_v25  ;;  %v1368_v25 = vunpack.c.h.bf16 %v3496_v36 }
 0x477   :  { %v2434_v13 = vpop.eup %2433 }
 0x478   :  { %v1338_v5 = vmul.f32 %v2434_v13, %v2432_v37 }
 0x47a   :  { %v1339_v12 = vpack.c.bf16 %v1338_v5, %v1337_v3 }
 0x47c   :  { %2240 = vst [vmem:[%s3438_s6 + $0x18] sm:$0xff] %v1339_v12   ;;  %1402 = vmatmul.mubr.bf16.vlgmr.msra.gmra.mrb[48].mxu0 %v1339_v12  ;;  %1445 = vmatmul.mubr.bf16.vlgmr.msra.gmra.mrb[48].mxu1 %v1339_v12 }
 0x47d   :  { %1542 = vmatpush1.bf16.msra.mxu0 %v3092_v58  ;;  %1585 = vmatpush1.bf16.msra.mxu1 %v3095_v59 }
 0x47e   :  { %1543 = vmatprep.subr.bf16.mxu0 %v3098_v10  ;;  %1586 = vmatprep.subr.bf16.mxu1 %v3101_v57 }
 0x47f   :  { %1573 = vmatprep.mubr.bf16.mxu0 %v3485_v2  ;;  %1616 = vmatprep.mubr.bf16.mxu1 %v3485_v2 }
 0x481   :  { %1544 = vmatpush1.bf16.msra.mxu0 %v3106_v63  ;;  %1587 = vmatpush1.bf16.msra.mxu1 %v3109_v55 }
 0x482   :  { %1545 = vmatprep.subr.bf16.mxu0 %v3112_v32  ;;  %1588 = vmatprep.subr.bf16.mxu1 %v3115_v11 }
 0x485   :  { %1546 = vmatpush1.bf16.msra.mxu0 %v3118_v17  ;;  %1589 = vmatpush1.bf16.msra.mxu1 %v3121_v0 }
 0x486   :  { %1547 = vmatprep.subr.bf16.mxu0 %v3124_v52  ;;  %1590 = vmatprep.subr.bf16.mxu1 %v3184_v18 }
 0x489   :  { %1548 = vmatpush1.bf16.msra.mxu0 %v3187_v50  ;;  %1591 = vmatpush1.bf16.msra.mxu1 %v3190_v15 }
 0x48a   :  { %1549 = vmatprep.subr.bf16.mxu0 %v3193_v7  ;;  %1592 = vmatprep.subr.bf16.mxu1 %v3196_v43 }
 0x48d   :  { %1550 = vmatpush1.bf16.msra.mxu0 %v3199_v1  ;;  %1593 = vmatpush1.bf16.msra.mxu1 %v3202_v54 }
 0x48e   :  { %1551 = vmatprep.subr.bf16.mxu0 %v3205_v60  ;;  %1594 = vmatprep.subr.bf16.mxu1 %v3208_v62 }
 0x491   :  { %1552 = vmatpush1.bf16.msra.mxu0 %v3211_v6  ;;  %1595 = vmatpush1.bf16.msra.mxu1 %v3214_v56 }
 0x492   :  { %1553 = vmatprep.subr.bf16.mxu0 %v3217_v51  ;;  %1596 = vmatprep.subr.bf16.mxu1 %v3220_v14 }
 0x495   :  { %1554 = vmatpush1.bf16.msra.mxu0 %v3223_v19  ;;  %1597 = vmatpush1.bf16.msra.mxu1 %v3226_v8 }
 0x496   :  { %1555 = vmatprep.subr.bf16.mxu0 %v3229_v20  ;;  %1598 = vmatprep.subr.bf16.mxu1 %v3232_v21 }
 0x499   :  { %1556 = vmatpush1.bf16.msra.mxu0 %v3235_v22  ;;  %1599 = vmatpush1.bf16.msra.mxu1 %v3238_v24 }
 0x49a   :  { %1713 = vmatprep.subr.bf16.mxu0 %v3146_v30  ;;  %1756 = vmatprep.subr.bf16.mxu1 %v3149_v31 }
 0x54f   :  { %v1403_v4 = vpop.f32.mrb[48].mxu0  ;;  %v1446_v33 = vpop.f32.mrb[48].mxu1 }
 0x550   :  { %v1455_v39 = vadd.f32 %v1403_v4, %v1361_v16  ;;  %v1457_v9 = vadd.f32 %v1446_v33, %v1363_v23  ;;  %v1405_v40 = vpop.f32.mrb[49].mxu0  ;;  %v1448_v41 = vpop.f32.mrb[49].mxu1 }
 0x551   :  { %v1456_v27 = vadd.f32 %v1405_v40, %v1362_v35  ;;  %v1458_v47 = vadd.f32 %v1448_v41, %v1364_v38  ;;  %v1407_v48 = vpop.f32.mrb[50].mxu0  ;;  %v1450_v49 = vpop.f32.mrb[50].mxu1 }
 0x552   :  { %v2142_v28 = vmul.f32 -1.442695, %v1455_v39  ;;  %v1459_v37 = vadd.f32 %v1407_v48, %v1365_v44  ;;  %v1461_v13 = vadd.f32 %v1450_v49, %v1367_v45  ;;  %v1409_v3 = vpop.f32.mrb[51].mxu0  ;;  %v1452_v5 = vpop.f32.mrb[51].mxu1 }
 0x553   :  { %v2144_v12 = vmul.f32 -1.442695, %v1456_v27  ;;  %v1460_v16 = vadd.f32 %v1409_v3, %v1366_v26  ;;  %v1462_v23 = vadd.f32 %v1452_v5, %v1368_v25  ;;  %v2146_v4 = vmul.f32 -1.442695, %v1458_v47 }
 0x554   :  { %2435 = vpow2.f32 %v2142_v28  ;;  %v2143_v42 = vmul.f32 -1.442695, %v1459_v37 }
 0x555   :  { %2437 = vpow2.f32 %v2144_v12  ;;  %v2145_v53 = vmul.f32 -1.442695, %v1460_v16  ;;  %v2147_v36 = vmul.f32 -1.442695, %v1462_v23 }
 0x556   :  { %2439 = vpow2.f32 %v2143_v42 }
 0x557   :  { %2441 = vpow2.f32 %v2145_v53 }
 0x558   :  { %2443 = vtanh.f32 %v1457_v9 }
 0x559   :  { %2445 = vpow2.f32 %v2146_v4 }
 0x55a   :  { %2447 = vtanh.f32 %v1461_v13 }
 0x55e   :  { %v2436_v33 = vpop.eup %2435 }
 0x55f   :  { %v2438_v34 = vpop.eup %2437  ;;  %v1469_v35 = vadd.f32 1.0, %v2436_v33 }
 0x560   :  { %v1481_v38 = vadd.f32 1.0, %v2438_v34  ;;  %v2440_v39 = vpop.eup %2439 }
 0x561   :  { %2449 = vrcp.f32 %v1469_v35  ;;  %v1470_v40 = vadd.f32 1.0, %v2440_v39  ;;  %v2442_v41 = vpop.eup %2441 }
 0x562   :  { %2451 = vrcp.f32 %v1481_v38  ;;  %v1482_v44 = vadd.f32 1.0, %v2442_v41  ;;  %v2444_v45 = vpop.eup %2443  ;;  %v3498_v38 = vld [vmem:[#allocation21_spill] sm:$0xff] }
 0x563   :  { %2453 = vpow2.f32 %v2147_v36  ;;  %v2446_v27 = vpop.eup %2445  ;;  %v1535_v39 = vunpack.c.l.bf16 %v3498_v38 }
 0x564   :  { %2455 = vrcp.f32 %v1470_v40  ;;  %v2448_v47 = vpop.eup %2447  ;;  %v1495_v37 = vadd.f32 1.0, %v2446_v27  ;;  %v3500_v27 = vld [vmem:[#allocation22_spill] sm:$0xff] }
 0x565   :  { %2457 = vrcp.f32 %v1482_v44  ;;  %v3499_v44 = vld [vmem:[#allocation20_spill] sm:$0xff] }
 0x566   :  { %2459 = vrcp.f32 %v1495_v37 }
 0x56b   :  { %v2450_v48 = vpop.eup %2449 }
 0x56c   :  { %v2452_v9 = vpop.eup %2451  ;;  %v1503_v49 = vmul.f32 %v2450_v48, %v2444_v45  ;;  %v1534_v45 = vunpack.c.l.bf16 %v3499_v44 }
 0x56d   :  { %v2454_v26 = vpop.eup %2453  ;;  %v1501_v25 = vmul.f32 %v2452_v9, %v3252_v46 }
 0x56e   :  { %v2456_v28 = vpop.eup %2455  ;;  %v1496_v12 = vadd.f32 1.0, %v2454_v26 }
 0x56f   :  { %v3305_v13 = vadd.f32 %v1503_v49, %v1501_v25  ;;  %v1504_v3 = vmul.f32 %v2456_v28, %v2448_v47  ;;  %v2458_v5 = vpop.eup %2457  ;;  %v1536_v47 = vunpack.c.l.bf16 %v3500_v27 }
 0x570   :  { %v1502_v16 = vmul.f32 %v2458_v5, %v3256_v29  ;;  %v2460_v42 = vpop.eup %2459  ;;  %v3497_v29 = vld [vmem:[#allocation19_spill] sm:$0xff]  ;;  %v1538_v5 = vunpack.c.h.bf16 %v3499_v44 }
 0x571   :  { %2461 = vtanh.f32 %v3305_v13  ;;  %v1533_v36 = vunpack.c.l.bf16 %v3497_v29  ;;  %v1537_v25 = vunpack.c.h.bf16 %v3497_v29 }
 0x572   :  { %v3309_v23 = vadd.f32 %v1504_v3, %v1502_v16  ;;  %2463 = vrcp.f32 %v1496_v12  ;;  %v1540_v12 = vunpack.c.h.bf16 %v3500_v27 }
 0x574   :  { %2465 = vtanh.f32 %v3309_v23 }
 0x57b   :  { %v2462_v53 = vpop.eup %2461 }
 0x57c   :  { %v2464_v46 = vpop.eup %2463  ;;  %v1509_v33 = vmul.f32 %v2462_v53, %v2460_v42 }
 0x57e   :  { %v2466_v4 = vpop.eup %2465 }
 0x57f   :  { %v1510_v34 = vmul.f32 %v2466_v4, %v2464_v46 }
 0x581   :  { %v1511_v35 = vpack.c.bf16 %v1510_v34, %v1509_v33 }
 0x583   :  { %2241 = vst [vmem:[%s3438_s6 + $0x20] sm:$0xff] %v1511_v35   ;;  %1574 = vmatmul.mubr.bf16.vlgmr.msra.gmra.mrb[52].mxu0 %v1511_v35  ;;  %1617 = vmatmul.mubr.bf16.vlgmr.msra.gmra.mrb[52].mxu1 %v1511_v35 }
 0x584   :  { %1714 = vmatpush1.bf16.msra.mxu0 %v3092_v58  ;;  %1757 = vmatpush1.bf16.msra.mxu1 %v3095_v59 }
 0x585   :  { %1715 = vmatprep.subr.bf16.mxu0 %v3098_v10  ;;  %1758 = vmatprep.subr.bf16.mxu1 %v3101_v57 }
 0x586   :  { %1745 = vmatprep.mubr.bf16.mxu0 %v3485_v2  ;;  %1788 = vmatprep.mubr.bf16.mxu1 %v3485_v2 }
 0x588   :  { %1716 = vmatpush1.bf16.msra.mxu0 %v3106_v63  ;;  %1759 = vmatpush1.bf16.msra.mxu1 %v3109_v55 }
 0x589   :  { %1717 = vmatprep.subr.bf16.mxu0 %v3112_v32  ;;  %1760 = vmatprep.subr.bf16.mxu1 %v3115_v11 }
 0x58c   :  { %1718 = vmatpush1.bf16.msra.mxu0 %v3118_v17  ;;  %1761 = vmatpush1.bf16.msra.mxu1 %v3121_v0 }
 0x58d   :  { %1719 = vmatprep.subr.bf16.mxu0 %v3124_v52  ;;  %1762 = vmatprep.subr.bf16.mxu1 %v3184_v18 }
 0x590   :  { %1720 = vmatpush1.bf16.msra.mxu0 %v3187_v50  ;;  %1763 = vmatpush1.bf16.msra.mxu1 %v3190_v15 }
 0x591   :  { %1721 = vmatprep.subr.bf16.mxu0 %v3193_v7  ;;  %1764 = vmatprep.subr.bf16.mxu1 %v3196_v43 }
 0x594   :  { %1722 = vmatpush1.bf16.msra.mxu0 %v3199_v1  ;;  %1765 = vmatpush1.bf16.msra.mxu1 %v3202_v54 }
 0x595   :  { %1723 = vmatprep.subr.bf16.mxu0 %v3205_v60  ;;  %1766 = vmatprep.subr.bf16.mxu1 %v3208_v62 }
 0x598   :  { %1724 = vmatpush1.bf16.msra.mxu0 %v3211_v6  ;;  %1767 = vmatpush1.bf16.msra.mxu1 %v3214_v56 }
 0x599   :  { %1725 = vmatprep.subr.bf16.mxu0 %v3217_v51  ;;  %1768 = vmatprep.subr.bf16.mxu1 %v3220_v14 }
 0x59c   :  { %1726 = vmatpush1.bf16.msra.mxu0 %v3223_v19  ;;  %1769 = vmatpush1.bf16.msra.mxu1 %v3226_v8 }
 0x59d   :  { %1727 = vmatprep.subr.bf16.mxu0 %v3229_v20  ;;  %1770 = vmatprep.subr.bf16.mxu1 %v3232_v21 }
 0x5a0   :  { %1728 = vmatpush1.bf16.msra.mxu0 %v3235_v22  ;;  %1771 = vmatpush1.bf16.msra.mxu1 %v3238_v24 }
 0x5a1   :  { %1885 = vmatprep.subr.bf16.mxu0 %v3146_v30  ;;  %1928 = vmatprep.subr.bf16.mxu1 %v3149_v31  ;;  %v1539_v30 = vunpack.c.h.bf16 %v3498_v38 }
 0x656   :  { %v1575_v40 = vpop.f32.mrb[52].mxu0  ;;  %v1618_v41 = vpop.f32.mrb[52].mxu1 }
 0x657   :  { %v1627_v48 = vadd.f32 %v1575_v40, %v1533_v36  ;;  %v1629_v9 = vadd.f32 %v1618_v41, %v1535_v39  ;;  %v1577_v49 = vpop.f32.mrb[53].mxu0  ;;  %v1620_v26 = vpop.f32.mrb[53].mxu1 }
 0x658   :  { %v1628_v28 = vadd.f32 %v1577_v49, %v1534_v45  ;;  %v1630_v31 = vadd.f32 %v1620_v26, %v1536_v47  ;;  %v1579_v37 = vpop.f32.mrb[54].mxu0  ;;  %v1622_v3 = vpop.f32.mrb[54].mxu1 }
 0x659   :  { %v2152_v16 = vmul.f32 -1.442695, %v1627_v48  ;;  %v1631_v42 = vadd.f32 %v1579_v37, %v1537_v25  ;;  %v1633_v53 = vadd.f32 %v1622_v3, %v1539_v30  ;;  %v1581_v46 = vpop.f32.mrb[55].mxu0  ;;  %v1624_v4 = vpop.f32.mrb[55].mxu1 }
 0x65a   :  { %v2154_v33 = vmul.f32 -1.442695, %v1628_v28  ;;  %v1632_v34 = vadd.f32 %v1581_v46, %v1538_v5  ;;  %v1634_v35 = vadd.f32 %v1624_v4, %v1540_v12  ;;  %v2156_v38 = vmul.f32 -1.442695, %v1630_v31 }
 0x65b   :  { %2467 = vpow2.f32 %v2152_v16  ;;  %v2153_v29 = vmul.f32 -1.442695, %v1631_v42 }
 0x65c   :  { %2469 = vpow2.f32 %v2154_v33  ;;  %v2155_v36 = vmul.f32 -1.442695, %v1632_v34  ;;  %v2157_v44 = vmul.f32 -1.442695, %v1634_v35 }
 0x65d   :  { %2471 = vpow2.f32 %v2153_v29 }
 0x65e   :  { %2473 = vpow2.f32 %v2155_v36 }
 0x65f   :  { %2475 = vtanh.f32 %v1629_v9 }
 0x660   :  { %2477 = vpow2.f32 %v2156_v38 }
 0x661   :  { %2479 = vtanh.f32 %v1633_v53 }
 0x665   :  { %v2468_v39 = vpop.eup %2467 }
 0x666   :  { %v2470_v40 = vpop.eup %2469  ;;  %v1641_v41 = vadd.f32 1.0, %v2468_v39 }
 0x667   :  { %v1653_v45 = vadd.f32 1.0, %v2470_v40  ;;  %v2472_v27 = vpop.eup %2471 }
 0x668   :  { %2481 = vrcp.f32 %v1641_v41  ;;  %v1642_v47 = vadd.f32 1.0, %v2472_v27  ;;  %v2474_v48 = vpop.eup %2473 }
 0x669   :  { %2483 = vrcp.f32 %v1653_v45  ;;  %v1654_v49 = vadd.f32 1.0, %v2474_v48  ;;  %v2476_v26 = vpop.eup %2475 }
 0x66a   :  { %2485 = vpow2.f32 %v2157_v44  ;;  %v2478_v25 = vpop.eup %2477 }
 0x66b   :  { %2487 = vrcp.f32 %v1642_v47  ;;  %v2480_v30 = vpop.eup %2479  ;;  %v1667_v12 = vadd.f32 1.0, %v2478_v25 }
 0x66c   :  { %2489 = vrcp.f32 %v1654_v49 }
 0x66d   :  { %2491 = vrcp.f32 %v1667_v12 }
 0x672   :  { %v2482_v28 = vpop.eup %2481 }
 0x673   :  { %v2484_v9 = vpop.eup %2483  ;;  %v1675_v31 = vmul.f32 %v2482_v28, %v2476_v26 }
 0x674   :  { %v2486_v37 = vpop.eup %2485  ;;  %v1673_v3 = vmul.f32 %v2484_v9, %v3305_v13 }
 0x675   :  { %v2488_v5 = vpop.eup %2487  ;;  %v1668_v46 = vadd.f32 1.0, %v2486_v37 }
 0x676   :  { %v3358_v16 = vadd.f32 %v1675_v31, %v1673_v3  ;;  %v1676_v42 = vmul.f32 %v2488_v5, %v2480_v30  ;;  %v2490_v53 = vpop.eup %2489 }
 0x677   :  { %v1674_v4 = vmul.f32 %v2490_v53, %v3309_v23  ;;  %v2492_v34 = vpop.eup %2491 }
 0x678   :  { %2493 = vtanh.f32 %v3358_v16 }
 0x679   :  { %v3362_v33 = vadd.f32 %v1676_v42, %v1674_v4  ;;  %2495 = vrcp.f32 %v1668_v46 }
 0x67b   :  { %2497 = vtanh.f32 %v3362_v33 }
 0x682   :  { %v2494_v35 = vpop.eup %2493 }
 0x683   :  { %v2496_v13 = vpop.eup %2495  ;;  %v1681_v36 = vmul.f32 %v2494_v35, %v2492_v34 }
 0x685   :  { %v2498_v29 = vpop.eup %2497 }
 0x686   :  { %v1682_v38 = vmul.f32 %v2498_v29, %v2496_v13 }
 0x688   :  { %v1683_v39 = vpack.c.bf16 %v1682_v38, %v1681_v36 }
 0x68a   :  { %2242 = vst [vmem:[%s3438_s6 + $0x28] sm:$0xff] %v1683_v39   ;;  %1746 = vmatmul.mubr.bf16.vlgmr.msra.gmra.mrb[56].mxu0 %v1683_v39  ;;  %1789 = vmatmul.mubr.bf16.vlgmr.msra.gmra.mrb[56].mxu1 %v1683_v39 }
 0x68b   :  { %1886 = vmatpush1.bf16.msra.mxu0 %v3092_v58  ;;  %1929 = vmatpush1.bf16.msra.mxu1 %v3095_v59  ;;  %v3501_v58 = vld [vmem:[#allocation24_spill] sm:$0xff] }
 0x68c   :  { %1887 = vmatprep.subr.bf16.mxu0 %v3098_v10  ;;  %1930 = vmatprep.subr.bf16.mxu1 %v3101_v57  ;;  %v1707_v59 = vunpack.c.l.bf16 %v3501_v58 }
 0x68d   :  { %1917 = vmatprep.mubr.bf16.mxu0 %v3485_v2  ;;  %1960 = vmatprep.mubr.bf16.mxu1 %v3485_v2  ;;  %v1705_v2 = vunpack.c.l.bf16 %v2990_v61 }
 0x68f   :  { %1888 = vmatpush1.bf16.msra.mxu0 %v3106_v63  ;;  %1931 = vmatpush1.bf16.msra.mxu1 %v3109_v55  ;;  %v3502_v63 = vld [vmem:[#allocation23_spill] sm:$0xff] }
 0x690   :  { %1889 = vmatprep.subr.bf16.mxu0 %v3112_v32  ;;  %1932 = vmatprep.subr.bf16.mxu1 %v3115_v11  ;;  %v1706_v55 = vunpack.c.l.bf16 %v3502_v63  ;;  %v3503_v32 = vld [vmem:[#allocation25_spill] sm:$0xff] }
 0x691   :  { %v1708_v11 = vunpack.c.l.bf16 %v3503_v32 }
 0x693   :  { %1890 = vmatpush1.bf16.msra.mxu0 %v3118_v17  ;;  %1933 = vmatpush1.bf16.msra.mxu1 %v3121_v0 }
 0x694   :  { %1891 = vmatprep.subr.bf16.mxu0 %v3124_v52  ;;  %1934 = vmatprep.subr.bf16.mxu1 %v3184_v18 }
 0x697   :  { %1892 = vmatpush1.bf16.msra.mxu0 %v3187_v50  ;;  %1935 = vmatpush1.bf16.msra.mxu1 %v3190_v15  ;;  %v1709_v50 = vunpack.c.h.bf16 %v2990_v61  ;;  %v1711_v15 = vunpack.c.h.bf16 %v3501_v58 }
 0x698   :  { %1893 = vmatprep.subr.bf16.mxu0 %v3193_v7  ;;  %1936 = vmatprep.subr.bf16.mxu1 %v3196_v43 }
 0x69b   :  { %1894 = vmatpush1.bf16.msra.mxu0 %v3199_v1  ;;  %1937 = vmatpush1.bf16.msra.mxu1 %v3202_v54 }
 0x69c   :  { %1895 = vmatprep.subr.bf16.mxu0 %v3205_v60  ;;  %1938 = vmatprep.subr.bf16.mxu1 %v3208_v62  ;;  %v1710_v60 = vunpack.c.h.bf16 %v3502_v63  ;;  %v1712_v62 = vunpack.c.h.bf16 %v3503_v32 }
 0x69f   :  { %1896 = vmatpush1.bf16.msra.mxu0 %v3211_v6  ;;  %1939 = vmatpush1.bf16.msra.mxu1 %v3214_v56 }
 0x6a0   :  { %1897 = vmatprep.subr.bf16.mxu0 %v3217_v51  ;;  %1940 = vmatprep.subr.bf16.mxu1 %v3220_v14 }
 0x6a3   :  { %1898 = vmatpush1.bf16.msra.mxu0 %v3223_v19  ;;  %1941 = vmatpush1.bf16.msra.mxu1 %v3226_v8 }
 0x6a4   :  { %1899 = vmatprep.subr.bf16.mxu0 %v3229_v20  ;;  %1942 = vmatprep.subr.bf16.mxu1 %v3232_v21 }
 0x6a7   :  { %1900 = vmatpush1.bf16.msra.mxu0 %v3235_v22  ;;  %1943 = vmatpush1.bf16.msra.mxu1 %v3238_v24 }
 0x75d   :  { %v1747_v10 = vpop.f32.mrb[56].mxu0  ;;  %v1790_v57 = vpop.f32.mrb[56].mxu1 }
 0x75e   :  { %v1799_v17 = vadd.f32 %v1747_v10, %v1705_v2  ;;  %v1801_v0 = vadd.f32 %v1790_v57, %v1707_v59  ;;  %v1749_v52 = vpop.f32.mrb[57].mxu0  ;;  %v1792_v18 = vpop.f32.mrb[57].mxu1  ;;  %v3505_v59 = vld [vmem:[#allocation28_spill] sm:$0xff] }
 0x75f   :  { %v1800_v7 = vadd.f32 %v1749_v52, %v1706_v55  ;;  %v1802_v43 = vadd.f32 %v1792_v18, %v1708_v11  ;;  %v1751_v1 = vpop.f32.mrb[58].mxu0  ;;  %v1794_v54 = vpop.f32.mrb[58].mxu1  ;;  %v1879_v10 = vunpack.c.l.bf16 %v3505_v59  ;;  %v3506_v55 = vld [vmem:[#allocation27_spill] sm:$0xff]  ;;  %v3507_v11 = vld [vmem:[#allocation29_spill] sm:$0xff] }
 0x760   :  { %v2162_v6 = vmul.f32 -1.442695, %v1799_v17  ;;  %v1803_v56 = vadd.f32 %v1751_v1, %v1709_v50  ;;  %v1805_v51 = vadd.f32 %v1794_v54, %v1711_v15  ;;  %v1753_v14 = vpop.f32.mrb[59].mxu0  ;;  %v1796_v19 = vpop.f32.mrb[59].mxu1  ;;  %v1878_v32 = vunpack.c.l.bf16 %v3506_v55 }
 0x761   :  { %v2164_v8 = vmul.f32 -1.442695, %v1800_v7  ;;  %v1804_v20 = vadd.f32 %v1753_v14, %v1710_v60  ;;  %v1806_v21 = vadd.f32 %v1796_v19, %v1712_v62  ;;  %v2166_v24 = vmul.f32 -1.442695, %v1802_v43 }
 0x762   :  { %2499 = vpow2.f32 %v2162_v6  ;;  %v2163_v61 = vmul.f32 -1.442695, %v1803_v56  ;;  %v1880_v17 = vunpack.c.l.bf16 %v3507_v11  ;;  %v1883_v7 = vunpack.c.h.bf16 %v3505_v59 }
 0x763   :  { %2501 = vpow2.f32 %v2164_v8  ;;  %v2165_v22 = vmul.f32 -1.442695, %v1804_v20  ;;  %v2167_v44 = vmul.f32 -1.442695, %v1806_v21  ;;  %v1882_v62 = vunpack.c.h.bf16 %v3506_v55 }
 0x764   :  { %2503 = vpow2.f32 %v2163_v61  ;;  %v1884_v6 = vunpack.c.h.bf16 %v3507_v11 }
 0x765   :  { %2505 = vpow2.f32 %v2165_v22 }
 0x766   :  { %2507 = vtanh.f32 %v1801_v0 }
 0x767   :  { %2509 = vpow2.f32 %v2166_v24 }
 0x768   :  { %2511 = vtanh.f32 %v1805_v51 }
 0x76c   :  { %v2500_v23 = vpop.eup %2499 }
 0x76d   :  { %v2502_v40 = vpop.eup %2501  ;;  %v1813_v41 = vadd.f32 1.0, %v2500_v23 }
 0x76e   :  { %v1825_v45 = vadd.f32 1.0, %v2502_v40  ;;  %v2504_v27 = vpop.eup %2503 }
 0x76f   :  { %2513 = vrcp.f32 %v1813_v41  ;;  %v1814_v47 = vadd.f32 1.0, %v2504_v27  ;;  %v2506_v48 = vpop.eup %2505 }
 0x770   :  { %2515 = vrcp.f32 %v1825_v45  ;;  %v1826_v49 = vadd.f32 1.0, %v2506_v48  ;;  %v2508_v26 = vpop.eup %2507 }
 0x771   :  { %2517 = vpow2.f32 %v2167_v44  ;;  %v2510_v25 = vpop.eup %2509 }
 0x772   :  { %2519 = vrcp.f32 %v1814_v47  ;;  %v2512_v30 = vpop.eup %2511  ;;  %v1839_v12 = vadd.f32 1.0, %v2510_v25 }
 0x773   :  { %2521 = vrcp.f32 %v1826_v49 }
 0x774   :  { %2523 = vrcp.f32 %v1839_v12 }
 0x779   :  { %v2514_v28 = vpop.eup %2513 }
 0x77a   :  { %v2516_v9 = vpop.eup %2515  ;;  %v1847_v31 = vmul.f32 %v2514_v28, %v2508_v26 }
 0x77b   :  { %v2518_v37 = vpop.eup %2517  ;;  %v1845_v3 = vmul.f32 %v2516_v9, %v3358_v16 }
 0x77c   :  { %v2520_v5 = vpop.eup %2519  ;;  %v1840_v4 = vadd.f32 1.0, %v2518_v37 }
 0x77d   :  { %v3409_v42 = vadd.f32 %v1847_v31, %v1845_v3  ;;  %v1848_v53 = vmul.f32 %v2520_v5, %v2512_v30  ;;  %v2522_v46 = vpop.eup %2521 }
 0x77e   :  { %v1846_v34 = vmul.f32 %v2522_v46, %v3362_v33  ;;  %v2524_v13 = vpop.eup %2523  ;;  %v3504_v33 = vld [vmem:[#allocation26_spill] sm:$0xff] }
 0x77f   :  { %2525 = vtanh.f32 %v3409_v42  ;;  %v1877_v58 = vunpack.c.l.bf16 %v3504_v33  ;;  %v1881_v15 = vunpack.c.h.bf16 %v3504_v33 }
 0x780   :  { %v3413_v35 = vadd.f32 %v1848_v53, %v1846_v34  ;;  %2527 = vrcp.f32 %v1840_v4 }
 0x782   :  { %2529 = vtanh.f32 %v3413_v35 }
 0x789   :  { %v2526_v29 = vpop.eup %2525 }
 0x78a   :  { %v2528_v16 = vpop.eup %2527  ;;  %v1853_v38 = vmul.f32 %v2526_v29, %v2524_v13 }
 0x78c   :  { %v2530_v36 = vpop.eup %2529 }
 0x78d   :  { %v1854_v39 = vmul.f32 %v2530_v36, %v2528_v16 }
 0x78f   :  { %v1855_v2 = vpack.c.bf16 %v1854_v39, %v1853_v38 }
 0x791   :  { %2243 = vst [vmem:[%s3438_s6 + $0x30] sm:$0xff] %v1855_v2   ;;  %1918 = vmatmul.mubr.bf16.vlgmr.msra.gmra.mrb[60].mxu0 %v1855_v2  ;;  %1961 = vmatmul.mubr.bf16.vlgmr.msra.gmra.mrb[60].mxu1 %v1855_v2 }
 0x864   :  { %v1919_v57 = vpop.f32.mrb[60].mxu0  ;;  %v1962_v63 = vpop.f32.mrb[60].mxu1 }
 0x865   :  { %v1971_v0 = vadd.f32 %v1919_v57, %v1877_v58  ;;  %v1973_v52 = vadd.f32 %v1962_v63, %v1879_v10  ;;  %v1921_v18 = vpop.f32.mrb[61].mxu0  ;;  %v1964_v50 = vpop.f32.mrb[61].mxu1 }
 0x866   :  { %v1972_v43 = vadd.f32 %v1921_v18, %v1878_v32  ;;  %v1974_v1 = vadd.f32 %v1964_v50, %v1880_v17  ;;  %v1923_v54 = vpop.f32.mrb[62].mxu0  ;;  %v1966_v60 = vpop.f32.mrb[62].mxu1 }
 0x867   :  { %v2172_v56 = vmul.f32 -1.442695, %v1971_v0  ;;  %v1975_v51 = vadd.f32 %v1923_v54, %v1881_v15  ;;  %v1977_v14 = vadd.f32 %v1966_v60, %v1883_v7  ;;  %v1925_v19 = vpop.f32.mrb[63].mxu0  ;;  %v1968_v8 = vpop.f32.mrb[63].mxu1 }
 0x868   :  { %v2174_v20 = vmul.f32 -1.442695, %v1972_v43  ;;  %v1976_v21 = vadd.f32 %v1925_v19, %v1882_v62  ;;  %v1978_v61 = vadd.f32 %v1968_v8, %v1884_v6  ;;  %v2176_v23 = vmul.f32 -1.442695, %v1974_v1 }
 0x869   :  { %2531 = vpow2.f32 %v2172_v56  ;;  %v2173_v22 = vmul.f32 -1.442695, %v1975_v51 }
 0x86a   :  { %2533 = vpow2.f32 %v2174_v20  ;;  %v2175_v24 = vmul.f32 -1.442695, %v1976_v21  ;;  %v2177_v45 = vmul.f32 -1.442695, %v1978_v61 }
 0x86b   :  { %2535 = vpow2.f32 %v2173_v22 }
 0x86c   :  { %2537 = vpow2.f32 %v2175_v24 }
 0x86d   :  { %2539 = vtanh.f32 %v1973_v52 }
 0x86e   :  { %2541 = vpow2.f32 %v2176_v23 }
 0x86f   :  { %2543 = vtanh.f32 %v1977_v14 }
 0x873   :  { %v2532_v40 = vpop.eup %2531 }
 0x874   :  { %v2534_v41 = vpop.eup %2533  ;;  %v1985_v44 = vadd.f32 1.0, %v2532_v40 }
 0x875   :  { %v1997_v27 = vadd.f32 1.0, %v2534_v41  ;;  %v2536_v47 = vpop.eup %2535 }
 0x876   :  { %2545 = vrcp.f32 %v1985_v44  ;;  %v1986_v48 = vadd.f32 1.0, %v2536_v47  ;;  %v2538_v49 = vpop.eup %2537 }
 0x877   :  { %2547 = vrcp.f32 %v1997_v27  ;;  %v1998_v26 = vadd.f32 1.0, %v2538_v49  ;;  %v2540_v25 = vpop.eup %2539 }
 0x878   :  { %2549 = vpow2.f32 %v2177_v45  ;;  %v2542_v30 = vpop.eup %2541 }
 0x879   :  { %2551 = vrcp.f32 %v1986_v48  ;;  %v2544_v28 = vpop.eup %2543  ;;  %v2011_v3 = vadd.f32 1.0, %v2542_v30 }
 0x87a   :  { %2553 = vrcp.f32 %v1998_v26 }
 0x87b   :  { %2555 = vrcp.f32 %v2011_v3 }
 0x880   :  { %v2546_v9 = vpop.eup %2545 }
 0x881   :  { %v2548_v31 = vpop.eup %2547  ;;  %v2019_v37 = vmul.f32 %v2546_v9, %v2540_v25 }
 0x882   :  { %v2550_v5 = vpop.eup %2549  ;;  %v2017_v12 = vmul.f32 %v2548_v31, %v3409_v42 }
 0x883   :  { %v2552_v53 = vpop.eup %2551  ;;  %v2012_v13 = vadd.f32 1.0, %v2550_v5 }
 0x884   :  { %v2021_v46 = vadd.f32 %v2019_v37, %v2017_v12  ;;  %v2020_v4 = vmul.f32 %v2552_v53, %v2544_v28  ;;  %v2554_v34 = vpop.eup %2553 }
 0x885   :  { %v2018_v29 = vmul.f32 %v2554_v34, %v3413_v35  ;;  %v2556_v36 = vpop.eup %2555 }
 0x886   :  { %2557 = vtanh.f32 %v2021_v46 }
 0x887   :  { %v2022_v16 = vadd.f32 %v2020_v4, %v2018_v29  ;;  %2559 = vrcp.f32 %v2012_v13 }
 0x889   :  { %2561 = vtanh.f32 %v2022_v16 }
 0x890   :  { %v2558_v38 = vpop.eup %2557 }
 0x891   :  { %v2025_v39 = vmul.f32 %v2558_v38, %v2556_v36  ;;  %v2560_v2 = vpop.eup %2559 }
 0x893   :  { %v2562_v33 = vpop.eup %2561 }
 0x894   :  { %v2026_v58 = vmul.f32 %v2562_v33, %v2560_v2 }
 0x896   :  { %v2027_v59 = vpack.c.bf16 %v2026_v58, %v2025_v39 }
 0x898   :  { %2244 = vst [vmem:[%s3438_s6 + $0x38] sm:$0xff] %v2027_v59  }
 0x899   :  { %2045 = vsyncpa [#allocation6], 1 }

// kernel: lstm_forward.3
= control target key start
LH: loop header
LB: loop body
LE: loop exit
PB: predicated region body
PF: predicated region fallthrough
CT: control target
= control target key end

     0   :  { %v3870_v1 = vmov 0   ;;  %vm2783_vm0 = vmmov 0   ;;  %vm2213_vm1 = vcmask 31744   ;;  %s3861_s1 = inlined_call_operand.vmem [shape: bf16[128,512], index: 1, kind: input, shape index: {}]   ;;  %s3862_s0 = inlined_call_operand.vmem [shape: bf16[8,16,128], index: 0, kind: input, shape index: {}]   ;;  %s3863_s2 = inlined_call_operand.vmem [shape: bf16[128,512], index: 2, kind: input, shape index: {}]   ;;  %s3864_s4 = inlined_call_operand.vmem [shape: f32[16,128], index: 4, kind: input, shape index: {}]   ;;  %s3865_s3 = inlined_call_operand.vmem [shape: f32[1,512], index: 3, kind: input, shape index: {}]   ;;  %s3866_s5 = inlined_call_operand.vmem [shape: f32[16,128], index: 5, kind: input, shape index: {}]   ;;  %s3867_s6 = inlined_call_operand.vmem [shape: bf16[128,4], index: 6, kind: input, shape index: {}]   ;;  %s3868_s7 = inlined_call_operand.vmem [shape: f32[1,4], index: 7, kind: input, shape index: {}]   ;;  %s3869_s8 = inlined_call_operand.vmem [shape: f32[16,4], index: 8, kind: output, shape index: {}]  }
   0x1   :  { %v2381_v0 = vld [vmem:[%s3861_s1 + $0x4] ss:$16 sps:$4 sm:$0xff]   ;;  %384 = vmatprep.mubr.bf16.mxu0 %v3870_v1  ;;  %497 = vmatprep.mubr.bf16.mxu1 %v3870_v1  ;;  %v2383_v2 = vld [vmem:[%s3861_s1 + $0xc] ss:$16 sps:$4 sm:$0xff]   ;;  %v2385_v3 = vld [vmem:[%s3861_s1] ss:$16 sps:$4 sm:$0xff]  }
   0x2   :  { %352 = vmatprep.subr.bf16.mxu0 %v2381_v0  ;;  %v2386_v4 = vld [vmem:[%s3861_s1 + $0x8] ss:$16 sps:$4 sm:$0xff]   ;;  %465 = vmatprep.subr.bf16.mxu1 %v2383_v2  ;;  %v2387_v5 = vld [vmem:[%s3861_s1 + $0x24] ss:$16 sps:$4 sm:$0xff]   ;;  %v2389_v6 = vld [vmem:[%s3861_s1 + $0x2c] ss:$16 sps:$4 sm:$0xff]  }
   0x3   :  { %353 = vmatpush1.bf16.msra.mxu0 %v2385_v3  ;;  %466 = vmatpush1.bf16.msra.mxu1 %v2386_v4  ;;  %v2391_v7 = vld [vmem:[%s3861_s1 + $0x20] ss:$16 sps:$4 sm:$0xff]   ;;  %v2392_v8 = vld [vmem:[%s3861_s1 + $0x28] ss:$16 sps:$4 sm:$0xff]   ;;  %v2393_v9 = vld [vmem:[%s3861_s1 + $0x44] ss:$16 sps:$4 sm:$0xff]  }
   0x4   :  { %354 = vmatprep.subr.bf16.mxu0 %v2387_v5  ;;  %467 = vmatprep.subr.bf16.mxu1 %v2389_v6  ;;  %v2395_v10 = vld [vmem:[%s3861_s1 + $0x4c] ss:$16 sps:$4 sm:$0xff]   ;;  %v2397_v11 = vld [vmem:[%s3861_s1 + $0x40] ss:$16 sps:$4 sm:$0xff]   ;;  %v2398_v12 = vld [vmem:[%s3861_s1 + $0x48] ss:$16 sps:$4 sm:$0xff]  }
   0x5   :  { %v2399_v13 = vld [vmem:[%s3861_s1 + $0x64] ss:$16 sps:$4 sm:$0xff]   ;;  %v2401_v14 = vld [vmem:[%s3861_s1 + $0x6c] ss:$16 sps:$4 sm:$0xff]   ;;  %v2403_v15 = vld [vmem:[%s3861_s1 + $0x60] ss:$16 sps:$4 sm:$0xff]  }
   0x6   :  { %v2404_v16 = vld [vmem:[%s3861_s1 + $0x68] ss:$16 sps:$4 sm:$0xff]   ;;  %v2405_v17 = vld [vmem:[%s3861_s1 + $0x84] ss:$16 sps:$4 sm:$0xff]   ;;  %v2407_v18 = vld [vmem:[%s3861_s1 + $0x8c] ss:$16 sps:$4 sm:$0xff]  }
   0x7   :  { %355 = vmatpush1.bf16.msra.mxu0 %v2391_v7  ;;  %468 = vmatpush1.bf16.msra.mxu1 %v2392_v8  ;;  %v2409_v19 = vld [vmem:[%s3861_s1 + $0x80] ss:$16 sps:$4 sm:$0xff]   ;;  %v2410_v20 = vld [vmem:[%s3861_s1 + $0x88] ss:$16 sps:$4 sm:$0xff]   ;;  %v2411_v21 = vld [vmem:[%s3861_s1 + $0xa4] ss:$16 sps:$4 sm:$0xff]  }
   0x8   :  { %356 = vmatprep.subr.bf16.mxu0 %v2393_v9  ;;  %469 = vmatprep.subr.bf16.mxu1 %v2395_v10  ;;  %v2413_v22 = vld [vmem:[%s3861_s1 + $0xac] ss:$16 sps:$4 sm:$0xff]   ;;  %v2415_v23 = vld [vmem:[%s3861_s1 + $0xa0] ss:$16 sps:$4 sm:$0xff]   ;;  %v2416_v24 = vld [vmem:[%s3861_s1 + $0xa8] ss:$16 sps:$4 sm:$0xff]  }
   0x9   :  { %v2417_v25 = vld [vmem:[%s3861_s1 + $0xc4] ss:$16 sps:$4 sm:$0xff]   ;;  %v2419_v26 = vld [vmem:[%s3861_s1 + $0xcc] ss:$16 sps:$4 sm:$0xff]   ;;  %v2421_v27 = vld [vmem:[%s3861_s1 + $0xc0] ss:$16 sps:$4 sm:$0xff]  }
   0xa   :  { %v2422_v28 = vld [vmem:[%s3861_s1 + $0xc8] ss:$16 sps:$4 sm:$0xff]   ;;  %v2423_v29 = vld [vmem:[%s3861_s1 + $0xe4] ss:$16 sps:$4 sm:$0xff]   ;;  %v2425_v30 = vld [vmem:[%s3861_s1 + $0xec] ss:$16 sps:$4 sm:$0xff]  }
   0xb   :  { %357 = vmatpush1.bf16.msra.mxu0 %v2397_v11  ;;  %470 = vmatpush1.bf16.msra.mxu1 %v2398_v12  ;;  %v2427_v31 = vld [vmem:[%s3861_s1 + $0xe0] ss:$16 sps:$4 sm:$0xff]   ;;  %v2428_v32 = vld [vmem:[%s3861_s1 + $0xe8] ss:$16 sps:$4 sm:$0xff]   ;;  %v2930_v33 = vld [vmem:[%s3863_s2 + $0x4] ss:$16 sps:$4 sm:$0xff]  }
   0xc   :  { %358 = vmatprep.subr.bf16.mxu0 %v2399_v13  ;;  %471 = vmatprep.subr.bf16.mxu1 %v2401_v14  ;;  %v2935_v34 = vld [vmem:[%s3863_s2 + $0xc] ss:$16 sps:$4 sm:$0xff]   ;;  %v2429_v35 = vld [vmem:[%s3862_s0] sm:$0xff]   ;;  %v2955_v38 = vld [vmem:[%s3863_s2 + $0x8] ss:$16 sps:$4 sm:$0xff]   ;;  %v124_v13 = vlaneseq }
   0xd   :  { %v2943_v36 = vld [vmem:[%s3863_s2] ss:$16 sps:$4 sm:$0xff]   ;;  %v2949_v37 = vld [vmem:[%s3863_s2 + $0x24] ss:$16 sps:$4 sm:$0xff]   ;;  %v2960_v39 = vld [vmem:[%s3863_s2 + $0x2c] ss:$16 sps:$4 sm:$0xff]  }
   0xe   :  { %v2967_v40 = vld [vmem:[%s3863_s2 + $0x20] ss:$16 sps:$4 sm:$0xff]   ;;  %v2974_v41 = vld [vmem:[%s3863_s2 + $0x44] ss:$16 sps:$4 sm:$0xff]   ;;  %v2980_v42 = vld [vmem:[%s3863_s2 + $0x28] ss:$16 sps:$4 sm:$0xff]  }
   0xf   :  { %359 = vmatpush1.bf16.msra.mxu0 %v2403_v15  ;;  %472 = vmatpush1.bf16.msra.mxu1 %v2404_v16  ;;  %v2433_v43 = vld [vmem:[%s3862_s0 + $0x8] sm:$0xff]   ;;  %v2990_v44 = vld [vmem:[%s3863_s2 + $0x40] ss:$16 sps:$4 sm:$0xff]   ;;  %v2995_v45 = vld [vmem:[%s3863_s2 + $0x64] ss:$16 sps:$4 sm:$0xff]   ;;  %v125_v14 = vshrl.u32 %v124_v13, 7 }
  0x10   :  { %360 = vmatprep.subr.bf16.mxu0 %v2405_v17  ;;  %473 = vmatprep.subr.bf16.mxu1 %v2407_v18  ;;  %v3001_v46 = vld [vmem:[%s3863_s2 + $0x4c] ss:$16 sps:$4 sm:$0xff]   ;;  %v3007_v47 = vld [vmem:[%s3863_s2 + $0x48] ss:$16 sps:$4 sm:$0xff]   ;;  %v3020_v49 = vld [vmem:[%s3863_s2 + $0x60] ss:$16 sps:$4 sm:$0xff]  }
  0x11   :  { %v3012_v48 = vld [vmem:[%s3863_s2 + $0x6c] ss:$16 sps:$4 sm:$0xff]   ;;  %v3026_v50 = vld [vmem:[%s3863_s2 + $0x84] ss:$16 sps:$4 sm:$0xff]   ;;  %v3033_v51 = vld [vmem:[%s3863_s2 + $0x68] ss:$16 sps:$4 sm:$0xff]  }
  0x12   :  { %v2439_v52 = vld [vmem:[%s3862_s0 + $0x10] sm:$0xff]   ;;  %v3048_v54 = vld [vmem:[%s3863_s2 + $0x8c] ss:$16 sps:$4 sm:$0xff]   ;;  %v3060_v56 = vld [vmem:[%s3863_s2 + $0x88] ss:$16 sps:$4 sm:$0xff]   ;;  %v134_v15 = vsub.s32 2, %v125_v14 }
  0x13   :  { %361 = vmatpush1.bf16.msra.mxu0 %v2409_v19  ;;  %474 = vmatpush1.bf16.msra.mxu1 %v2410_v20  ;;  %v3042_v53 = vld [vmem:[%s3863_s2 + $0x80] ss:$16 sps:$4 sm:$0xff]   ;;  %v3054_v55 = vld [vmem:[%s3863_s2 + $0xa4] ss:$16 sps:$4 sm:$0xff]   ;;  %v3065_v57 = vld [vmem:[%s3863_s2 + $0xac] ss:$16 sps:$4 sm:$0xff]  }
  0x14   :  { %362 = vmatprep.subr.bf16.mxu0 %v2411_v21  ;;  %475 = vmatprep.subr.bf16.mxu1 %v2413_v22  ;;  %v3073_v58 = vld [vmem:[%s3863_s2 + $0xa0] ss:$16 sps:$4 sm:$0xff]   ;;  %v3080_v59 = vld [vmem:[%s3863_s2 + $0xc4] ss:$16 sps:$4 sm:$0xff]   ;;  %v3086_v60 = vld [vmem:[%s3863_s2 + $0xa8] ss:$16 sps:$4 sm:$0xff]  }
  0x15   :  { %v2446_v61 = vld [vmem:[%s3862_s0 + $0x18] sm:$0xff]   ;;  %v3096_v62 = vld [vmem:[%s3863_s2 + $0xc0] ss:$16 sps:$4 sm:$0xff]   ;;  %v3108_v0 = vld [vmem:[%s3863_s2 + $0xe4] ss:$16 sps:$4 sm:$0xff]   ;;  %v138_v16 = vsub.s32 3, %v125_v14 }
  0x16   :  { %v3101_v63 = vld [vmem:[%s3863_s2 + $0xcc] ss:$16 sps:$4 sm:$0xff]   ;;  %v3113_v2 = vld [vmem:[%s3863_s2 + $0xc8] ss:$16 sps:$4 sm:$0xff]   ;;  %v3127_v4 = vld [vmem:[%s3863_s2 + $0xe0] ss:$16 sps:$4 sm:$0xff]  }
  0x17   :  { %363 = vmatpush1.bf16.msra.mxu0 %v2415_v23  ;;  %476 = vmatpush1.bf16.msra.mxu1 %v2416_v24  ;;  %v3118_v3 = vld [vmem:[%s3863_s2 + $0xec] ss:$16 sps:$4 sm:$0xff]   ;;  %v3134_v5 = vld [vmem:[%s3863_s2 + $0xe8] ss:$16 sps:$4 sm:$0xff]   ;;  %v2453_v6 = vld [vmem:[%s3862_s0 + $0x20] sm:$0xff]   ;;  %v126_v17 = vsub.s32 0, %v125_v14 }
  0x18   :  { %364 = vmatprep.subr.bf16.mxu0 %v2417_v25  ;;  %477 = vmatprep.subr.bf16.mxu1 %v2419_v26  ;;  %v2460_v7 = vld [vmem:[%s3862_s0 + $0x28] sm:$0xff]   ;;  %v2467_v8 = vld [vmem:[%s3862_s0 + $0x30] sm:$0xff]   ;;  %v2475_v9 = vld [vmem:[%s3862_s0 + $0x38] sm:$0xff]   ;;  %v130_v19 = vsub.s32 1, %v125_v14 }
  0x19   :  { %v34_v10 = vld [vmem:[%s3864_s4] sm:$0xff]  ;;  %v35_v11 = vld [vmem:[%s3864_s4 + $0x8] sm:$0xff] }
  0x1a   :  { %v36_v12 = vpack.c.bf16 %v35_v11, %v34_v10  ;;  %v122_v18 = vld [vmem:[%s3865_s3] sm:$0xf] }
  0x1b   :  { %365 = vmatpush1.bf16.msra.mxu0 %v2421_v27  ;;  %478 = vmatpush1.bf16.msra.mxu1 %v2422_v28  ;;  %v3204_v20 = vrot.slane %v122_v18, %v134_v15  ;;  %v3206_v21 = vrot.slane %v122_v18, %v138_v16  ;;  %v3208_v22 = vrot.slane %v122_v18, %v126_v17 }
  0x1c   :  { %366 = vmatprep.subr.bf16.mxu0 %v2423_v29  ;;  %479 = vmatprep.subr.bf16.mxu1 %v2425_v30  ;;  %v3210_v24 = vrot.slane %v122_v18, %v130_v19 }
  0x1f   :  { %367 = vmatpush1.bf16.msra.mxu0 %v2427_v31  ;;  %480 = vmatpush1.bf16.msra.mxu1 %v2428_v32 }
  0x20   :  { %817 = vmatprep.subr.bf16.mxu0 %v2930_v33  ;;  %860 = vmatprep.subr.bf16.mxu1 %v2935_v34 }
  0x22   :  { %385 = vmatmul.mubr.bf16.vlgmr.msra.gmra.mrb[0].mxu0 %v2429_v35  ;;  %498 = vmatmul.mubr.bf16.vlgmr.msra.gmra.mrb[0].mxu1 %v2429_v35 }
  0x23   :  { %818 = vmatpush1.bf16.msra.mxu0 %v2943_v36  ;;  %394 = vmatprep.mubr.bf16.mxu0 %v3870_v1 }
  0x24   :  { %507 = vmatprep.mubr.bf16.mxu1 %v3870_v1  ;;  %819 = vmatprep.subr.bf16.mxu0 %v2949_v37 }
  0x25   :  { %861 = vmatpush1.bf16.msra.mxu1 %v2955_v38 }
  0x26   :  { %862 = vmatprep.subr.bf16.mxu1 %v2960_v39 }
  0x27   :  { %820 = vmatpush1.bf16.msra.mxu0 %v2967_v40 }
  0x28   :  { %821 = vmatprep.subr.bf16.mxu0 %v2974_v41 }
  0x29   :  { %863 = vmatpush1.bf16.msra.mxu1 %v2980_v42 }
  0x2a   :  { %395 = vmatmul.mubr.bf16.gmra.mrb[4].mxu0 %v2433_v43  ;;  %508 = vmatmul.mubr.bf16.gmra.mrb[4].mxu1 %v2433_v43 }
  0x2b   :  { %404 = vmatprep.mubr.bf16.mxu0 %v3870_v1  ;;  %517 = vmatprep.mubr.bf16.mxu1 %v3870_v1 }
  0x2c   :  { %822 = vmatpush1.bf16.msra.mxu0 %v2990_v44  ;;  %864 = vmatprep.subr.bf16.mxu1 %v3001_v46 }
  0x2d   :  { %823 = vmatprep.subr.bf16.mxu0 %v2995_v45  ;;  %865 = vmatpush1.bf16.msra.mxu1 %v3007_v47 }
  0x2e   :  { %866 = vmatprep.subr.bf16.mxu1 %v3012_v48 }
  0x30   :  { %824 = vmatpush1.bf16.msra.mxu0 %v3020_v49 }
  0x31   :  { %825 = vmatprep.subr.bf16.mxu0 %v3026_v50  ;;  %867 = vmatpush1.bf16.msra.mxu1 %v3033_v51 }
  0x32   :  { %405 = vmatmul.mubr.bf16.gmra.mrb[8].mxu0 %v2439_v52  ;;  %518 = vmatmul.mubr.bf16.gmra.mrb[8].mxu1 %v2439_v52 }
  0x33   :  { %414 = vmatprep.mubr.bf16.mxu0 %v3870_v1  ;;  %527 = vmatprep.mubr.bf16.mxu1 %v3870_v1 }
  0x34   :  { %826 = vmatpush1.bf16.msra.mxu0 %v3042_v53  ;;  %868 = vmatprep.subr.bf16.mxu1 %v3048_v54 }
  0x35   :  { %827 = vmatprep.subr.bf16.mxu0 %v3054_v55  ;;  %869 = vmatpush1.bf16.msra.mxu1 %v3060_v56 }
  0x36   :  { %870 = vmatprep.subr.bf16.mxu1 %v3065_v57 }
  0x38   :  { %828 = vmatpush1.bf16.msra.mxu0 %v3073_v58 }
  0x39   :  { %829 = vmatprep.subr.bf16.mxu0 %v3080_v59  ;;  %871 = vmatpush1.bf16.msra.mxu1 %v3086_v60 }
  0x3a   :  { %415 = vmatmul.mubr.bf16.gmra.mrb[12].mxu0 %v2446_v61  ;;  %528 = vmatmul.mubr.bf16.gmra.mrb[12].mxu1 %v2446_v61 }
  0x3b   :  { %424 = vmatprep.mubr.bf16.mxu0 %v3870_v1  ;;  %537 = vmatprep.mubr.bf16.mxu1 %v3870_v1 }
  0x3c   :  { %830 = vmatpush1.bf16.msra.mxu0 %v3096_v62  ;;  %872 = vmatprep.subr.bf16.mxu1 %v3101_v63 }
  0x3d   :  { %831 = vmatprep.subr.bf16.mxu0 %v3108_v0  ;;  %873 = vmatpush1.bf16.msra.mxu1 %v3113_v2 }
  0x3e   :  { %874 = vmatprep.subr.bf16.mxu1 %v3118_v3 }
  0x40   :  { %832 = vmatpush1.bf16.msra.mxu0 %v3127_v4 }
  0x41   :  { %875 = vmatpush1.bf16.msra.mxu1 %v3134_v5  ;;  %979 = vmatprep.subr.bf16.mxu0 %v2930_v33 }
  0x42   :  { %425 = vmatmul.mubr.bf16.gmra.mrb[16].mxu0 %v2453_v6  ;;  %538 = vmatmul.mubr.bf16.gmra.mrb[16].mxu1 %v2453_v6 }
  0x43   :  { %434 = vmatprep.mubr.bf16.mxu0 %v3870_v1  ;;  %547 = vmatprep.mubr.bf16.mxu1 %v3870_v1 }
  0x44   :  { %1022 = vmatprep.subr.bf16.mxu1 %v2935_v34 }
  0x4a   :  { %435 = vmatmul.mubr.bf16.gmra.mrb[20].mxu0 %v2460_v7  ;;  %548 = vmatmul.mubr.bf16.gmra.mrb[20].mxu1 %v2460_v7 }
  0x4b   :  { %444 = vmatprep.mubr.bf16.mxu0 %v3870_v1  ;;  %557 = vmatprep.mubr.bf16.mxu1 %v3870_v1 }
  0x52   :  { %445 = vmatmul.mubr.bf16.gmra.mrb[24].mxu0 %v2467_v8  ;;  %558 = vmatmul.mubr.bf16.gmra.mrb[24].mxu1 %v2467_v8 }
  0x53   :  { %454 = vmatprep.mubr.bf16.mxu0 %v3870_v1  ;;  %567 = vmatprep.mubr.bf16.mxu1 %v3870_v1 }
  0x5a   :  { %455 = vmatmul.mubr.bf16.gmra.mrb[28].mxu0 %v2475_v9  ;;  %568 = vmatmul.mubr.bf16.gmra.mrb[28].mxu1 %v2475_v9 }
  0x5b   :  { %849 = vmatprep.mubr.bf16.mxu0 %v3870_v1  ;;  %892 = vmatprep.mubr.bf16.mxu1 %v3870_v1 }
  0x62   :  { %850 = vmatmul.mubr.bf16.vlgmr.msra.gmra.mrb[32].mxu0 %v36_v12  ;;  %893 = vmatmul.mubr.bf16.vlgmr.msra.gmra.mrb[32].mxu1 %v36_v12 }
  0x63   :  { %980 = vmatpush1.bf16.msra.mxu0 %v2943_v36  ;;  %1023 = vmatpush1.bf16.msra.mxu1 %v2955_v38 }
  0x64   :  { %981 = vmatprep.subr.bf16.mxu0 %v2949_v37  ;;  %1024 = vmatprep.subr.bf16.mxu1 %v2960_v39 }
  0x65   :  { %1011 = vmatprep.mubr.bf16.mxu0 %v3870_v1  ;;  %1054 = vmatprep.mubr.bf16.mxu1 %v3870_v1 }
  0x67   :  { %982 = vmatpush1.bf16.msra.mxu0 %v2967_v40  ;;  %1025 = vmatpush1.bf16.msra.mxu1 %v2980_v42 }
  0x68   :  { %983 = vmatprep.subr.bf16.mxu0 %v2974_v41  ;;  %1026 = vmatprep.subr.bf16.mxu1 %v3001_v46 }
  0x6b   :  { %984 = vmatpush1.bf16.msra.mxu0 %v2990_v44  ;;  %1027 = vmatpush1.bf16.msra.mxu1 %v3007_v47 }
  0x6c   :  { %985 = vmatprep.subr.bf16.mxu0 %v2995_v45  ;;  %1028 = vmatprep.subr.bf16.mxu1 %v3012_v48 }
  0x6f   :  { %986 = vmatpush1.bf16.msra.mxu0 %v3020_v49  ;;  %1029 = vmatpush1.bf16.msra.mxu1 %v3033_v51 }
  0x70   :  { %987 = vmatprep.subr.bf16.mxu0 %v3026_v50  ;;  %1030 = vmatprep.subr.bf16.mxu1 %v3048_v54 }
  0x73   :  { %988 = vmatpush1.bf16.msra.mxu0 %v3042_v53  ;;  %1031 = vmatpush1.bf16.msra.mxu1 %v3060_v56 }
  0x74   :  { %989 = vmatprep.subr.bf16.mxu0 %v3054_v55  ;;  %1032 = vmatprep.subr.bf16.mxu1 %v3065_v57 }
  0x77   :  { %990 = vmatpush1.bf16.msra.mxu0 %v3073_v58  ;;  %1033 = vmatpush1.bf16.msra.mxu1 %v3086_v60 }
  0x78   :  { %991 = vmatprep.subr.bf16.mxu0 %v3080_v59  ;;  %1034 = vmatprep.subr.bf16.mxu1 %v3101_v63 }
  0x7b   :  { %992 = vmatpush1.bf16.msra.mxu0 %v3096_v62  ;;  %1035 = vmatpush1.bf16.msra.mxu1 %v3113_v2 }
  0x7c   :  { %993 = vmatprep.subr.bf16.mxu0 %v3108_v0  ;;  %1036 = vmatprep.subr.bf16.mxu1 %v3118_v3 }
  0x7f   :  { %994 = vmatpush1.bf16.msra.mxu0 %v3127_v4  ;;  %1037 = vmatpush1.bf16.msra.mxu1 %v3134_v5 }
  0x80   :  { %1141 = vmatprep.subr.bf16.mxu0 %v2930_v33  ;;  %1184 = vmatprep.subr.bf16.mxu1 %v2935_v34 }
  0xf5   :  { %v386_v23 = vpop.f32.mrb[0].mxu0  ;;  %v499_v25 = vpop.f32.mrb[0].mxu1 }
  0xf6   :  { %v388_v26 = vpop.f32.mrb[1].mxu0  ;;  %v500_v27 = vadd.f32 %v499_v25, %v3204_v20  ;;  %v501_v28 = vpop.f32.mrb[1].mxu1  ;;  %v387_v32 = vadd.f32 %v386_v23, %v3208_v22 }
  0xf7   :  { %v390_v29 = vpop.f32.mrb[2].mxu0  ;;  %v502_v30 = vadd.f32 %v501_v28, %v3206_v21  ;;  %v503_v31 = vpop.f32.mrb[2].mxu1  ;;  %v389_v6 = vadd.f32 %v388_v26, %v3210_v24 }
  0xf8   :  { %v391_v35 = vadd.f32 %v390_v29, %v3208_v22  ;;  %v392_v43 = vpop.f32.mrb[3].mxu0  ;;  %v504_v52 = vadd.f32 %v503_v31, %v3204_v20  ;;  %v505_v61 = vpop.f32.mrb[3].mxu1 }
  0xf9   :  { %v393_v7 = vadd.f32 %v392_v43, %v3210_v24  ;;  %v506_v8 = vadd.f32 %v505_v61, %v3206_v21 }
  0xfa   :  { %v3220_v9 = vpack.c.bf16 %v391_v35, %v387_v32  ;;  %v3222_v10 = vpack.c.bf16 %v504_v52, %v500_v27 }
  0xfb   :  { %v3224_v11 = vpack.c.bf16 %v393_v7, %v389_v6  ;;  %v3226_v12 = vpack.c.bf16 %v506_v8, %v502_v30 }
  0xfd   :  { %v396_v13 = vpop.f32.mrb[4].mxu0  ;;  %v509_v14 = vpop.f32.mrb[4].mxu1 }
  0xfe   :  { %v397_v15 = vadd.f32 %v396_v13, %v3208_v22  ;;  %v398_v16 = vpop.f32.mrb[5].mxu0  ;;  %v510_v17 = vadd.f32 %v509_v14, %v3204_v20  ;;  %v511_v18 = vpop.f32.mrb[5].mxu1 }
  0xff   :  { %v399_v19 = vadd.f32 %v398_v16, %v3210_v24  ;;  %v400_v23 = vpop.f32.mrb[6].mxu0  ;;  %v512_v25 = vadd.f32 %v511_v18, %v3206_v21  ;;  %v513_v26 = vpop.f32.mrb[6].mxu1 }
 0x100   :  { %v401_v27 = vadd.f32 %v400_v23, %v3208_v22  ;;  %v402_v28 = vpop.f32.mrb[7].mxu0  ;;  %v514_v29 = vadd.f32 %v513_v26, %v3204_v20  ;;  %v515_v30 = vpop.f32.mrb[7].mxu1 }
 0x101   :  { %v403_v31 = vadd.f32 %v402_v28, %v3210_v24  ;;  %v516_v32 = vadd.f32 %v515_v30, %v3206_v21 }
 0x102   :  { %v3236_v35 = vpack.c.bf16 %v401_v27, %v397_v15  ;;  %v3238_v43 = vpack.c.bf16 %v514_v29, %v510_v17 }
 0x103   :  { %v3240_v52 = vpack.c.bf16 %v403_v31, %v399_v19  ;;  %v3242_v61 = vpack.c.bf16 %v516_v32, %v512_v25 }
 0x105   :  { %3894 = vst [vmem:[#allocation5_spill] sm:$0xff] %v3242_v61  ;;  %v406_v6 = vpop.f32.mrb[8].mxu0  ;;  %v519_v7 = vpop.f32.mrb[8].mxu1 }
 0x106   :  { %v407_v8 = vadd.f32 %v406_v6, %v3208_v22  ;;  %v408_v13 = vpop.f32.mrb[9].mxu0  ;;  %v520_v14 = vadd.f32 %v519_v7, %v3204_v20  ;;  %v521_v16 = vpop.f32.mrb[9].mxu1 }
 0x107   :  { %v409_v18 = vadd.f32 %v408_v13, %v3210_v24  ;;  %v410_v23 = vpop.f32.mrb[10].mxu0  ;;  %v522_v15 = vadd.f32 %v521_v16, %v3206_v21  ;;  %v523_v26 = vpop.f32.mrb[10].mxu1 }
 0x108   :  { %v411_v17 = vadd.f32 %v410_v23, %v3208_v22  ;;  %v412_v19 = vpop.f32.mrb[11].mxu0  ;;  %v524_v25 = vadd.f32 %v523_v26, %v3204_v20  ;;  %v525_v27 = vpop.f32.mrb[11].mxu1 }
 0x109   :  { %v413_v28 = vadd.f32 %v412_v19, %v3210_v24  ;;  %v526_v29 = vadd.f32 %v525_v27, %v3206_v21 }
 0x10a   :  { %v3252_v30 = vpack.c.bf16 %v411_v17, %v407_v8  ;;  %v3254_v31 = vpack.c.bf16 %v524_v25, %v520_v14 }
 0x10b   :  { %v3256_v32 = vpack.c.bf16 %v413_v28, %v409_v18  ;;  %v3258_v6 = vpack.c.bf16 %v526_v29, %v522_v15 }
 0x10c   :  { %3895 = vst [vmem:[#allocation6_spill] sm:$0xff] %v3252_v30  ;;  %3896 = vst [vmem:[#allocation7_spill] sm:$0xff] %v3254_v31 }
 0x10d   :  { %3897 = vst [vmem:[#allocation8_spill] sm:$0xff] %v3256_v32  ;;  %3898 = vst [vmem:[#allocation9_spill] sm:$0xff] %v3258_v6  ;;  %v416_v7 = vpop.f32.mrb[12].mxu0  ;;  %v529_v13 = vpop.f32.mrb[12].mxu1 }
 0x10e   :  { %v417_v16 = vadd.f32 %v416_v7, %v3208_v22  ;;  %v418_v23 = vpop.f32.mrb[13].mxu0  ;;  %v530_v26 = vadd.f32 %v529_v13, %v3204_v20  ;;  %v531_v1 = vpop.f32.mrb[13].mxu1 }
 0x10f   :  { %v419_v19 = vadd.f32 %v418_v23, %v3210_v24  ;;  %v420_v61 = vpop.f32.mrb[14].mxu0  ;;  %v532_v8 = vadd.f32 %v531_v1, %v3206_v21  ;;  %v533_v17 = vpop.f32.mrb[14].mxu1 }
 0x110   :  { %v421_v14 = vadd.f32 %v420_v61, %v3208_v22  ;;  %v422_v18 = vpop.f32.mrb[15].mxu0  ;;  %v534_v15 = vadd.f32 %v533_v17, %v3204_v20  ;;  %v535_v25 = vpop.f32.mrb[15].mxu1 }
 0x111   :  { %v423_v27 = vadd.f32 %v422_v18, %v3210_v24  ;;  %v536_v28 = vadd.f32 %v535_v25, %v3206_v21 }
 0x112   :  { %v3268_v29 = vpack.c.bf16 %v421_v14, %v417_v16  ;;  %v3270_v7 = vpack.c.bf16 %v534_v15, %v530_v26 }
 0x113   :  { %v3272_v13 = vpack.c.bf16 %v423_v27, %v419_v19  ;;  %v3274_v23 = vpack.c.bf16 %v536_v28, %v532_v8 }
 0x114   :  { %3899 = vst [vmem:[#allocation10_spill] sm:$0xff] %v3268_v29  ;;  %3900 = vst [vmem:[#allocation11_spill] sm:$0xff] %v3270_v7 }
 0x115   :  { %3901 = vst [vmem:[#allocation12_spill] sm:$0xff] %v3272_v13  ;;  %3902 = vst [vmem:[#allocation13_spill] sm:$0xff] %v3274_v23  ;;  %v426_v1 = vpop.f32.mrb[16].mxu0  ;;  %v539_v6 = vpop.f32.mrb[16].mxu1 }
 0x116   :  { %v427_v61 = vadd.f32 %v426_v1, %v3208_v22  ;;  %v428_v32 = vpop.f32.mrb[17].mxu0  ;;  %v540_v17 = vadd.f32 %v539_v6, %v3204_v20  ;;  %v541_v31 = vpop.f32.mrb[17].mxu1 }
 0x117   :  { %v429_v18 = vadd.f32 %v428_v32, %v3210_v24  ;;  %v430_v30 = vpop.f32.mrb[18].mxu0  ;;  %v542_v16 = vadd.f32 %v541_v31, %v3206_v21  ;;  %v543_v14 = vpop.f32.mrb[18].mxu1 }
 0x118   :  { %v431_v26 = vadd.f32 %v430_v30, %v3208_v22  ;;  %v432_v19 = vpop.f32.mrb[19].mxu0  ;;  %v544_v8 = vadd.f32 %v543_v14, %v3204_v20  ;;  %v545_v15 = vpop.f32.mrb[19].mxu1 }
 0x119   :  { %v433_v25 = vadd.f32 %v432_v19, %v3210_v24  ;;  %v546_v27 = vadd.f32 %v545_v15, %v3206_v21 }
 0x11a   :  { %v3284_v28 = vpack.c.bf16 %v431_v26, %v427_v61  ;;  %v3286_v6 = vpack.c.bf16 %v544_v8, %v540_v17 }
 0x11b   :  { %v3288_v1 = vpack.c.bf16 %v433_v25, %v429_v18  ;;  %v3290_v32 = vpack.c.bf16 %v546_v27, %v542_v16 }
 0x11c   :  { %3903 = vst [vmem:[#allocation14_spill] sm:$0xff] %v3284_v28  ;;  %3904 = vst [vmem:[#allocation15_spill] sm:$0xff] %v3286_v6 }
 0x11d   :  { %3905 = vst [vmem:[#allocation16_spill] sm:$0xff] %v3288_v1  ;;  %3906 = vst [vmem:[#allocation17_spill] sm:$0xff] %v3290_v32  ;;  %v436_v31 = vpop.f32.mrb[20].mxu0  ;;  %v549_v23 = vpop.f32.mrb[20].mxu1 }
 0x11e   :  { %v437_v30 = vadd.f32 %v436_v31, %v3208_v22  ;;  %v438_v13 = vpop.f32.mrb[21].mxu0  ;;  %v550_v14 = vadd.f32 %v549_v23, %v3204_v20  ;;  %v551_v7 = vpop.f32.mrb[21].mxu1 }
 0x11f   :  { %v439_v19 = vadd.f32 %v438_v13, %v3210_v24  ;;  %v440_v29 = vpop.f32.mrb[22].mxu0  ;;  %v552_v61 = vadd.f32 %v551_v7, %v3206_v21  ;;  %v553_v26 = vpop.f32.mrb[22].mxu1 }
 0x120   :  { %v441_v17 = vadd.f32 %v440_v29, %v3208_v22  ;;  %v442_v18 = vpop.f32.mrb[23].mxu0  ;;  %v554_v16 = vadd.f32 %v553_v26, %v3204_v20  ;;  %v555_v8 = vpop.f32.mrb[23].mxu1 }
 0x121   :  { %v443_v15 = vadd.f32 %v442_v18, %v3210_v24  ;;  %v556_v25 = vadd.f32 %v555_v8, %v3206_v21 }
 0x122   :  { %v3300_v27 = vpack.c.bf16 %v441_v17, %v437_v30  ;;  %v3302_v23 = vpack.c.bf16 %v554_v16, %v550_v14 }
 0x123   :  { %v3304_v31 = vpack.c.bf16 %v443_v15, %v439_v19  ;;  %v3306_v13 = vpack.c.bf16 %v556_v25, %v552_v61 }
 0x124   :  { %3907 = vst [vmem:[#allocation18_spill] sm:$0xff] %v3300_v27  ;;  %3908 = vst [vmem:[#allocation19_spill] sm:$0xff] %v3302_v23 }
 0x125   :  { %3909 = vst [vmem:[#allocation20_spill] sm:$0xff] %v3304_v31  ;;  %3910 = vst [vmem:[#allocation21_spill] sm:$0xff] %v3306_v13  ;;  %v446_v7 = vpop.f32.mrb[24].mxu0  ;;  %v559_v32 = vpop.f32.mrb[24].mxu1 }
 0x126   :  { %v447_v29 = vadd.f32 %v446_v7, %v3208_v22  ;;  %v448_v1 = vpop.f32.mrb[25].mxu0  ;;  %v560_v26 = vadd.f32 %v559_v32, %v3204_v20  ;;  %v561_v6 = vpop.f32.mrb[25].mxu1 }
 0x127   :  { %v449_v18 = vadd.f32 %v448_v1, %v3210_v24  ;;  %v450_v28 = vpop.f32.mrb[26].mxu0  ;;  %v562_v30 = vadd.f32 %v561_v6, %v3206_v21  ;;  %v563_v17 = vpop.f32.mrb[26].mxu1 }
 0x128   :  { %v451_v14 = vadd.f32 %v450_v28, %v3208_v22  ;;  %v452_v19 = vpop.f32.mrb[27].mxu0  ;;  %v564_v61 = vadd.f32 %v563_v17, %v3204_v20  ;;  %v565_v16 = vpop.f32.mrb[27].mxu1 }
 0x129   :  { %v453_v8 = vadd.f32 %v452_v19, %v3210_v24  ;;  %v566_v15 = vadd.f32 %v565_v16, %v3206_v21 }
 0x12a   :  { %v3316_v25 = vpack.c.bf16 %v451_v14, %v447_v29  ;;  %v3318_v32 = vpack.c.bf16 %v564_v61, %v560_v26 }
 0x12b   :  { %v3320_v7 = vpack.c.bf16 %v453_v8, %v449_v18  ;;  %v3322_v1 = vpack.c.bf16 %v566_v15, %v562_v30 }
 0x12d   :  { %3911 = vst [vmem:[#allocation22_spill] sm:$0xff] %v3322_v1  ;;  %v456_v6 = vpop.f32.mrb[28].mxu0  ;;  %v569_v13 = vpop.f32.mrb[28].mxu1 }
 0x12e   :  { %v457_v28 = vadd.f32 %v456_v6, %v3208_v22  ;;  %v458_v31 = vpop.f32.mrb[29].mxu0  ;;  %v570_v17 = vadd.f32 %v569_v13, %v3204_v20  ;;  %v571_v23 = vpop.f32.mrb[29].mxu1 }
 0x12f   :  { %v459_v19 = vadd.f32 %v458_v31, %v3210_v24  ;;  %v460_v27 = vpop.f32.mrb[30].mxu0  ;;  %v572_v29 = vadd.f32 %v571_v23, %v3206_v21  ;;  %v573_v14 = vpop.f32.mrb[30].mxu1  ;;  %v649_v23 = vunpack.c.l.bf16 %v3220_v9 }
 0x130   :  { %v461_v26 = vadd.f32 %v460_v27, %v3208_v22  ;;  %v462_v18 = vpop.f32.mrb[31].mxu0  ;;  %v574_v30 = vadd.f32 %v573_v14, %v3204_v20  ;;  %v575_v61 = vpop.f32.mrb[31].mxu1  ;;  %v651_v22 = vunpack.c.l.bf16 %v3222_v10  ;;  %v650_v20 = vunpack.c.l.bf16 %v3224_v11 }
 0x131   :  { %v463_v16 = vadd.f32 %v462_v18, %v3210_v24  ;;  %v576_v8 = vadd.f32 %v575_v61, %v3206_v21  ;;  %v652_v24 = vunpack.c.l.bf16 %v3226_v12 }
 0x132   :  { %v3332_v15 = vpack.c.bf16 %v461_v26, %v457_v28  ;;  %v3334_v13 = vpack.c.bf16 %v574_v30, %v570_v17  ;;  %v653_v17 = vunpack.c.h.bf16 %v3220_v9 }
 0x133   :  { %v3336_v6 = vpack.c.bf16 %v463_v16, %v459_v19  ;;  %v3338_v31 = vpack.c.bf16 %v576_v8, %v572_v29  ;;  %v655_v19 = vunpack.c.h.bf16 %v3222_v10  ;;  %v654_v16 = vunpack.c.h.bf16 %v3224_v11 }
 0x134   :  { %3912 = vst [vmem:[#allocation23_spill] sm:$0xff] %v3332_v15  ;;  %3913 = vst [vmem:[#allocation24_spill] sm:$0xff] %v3334_v13  ;;  %v656_v8 = vunpack.c.h.bf16 %v3226_v12 }
 0x135   :  { %3914 = vst [vmem:[#allocation25_spill] sm:$0xff] %v3336_v6  ;;  %3915 = vst [vmem:[#allocation26_spill] sm:$0xff] %v3338_v31  ;;  %v851_v27 = vpop.f32.mrb[32].mxu0  ;;  %v894_v1 = vpop.f32.mrb[32].mxu1 }
 0x136   :  { %v903_v14 = vadd.f32 %v851_v27, %v649_v23  ;;  %v905_v21 = vadd.f32 %v894_v1, %v651_v22  ;;  %v853_v28 = vpop.f32.mrb[33].mxu0  ;;  %v896_v26 = vpop.f32.mrb[33].mxu1 }
 0x137   :  { %v904_v29 = vadd.f32 %v853_v28, %v650_v20  ;;  %v906_v18 = vadd.f32 %v896_v26, %v652_v24  ;;  %v855_v30 = vpop.f32.mrb[34].mxu0  ;;  %v898_v61 = vpop.f32.mrb[34].mxu1 }
 0x138   :  { %v2292_v31 = vmul.f32 -1.442695, %v903_v14  ;;  %v907_v6 = vadd.f32 %v855_v30, %v653_v17  ;;  %v909_v13 = vadd.f32 %v898_v61, %v655_v19  ;;  %v857_v15 = vpop.f32.mrb[35].mxu0  ;;  %v900_v23 = vpop.f32.mrb[35].mxu1 }
 0x139   :  { %v2294_v1 = vmul.f32 -1.442695, %v904_v29  ;;  %v908_v22 = vadd.f32 %v857_v15, %v654_v16  ;;  %v910_v27 = vadd.f32 %v900_v23, %v656_v8  ;;  %v2296_v20 = vmul.f32 -1.442695, %v906_v18 }
 0x13a   :  { %2493 = vpow2.f32 %v2292_v31  ;;  %v2293_v9 = vmul.f32 -1.442695, %v907_v6 }
 0x13b   :  { %2495 = vpow2.f32 %v2294_v1  ;;  %v2295_v10 = vmul.f32 -1.442695, %v908_v22  ;;  %v2297_v12 = vmul.f32 -1.442695, %v910_v27  ;;  %v39_v1 = vld [vmem:[%s3866_s5 + $0x8] sm:$0xff] }
 0x13c   :  { %2497 = vpow2.f32 %v2293_v9 }
 0x13d   :  { %2499 = vpow2.f32 %v2295_v10 }
 0x13e   :  { %2501 = vtanh.f32 %v905_v21  ;;  %v38_v21 = vld [vmem:[%s3866_s5] sm:$0xff] }
 0x13f   :  { %2503 = vpow2.f32 %v2296_v20 }
 0x140   :  { %2505 = vtanh.f32 %v909_v13 }
 0x144   :  { %v2494_v24 = vpop.eup %2493 }
 0x145   :  { %v2496_v11 = vpop.eup %2495  ;;  %v917_v28 = vadd.f32 1.0, %v2494_v24 }
 0x146   :  { %v929_v14 = vadd.f32 1.0, %v2496_v11  ;;  %v2498_v26 = vpop.eup %2497 }
 0x147   :  { %2507 = vrcp.f32 %v917_v28  ;;  %v918_v15 = vadd.f32 1.0, %v2498_v26  ;;  %v2500_v17 = vpop.eup %2499 }
 0x148   :  { %2509 = vrcp.f32 %v929_v14  ;;  %v930_v6 = vadd.f32 1.0, %v2500_v17  ;;  %v2502_v31 = vpop.eup %2501 }
 0x149   :  { %2511 = vpow2.f32 %v2297_v12  ;;  %v2504_v19 = vpop.eup %2503 }
 0x14a   :  { %2513 = vrcp.f32 %v918_v15  ;;  %v2506_v29 = vpop.eup %2505  ;;  %v943_v23 = vadd.f32 1.0, %v2504_v19  ;;  %v975_v19 = vunpack.c.h.bf16 %v3236_v35 }
 0x14b   :  { %2515 = vrcp.f32 %v930_v6  ;;  %v3916_v6 = vmov 0  }
 0x14c   :  { %2517 = vrcp.f32 %v943_v23 }
 0x151   :  { %v2508_v18 = vpop.eup %2507 }
 0x152   :  { %v2510_v30 = vpop.eup %2509  ;;  %v951_v61 = vmul.f32 %v2508_v18, %v2502_v31 }
 0x153   :  { %v2512_v13 = vpop.eup %2511  ;;  %v949_v16 = vmul.f32 %v2510_v30, %v38_v21  ;;  %v976_v30 = vunpack.c.h.bf16 %v3240_v52 }
 0x154   :  { %v2514_v8 = vpop.eup %2513  ;;  %v944_v10 = vadd.f32 1.0, %v2512_v13 }
 0x155   :  { %v3354_v22 = vadd.f32 %v951_v61, %v949_v16  ;;  %v952_v27 = vmul.f32 %v2514_v8, %v2506_v29  ;;  %v2516_v9 = vpop.eup %2515 }
 0x156   :  { %v950_v20 = vmul.f32 %v2516_v9, %v39_v1  ;;  %v2518_v11 = vpop.eup %2517 }
 0x157   :  { %2519 = vtanh.f32 %v3354_v22 }
 0x158   :  { %v3357_v24 = vadd.f32 %v952_v27, %v950_v20  ;;  %2521 = vrcp.f32 %v944_v10 }
 0x15a   :  { %2523 = vtanh.f32 %v3357_v24 }
 0x161   :  { %v2520_v28 = vpop.eup %2519 }
 0x162   :  { %v2522_v12 = vpop.eup %2521  ;;  %v957_v26 = vmul.f32 %v2520_v28, %v2518_v11 }
 0x164   :  { %v2524_v14 = vpop.eup %2523 }
 0x165   :  { %v958_v15 = vmul.f32 %v2524_v14, %v2522_v12 }
 0x167   :  { %v959_v17 = vpack.c.bf16 %v958_v15, %v957_v26 }
 0x169   :  { %1012 = vmatmul.mubr.bf16.vlgmr.msra.gmra.mrb[36].mxu0 %v959_v17  ;;  %1055 = vmatmul.mubr.bf16.vlgmr.msra.gmra.mrb[36].mxu1 %v959_v17 }
 0x16a   :  { %1142 = vmatpush1.bf16.msra.mxu0 %v2943_v36  ;;  %1185 = vmatpush1.bf16.msra.mxu1 %v2955_v38  ;;  %v971_v36 = vunpack.c.l.bf16 %v3236_v35 }
 0x16b   :  { %1143 = vmatprep.subr.bf16.mxu0 %v2949_v37  ;;  %1186 = vmatprep.subr.bf16.mxu1 %v2960_v39  ;;  %v973_v37 = vunpack.c.l.bf16 %v3238_v43 }
 0x16c   :  { %1173 = vmatprep.mubr.bf16.mxu0 %v3916_v6  ;;  %1216 = vmatprep.mubr.bf16.mxu1 %v3916_v6 }
 0x16e   :  { %1144 = vmatpush1.bf16.msra.mxu0 %v2967_v40  ;;  %1187 = vmatpush1.bf16.msra.mxu1 %v2980_v42  ;;  %v972_v40 = vunpack.c.l.bf16 %v3240_v52 }
 0x16f   :  { %1145 = vmatprep.subr.bf16.mxu0 %v2974_v41  ;;  %1188 = vmatprep.subr.bf16.mxu1 %v3001_v46  ;;  %v3917_v41 = vld [vmem:[#allocation5_spill] sm:$0xff] }
 0x170   :  { %v974_v42 = vunpack.c.l.bf16 %v3917_v41  ;;  %v978_v61 = vunpack.c.h.bf16 %v3917_v41 }
 0x172   :  { %1146 = vmatpush1.bf16.msra.mxu0 %v2990_v44  ;;  %1189 = vmatpush1.bf16.msra.mxu1 %v3007_v47 }
 0x173   :  { %1147 = vmatprep.subr.bf16.mxu0 %v2995_v45  ;;  %1190 = vmatprep.subr.bf16.mxu1 %v3012_v48 }
 0x176   :  { %1148 = vmatpush1.bf16.msra.mxu0 %v3020_v49  ;;  %1191 = vmatpush1.bf16.msra.mxu1 %v3033_v51 }
 0x177   :  { %1149 = vmatprep.subr.bf16.mxu0 %v3026_v50  ;;  %1192 = vmatprep.subr.bf16.mxu1 %v3048_v54 }
 0x17a   :  { %1150 = vmatpush1.bf16.msra.mxu0 %v3042_v53  ;;  %1193 = vmatpush1.bf16.msra.mxu1 %v3060_v56 }
 0x17b   :  { %1151 = vmatprep.subr.bf16.mxu0 %v3054_v55  ;;  %1194 = vmatprep.subr.bf16.mxu1 %v3065_v57 }
 0x17e   :  { %1152 = vmatpush1.bf16.msra.mxu0 %v3073_v58  ;;  %1195 = vmatpush1.bf16.msra.mxu1 %v3086_v60 }
 0x17f   :  { %1153 = vmatprep.subr.bf16.mxu0 %v3080_v59  ;;  %1196 = vmatprep.subr.bf16.mxu1 %v3101_v63 }
 0x182   :  { %1154 = vmatpush1.bf16.msra.mxu0 %v3096_v62  ;;  %1197 = vmatpush1.bf16.msra.mxu1 %v3113_v2 }
 0x183   :  { %1155 = vmatprep.subr.bf16.mxu0 %v3108_v0  ;;  %1198 = vmatprep.subr.bf16.mxu1 %v3118_v3 }
 0x186   :  { %1156 = vmatpush1.bf16.msra.mxu0 %v3127_v4  ;;  %1199 = vmatpush1.bf16.msra.mxu1 %v3134_v5 }
 0x187   :  { %1303 = vmatprep.subr.bf16.mxu0 %v2930_v33  ;;  %1346 = vmatprep.subr.bf16.mxu1 %v2935_v34  ;;  %v977_v33 = vunpack.c.h.bf16 %v3238_v43 }
 0x23c   :  { %v1013_v38 = vpop.f32.mrb[36].mxu0  ;;  %v1056_v39 = vpop.f32.mrb[36].mxu1 }
 0x23d   :  { %v1065_v44 = vadd.f32 %v1013_v38, %v971_v36  ;;  %v1067_v45 = vadd.f32 %v1056_v39, %v973_v37  ;;  %v1015_v46 = vpop.f32.mrb[37].mxu0  ;;  %v1058_v31 = vpop.f32.mrb[37].mxu1 }
 0x23e   :  { %v1066_v29 = vadd.f32 %v1015_v46, %v972_v40  ;;  %v1068_v34 = vadd.f32 %v1058_v31, %v974_v42  ;;  %v1017_v21 = vpop.f32.mrb[38].mxu0  ;;  %v1060_v18 = vpop.f32.mrb[38].mxu1 }
 0x23f   :  { %v2298_v13 = vmul.f32 -1.442695, %v1065_v44  ;;  %v1069_v16 = vadd.f32 %v1017_v21, %v975_v19  ;;  %v1071_v8 = vadd.f32 %v1060_v18, %v977_v33  ;;  %v1019_v23 = vpop.f32.mrb[39].mxu0  ;;  %v1062_v1 = vpop.f32.mrb[39].mxu1 }
 0x240   :  { %v2300_v27 = vmul.f32 -1.442695, %v1066_v29  ;;  %v1070_v9 = vadd.f32 %v1019_v23, %v976_v30  ;;  %v1072_v10 = vadd.f32 %v1062_v1, %v978_v61  ;;  %v2302_v20 = vmul.f32 -1.442695, %v1068_v34  ;;  %v3419_v1 = vld [vmem:[%s3863_s2 + $0x8] ss:$16 sps:$4 sm:$0xff]  }
 0x241   :  { %2525 = vpow2.f32 %v2298_v13  ;;  %v2299_v35 = vmul.f32 -1.442695, %v1069_v16 }
 0x242   :  { %2527 = vpow2.f32 %v2300_v27  ;;  %v2301_v43 = vmul.f32 -1.442695, %v1070_v9  ;;  %v2303_v12 = vmul.f32 -1.442695, %v1072_v10  ;;  %v3425_v27 = vld [vmem:[%s3863_s2 + $0x24] ss:$16 sps:$4 sm:$0xff]  }
 0x243   :  { %2529 = vpow2.f32 %v2299_v35  ;;  %v3431_v9 = vld [vmem:[%s3863_s2 + $0x2c] ss:$16 sps:$4 sm:$0xff]   ;;  %v3439_v10 = vld [vmem:[%s3863_s2 + $0x20] ss:$16 sps:$4 sm:$0xff]   ;;  %v3445_v35 = vld [vmem:[%s3863_s2 + $0x28] ss:$16 sps:$4 sm:$0xff]  }
 0x244   :  { %2531 = vpow2.f32 %v2301_v43  ;;  %v3451_v43 = vld [vmem:[%s3863_s2 + $0x44] ss:$16 sps:$4 sm:$0xff]  }
 0x245   :  { %2533 = vtanh.f32 %v1067_v45 }
 0x246   :  { %2535 = vpow2.f32 %v2302_v20  ;;  %v3457_v20 = vld [vmem:[%s3863_s2 + $0x4c] ss:$16 sps:$4 sm:$0xff]  }
 0x247   :  { %2537 = vtanh.f32 %v1071_v8 }
 0x24b   :  { %v2526_v11 = vpop.eup %2525 }
 0x24c   :  { %v2528_v52 = vpop.eup %2527  ;;  %v1079_v28 = vadd.f32 1.0, %v2526_v11  ;;  %v3463_v11 = vld [vmem:[%s3863_s2 + $0x40] ss:$16 sps:$4 sm:$0xff]  }
 0x24d   :  { %v1091_v14 = vadd.f32 1.0, %v2528_v52  ;;  %v2530_v26 = vpop.eup %2529  ;;  %v3470_v52 = vld [vmem:[%s3863_s2 + $0x64] ss:$16 sps:$4 sm:$0xff]  }
 0x24e   :  { %2539 = vrcp.f32 %v1079_v28  ;;  %v1080_v15 = vadd.f32 1.0, %v2530_v26  ;;  %v2532_v17 = vpop.eup %2531 }
 0x24f   :  { %2541 = vrcp.f32 %v1091_v14  ;;  %v1092_v36 = vadd.f32 1.0, %v2532_v17  ;;  %v2534_v37 = vpop.eup %2533 }
 0x250   :  { %2543 = vpow2.f32 %v2303_v12  ;;  %v2536_v38 = vpop.eup %2535 }
 0x251   :  { %2545 = vrcp.f32 %v1080_v15  ;;  %v2538_v39 = vpop.eup %2537  ;;  %v1105_v31 = vadd.f32 1.0, %v2536_v38 }
 0x252   :  { %2547 = vrcp.f32 %v1092_v36 }
 0x253   :  { %2549 = vrcp.f32 %v1105_v31 }
 0x258   :  { %v2540_v40 = vpop.eup %2539 }
 0x259   :  { %v2542_v41 = vpop.eup %2541  ;;  %v1113_v42 = vmul.f32 %v2540_v40, %v2534_v37 }
 0x25a   :  { %v2544_v44 = vpop.eup %2543  ;;  %v1111_v45 = vmul.f32 %v2542_v41, %v3354_v22 }
 0x25b   :  { %v2546_v46 = vpop.eup %2545  ;;  %v1106_v34 = vadd.f32 1.0, %v2544_v44 }
 0x25c   :  { %v3403_v19 = vadd.f32 %v1113_v42, %v1111_v45  ;;  %v1114_v33 = vmul.f32 %v2546_v46, %v2538_v39  ;;  %v2548_v29 = vpop.eup %2547 }
 0x25d   :  { %v1112_v21 = vmul.f32 %v2548_v29, %v3357_v24  ;;  %v2550_v30 = vpop.eup %2549  ;;  %v3413_v24 = vld [vmem:[%s3863_s2] ss:$16 sps:$4 sm:$0xff]  }
 0x25e   :  { %2551 = vtanh.f32 %v3403_v19 }
 0x25f   :  { %v3407_v18 = vadd.f32 %v1114_v33, %v1112_v21  ;;  %2553 = vrcp.f32 %v1106_v34 }
 0x261   :  { %2555 = vtanh.f32 %v3407_v18 }
 0x268   :  { %v2552_v61 = vpop.eup %2551 }
 0x269   :  { %v2554_v22 = vpop.eup %2553  ;;  %v1119_v16 = vmul.f32 %v2552_v61, %v2550_v30 }
 0x26b   :  { %v2556_v13 = vpop.eup %2555 }
 0x26c   :  { %v1120_v8 = vmul.f32 %v2556_v13, %v2554_v22 }
 0x26e   :  { %v1121_v23 = vpack.c.bf16 %v1120_v8, %v1119_v16 }
 0x270   :  { %1174 = vmatmul.mubr.bf16.vlgmr.msra.gmra.mrb[40].mxu0 %v1121_v23  ;;  %1217 = vmatmul.mubr.bf16.vlgmr.msra.gmra.mrb[40].mxu1 %v1121_v23 }
 0x271   :  { %1304 = vmatpush1.bf16.msra.mxu0 %v3413_v24  ;;  %1347 = vmatpush1.bf16.msra.mxu1 %v3419_v1 }
 0x272   :  { %1305 = vmatprep.subr.bf16.mxu0 %v3425_v27  ;;  %1348 = vmatprep.subr.bf16.mxu1 %v3431_v9 }
 0x273   :  { %1335 = vmatprep.mubr.bf16.mxu0 %v3916_v6  ;;  %1378 = vmatprep.mubr.bf16.mxu1 %v3916_v6 }
 0x275   :  { %1306 = vmatpush1.bf16.msra.mxu0 %v3439_v10  ;;  %1349 = vmatpush1.bf16.msra.mxu1 %v3445_v35 }
 0x276   :  { %1307 = vmatprep.subr.bf16.mxu0 %v3451_v43  ;;  %1350 = vmatprep.subr.bf16.mxu1 %v3457_v20 }
 0x279   :  { %1308 = vmatpush1.bf16.msra.mxu0 %v3463_v11  ;;  %1351 = vmatpush1.bf16.msra.mxu1 %v3007_v47  ;;  %v3495_v47 = vld [vmem:[%s3863_s2 + $0x4] ss:$16 sps:$4 sm:$0xff]  }
 0x27a   :  { %1309 = vmatprep.subr.bf16.mxu0 %v3470_v52  ;;  %1352 = vmatprep.subr.bf16.mxu1 %v3012_v48  ;;  %v3501_v48 = vld [vmem:[%s3863_s2 + $0xc] ss:$16 sps:$4 sm:$0xff]  }
 0x27d   :  { %1310 = vmatpush1.bf16.msra.mxu0 %v3020_v49  ;;  %1353 = vmatpush1.bf16.msra.mxu1 %v3033_v51  ;;  %v3918_v49 = vld [vmem:[#allocation6_spill] sm:$0xff]  ;;  %v3919_v51 = vld [vmem:[#allocation7_spill] sm:$0xff] }
 0x27e   :  { %1311 = vmatprep.subr.bf16.mxu0 %v3026_v50  ;;  %1354 = vmatprep.subr.bf16.mxu1 %v3048_v54  ;;  %v1133_v50 = vunpack.c.l.bf16 %v3918_v49 }
 0x281   :  { %1312 = vmatpush1.bf16.msra.mxu0 %v3042_v53  ;;  %1355 = vmatpush1.bf16.msra.mxu1 %v3060_v56  ;;  %v1135_v53 = vunpack.c.l.bf16 %v3919_v51  ;;  %v3920_v56 = vld [vmem:[#allocation8_spill] sm:$0xff] }
 0x282   :  { %1313 = vmatprep.subr.bf16.mxu0 %v3054_v55  ;;  %1356 = vmatprep.subr.bf16.mxu1 %v3065_v57  ;;  %v1134_v57 = vunpack.c.l.bf16 %v3920_v56  ;;  %v1138_v14 = vunpack.c.h.bf16 %v3920_v56 }
 0x285   :  { %1314 = vmatpush1.bf16.msra.mxu0 %v3073_v58  ;;  %1357 = vmatpush1.bf16.msra.mxu1 %v3086_v60  ;;  %v3921_v58 = vld [vmem:[#allocation9_spill] sm:$0xff] }
 0x286   :  { %1315 = vmatprep.subr.bf16.mxu0 %v3080_v59  ;;  %1358 = vmatprep.subr.bf16.mxu1 %v3101_v63  ;;  %v1136_v59 = vunpack.c.l.bf16 %v3921_v58  ;;  %v1140_v26 = vunpack.c.h.bf16 %v3921_v58 }
 0x289   :  { %1316 = vmatpush1.bf16.msra.mxu0 %v3096_v62  ;;  %1359 = vmatpush1.bf16.msra.mxu1 %v3113_v2  ;;  %v1137_v2 = vunpack.c.h.bf16 %v3918_v49 }
 0x28a   :  { %1317 = vmatprep.subr.bf16.mxu0 %v3108_v0  ;;  %1360 = vmatprep.subr.bf16.mxu1 %v3118_v3  ;;  %v1139_v3 = vunpack.c.h.bf16 %v3919_v51 }
 0x28d   :  { %1318 = vmatpush1.bf16.msra.mxu0 %v3127_v4  ;;  %1361 = vmatpush1.bf16.msra.mxu1 %v3134_v5 }
 0x28e   :  { %1465 = vmatprep.subr.bf16.mxu0 %v3495_v47  ;;  %1508 = vmatprep.subr.bf16.mxu1 %v3501_v48 }
 0x343   :  { %v1175_v54 = vpop.f32.mrb[40].mxu0  ;;  %v1218_v55 = vpop.f32.mrb[40].mxu1 }
 0x344   :  { %v1227_v60 = vadd.f32 %v1175_v54, %v1133_v50  ;;  %v1229_v62 = vadd.f32 %v1218_v55, %v1135_v53  ;;  %v1177_v63 = vpop.f32.mrb[41].mxu0  ;;  %v1220_v0 = vpop.f32.mrb[41].mxu1 }
 0x345   :  { %v1228_v4 = vadd.f32 %v1177_v63, %v1134_v57  ;;  %v1230_v5 = vadd.f32 %v1220_v0, %v1136_v59  ;;  %v1179_v28 = vpop.f32.mrb[42].mxu0  ;;  %v1222_v12 = vpop.f32.mrb[42].mxu1 }
 0x346   :  { %v2304_v15 = vmul.f32 -1.442695, %v1227_v60  ;;  %v1231_v17 = vadd.f32 %v1179_v28, %v1137_v2  ;;  %v1233_v36 = vadd.f32 %v1222_v12, %v1139_v3  ;;  %v1181_v37 = vpop.f32.mrb[43].mxu0  ;;  %v1224_v38 = vpop.f32.mrb[43].mxu1  ;;  %v3541_v28 = vld [vmem:[%s3863_s2 + $0x6c] ss:$16 sps:$4 sm:$0xff]  }
 0x347   :  { %v2306_v39 = vmul.f32 -1.442695, %v1228_v4  ;;  %v1232_v40 = vadd.f32 %v1181_v37, %v1138_v14  ;;  %v1234_v41 = vadd.f32 %v1224_v38, %v1140_v26  ;;  %v2308_v45 = vmul.f32 -1.442695, %v1230_v5  ;;  %v3547_v12 = vld [vmem:[%s3863_s2 + $0x60] ss:$16 sps:$4 sm:$0xff]  }
 0x348   :  { %2557 = vpow2.f32 %v2304_v15  ;;  %v2305_v42 = vmul.f32 -1.442695, %v1231_v17  ;;  %v3553_v14 = vld [vmem:[%s3863_s2 + $0x68] ss:$16 sps:$4 sm:$0xff]   ;;  %v3559_v26 = vld [vmem:[%s3863_s2 + $0x84] ss:$16 sps:$4 sm:$0xff]  }
 0x349   :  { %2559 = vpow2.f32 %v2306_v39  ;;  %v2307_v44 = vmul.f32 -1.442695, %v1232_v40  ;;  %v2309_v29 = vmul.f32 -1.442695, %v1234_v41  ;;  %v3565_v15 = vld [vmem:[%s3863_s2 + $0x8c] ss:$16 sps:$4 sm:$0xff]  }
 0x34a   :  { %2561 = vpow2.f32 %v2305_v42  ;;  %v3571_v17 = vld [vmem:[%s3863_s2 + $0x80] ss:$16 sps:$4 sm:$0xff]   ;;  %v3583_v37 = vld [vmem:[%s3863_s2 + $0xa4] ss:$16 sps:$4 sm:$0xff]   ;;  %v3589_v38 = vld [vmem:[%s3863_s2 + $0xac] ss:$16 sps:$4 sm:$0xff]  }
 0x34b   :  { %2563 = vpow2.f32 %v2307_v44  ;;  %v3595_v39 = vld [vmem:[%s3863_s2 + $0xa0] ss:$16 sps:$4 sm:$0xff]   ;;  %v3601_v40 = vld [vmem:[%s3863_s2 + $0xa8] ss:$16 sps:$4 sm:$0xff]   ;;  %v3607_v41 = vld [vmem:[%s3863_s2 + $0xc4] ss:$16 sps:$4 sm:$0xff]  }
 0x34c   :  { %2565 = vtanh.f32 %v1229_v62  ;;  %v3613_v42 = vld [vmem:[%s3863_s2 + $0xcc] ss:$16 sps:$4 sm:$0xff]   ;;  %v3619_v44 = vld [vmem:[%s3863_s2 + $0xc0] ss:$16 sps:$4 sm:$0xff]  }
 0x34d   :  { %2567 = vpow2.f32 %v2308_v45  ;;  %v3625_v45 = vld [vmem:[%s3863_s2 + $0xc8] ss:$16 sps:$4 sm:$0xff]  }
 0x34e   :  { %2569 = vtanh.f32 %v1233_v36  ;;  %v3577_v36 = vld [vmem:[%s3863_s2 + $0x88] ss:$16 sps:$4 sm:$0xff]  }
 0x352   :  { %v2558_v46 = vpop.eup %2557 }
 0x353   :  { %v2560_v31 = vpop.eup %2559  ;;  %v1241_v33 = vadd.f32 1.0, %v2558_v46  ;;  %v3631_v46 = vld [vmem:[%s3863_s2 + $0xe4] ss:$16 sps:$4 sm:$0xff]  }
 0x354   :  { %v1253_v34 = vadd.f32 1.0, %v2560_v31  ;;  %v2562_v21 = vpop.eup %2561  ;;  %v3637_v31 = vld [vmem:[%s3863_s2 + $0xec] ss:$16 sps:$4 sm:$0xff]  }
 0x355   :  { %2571 = vrcp.f32 %v1241_v33  ;;  %v1242_v30 = vadd.f32 1.0, %v2562_v21  ;;  %v2564_v61 = vpop.eup %2563  ;;  %v3643_v33 = vld [vmem:[%s3863_s2 + $0xe0] ss:$16 sps:$4 sm:$0xff]  }
 0x356   :  { %2573 = vrcp.f32 %v1253_v34  ;;  %v1254_v22 = vadd.f32 1.0, %v2564_v61  ;;  %v2566_v13 = vpop.eup %2565  ;;  %v3922_v34 = vld [vmem:[#allocation10_spill] sm:$0xff] }
 0x357   :  { %2575 = vpow2.f32 %v2309_v29  ;;  %v2568_v16 = vpop.eup %2567  ;;  %v3649_v29 = vld [vmem:[%s3863_s2 + $0xe8] ss:$16 sps:$4 sm:$0xff]   ;;  %v1295_v21 = vunpack.c.l.bf16 %v3922_v34 }
 0x358   :  { %2577 = vrcp.f32 %v1242_v30  ;;  %v2570_v8 = vpop.eup %2569  ;;  %v1267_v55 = vadd.f32 1.0, %v2568_v16  ;;  %v3923_v30 = vld [vmem:[#allocation11_spill] sm:$0xff]  ;;  %v3924_v16 = vld [vmem:[#allocation12_spill] sm:$0xff] }
 0x359   :  { %2579 = vrcp.f32 %v1254_v22  ;;  %v1297_v61 = vunpack.c.l.bf16 %v3923_v30 }
 0x35a   :  { %2581 = vrcp.f32 %v1267_v55  ;;  %v1299_v55 = vunpack.c.h.bf16 %v3922_v34 }
 0x35f   :  { %v2572_v23 = vpop.eup %2571 }
 0x360   :  { %v2574_v49 = vpop.eup %2573  ;;  %v1275_v50 = vmul.f32 %v2572_v23, %v2566_v13  ;;  %v3925_v23 = vld [vmem:[#allocation13_spill] sm:$0xff] }
 0x361   :  { %v2576_v51 = vpop.eup %2575  ;;  %v1273_v53 = vmul.f32 %v2574_v49, %v3403_v19  ;;  %v1298_v49 = vunpack.c.l.bf16 %v3925_v23 }
 0x362   :  { %v2578_v54 = vpop.eup %2577  ;;  %v1268_v59 = vadd.f32 1.0, %v2576_v51 }
 0x363   :  { %v3513_v56 = vadd.f32 %v1275_v50, %v1273_v53  ;;  %v1276_v57 = vmul.f32 %v2578_v54, %v2570_v8  ;;  %v2580_v58 = vpop.eup %2579  ;;  %v1296_v8 = vunpack.c.l.bf16 %v3924_v16 }
 0x364   :  { %v1274_v60 = vmul.f32 %v2580_v58, %v3407_v18  ;;  %v2582_v63 = vpop.eup %2581  ;;  %v3534_v18 = vld [vmem:[%s3863_s2 + $0x48] ss:$16 sps:$4 sm:$0xff]  }
 0x365   :  { %2583 = vtanh.f32 %v3513_v56 }
 0x366   :  { %v3517_v62 = vadd.f32 %v1276_v57, %v1274_v60  ;;  %2585 = vrcp.f32 %v1268_v59  ;;  %v1301_v57 = vunpack.c.h.bf16 %v3923_v30 }
 0x368   :  { %2587 = vtanh.f32 %v3517_v62 }
 0x36f   :  { %v2584_v0 = vpop.eup %2583 }
 0x370   :  { %v2586_v19 = vpop.eup %2585  ;;  %v1281_v3 = vmul.f32 %v2584_v0, %v2582_v63  ;;  %v1300_v0 = vunpack.c.h.bf16 %v3924_v16 }
 0x372   :  { %v2588_v2 = vpop.eup %2587 }
 0x373   :  { %v1282_v4 = vmul.f32 %v2588_v2, %v2586_v19  ;;  %v1302_v19 = vunpack.c.h.bf16 %v3925_v23 }
 0x375   :  { %v1283_v5 = vpack.c.bf16 %v1282_v4, %v1281_v3 }
 0x377   :  { %1336 = vmatmul.mubr.bf16.vlgmr.msra.gmra.mrb[44].mxu0 %v1283_v5  ;;  %1379 = vmatmul.mubr.bf16.vlgmr.msra.gmra.mrb[44].mxu1 %v1283_v5 }
 0x378   :  { %1466 = vmatpush1.bf16.msra.mxu0 %v3413_v24  ;;  %1509 = vmatpush1.bf16.msra.mxu1 %v3419_v1 }
 0x379   :  { %1467 = vmatprep.subr.bf16.mxu0 %v3425_v27  ;;  %1510 = vmatprep.subr.bf16.mxu1 %v3431_v9 }
 0x37a   :  { %1497 = vmatprep.mubr.bf16.mxu0 %v3916_v6  ;;  %1540 = vmatprep.mubr.bf16.mxu1 %v3916_v6 }
 0x37c   :  { %1468 = vmatpush1.bf16.msra.mxu0 %v3439_v10  ;;  %1511 = vmatpush1.bf16.msra.mxu1 %v3445_v35 }
 0x37d   :  { %1469 = vmatprep.subr.bf16.mxu0 %v3451_v43  ;;  %1512 = vmatprep.subr.bf16.mxu1 %v3457_v20 }
 0x380   :  { %1470 = vmatpush1.bf16.msra.mxu0 %v3463_v11  ;;  %1513 = vmatpush1.bf16.msra.mxu1 %v3534_v18 }
 0x381   :  { %1471 = vmatprep.subr.bf16.mxu0 %v3470_v52  ;;  %1514 = vmatprep.subr.bf16.mxu1 %v3541_v28 }
 0x384   :  { %1472 = vmatpush1.bf16.msra.mxu0 %v3547_v12  ;;  %1515 = vmatpush1.bf16.msra.mxu1 %v3553_v14 }
 0x385   :  { %1473 = vmatprep.subr.bf16.mxu0 %v3559_v26  ;;  %1516 = vmatprep.subr.bf16.mxu1 %v3565_v15 }
 0x388   :  { %1474 = vmatpush1.bf16.msra.mxu0 %v3571_v17  ;;  %1517 = vmatpush1.bf16.msra.mxu1 %v3577_v36 }
 0x389   :  { %1475 = vmatprep.subr.bf16.mxu0 %v3583_v37  ;;  %1518 = vmatprep.subr.bf16.mxu1 %v3589_v38 }
 0x38c   :  { %1476 = vmatpush1.bf16.msra.mxu0 %v3595_v39  ;;  %1519 = vmatpush1.bf16.msra.mxu1 %v3601_v40 }
 0x38d   :  { %1477 = vmatprep.subr.bf16.mxu0 %v3607_v41  ;;  %1520 = vmatprep.subr.bf16.mxu1 %v3613_v42 }
 0x390   :  { %1478 = vmatpush1.bf16.msra.mxu0 %v3619_v44  ;;  %1521 = vmatpush1.bf16.msra.mxu1 %v3625_v45 }
 0x391   :  { %1479 = vmatprep.subr.bf16.mxu0 %v3631_v46  ;;  %1522 = vmatprep.subr.bf16.mxu1 %v3637_v31 }
 0x394   :  { %1480 = vmatpush1.bf16.msra.mxu0 %v3643_v33  ;;  %1523 = vmatpush1.bf16.msra.mxu1 %v3649_v29 }
 0x395   :  { %1627 = vmatprep.subr.bf16.mxu0 %v3495_v47  ;;  %1670 = vmatprep.subr.bf16.mxu1 %v3501_v48 }
 0x44a   :  { %v1337_v22 = vpop.f32.mrb[44].mxu0  ;;  %v1380_v13 = vpop.f32.mrb[44].mxu1 }
 0x44b   :  { %v1389_v50 = vadd.f32 %v1337_v22, %v1295_v21  ;;  %v1391_v51 = vadd.f32 %v1380_v13, %v1297_v61  ;;  %v1339_v53 = vpop.f32.mrb[45].mxu0  ;;  %v1382_v54 = vpop.f32.mrb[45].mxu1 }
 0x44c   :  { %v1390_v58 = vadd.f32 %v1339_v53, %v1296_v8  ;;  %v1392_v59 = vadd.f32 %v1382_v54, %v1298_v49  ;;  %v1341_v60 = vpop.f32.mrb[46].mxu0  ;;  %v1384_v63 = vpop.f32.mrb[46].mxu1 }
 0x44d   :  { %v2310_v2 = vmul.f32 -1.442695, %v1389_v50  ;;  %v1393_v3 = vadd.f32 %v1341_v60, %v1299_v55  ;;  %v1395_v4 = vadd.f32 %v1384_v63, %v1301_v57  ;;  %v1343_v5 = vpop.f32.mrb[47].mxu0  ;;  %v1386_v21 = vpop.f32.mrb[47].mxu1 }
 0x44e   :  { %v2312_v61 = vmul.f32 -1.442695, %v1390_v58  ;;  %v1394_v22 = vadd.f32 %v1343_v5, %v1300_v0  ;;  %v1396_v13 = vadd.f32 %v1386_v21, %v1302_v19  ;;  %v2314_v8 = vmul.f32 -1.442695, %v1392_v59 }
 0x44f   :  { %2589 = vpow2.f32 %v2310_v2  ;;  %v2311_v34 = vmul.f32 -1.442695, %v1393_v3 }
 0x450   :  { %2591 = vpow2.f32 %v2312_v61  ;;  %v2313_v30 = vmul.f32 -1.442695, %v1394_v22  ;;  %v2315_v23 = vmul.f32 -1.442695, %v1396_v13 }
 0x451   :  { %2593 = vpow2.f32 %v2311_v34 }
 0x452   :  { %2595 = vpow2.f32 %v2313_v30 }
 0x453   :  { %2597 = vtanh.f32 %v1391_v51 }
 0x454   :  { %2599 = vpow2.f32 %v2314_v8 }
 0x455   :  { %2601 = vtanh.f32 %v1395_v4 }
 0x459   :  { %v2590_v49 = vpop.eup %2589 }
 0x45a   :  { %v2592_v16 = vpop.eup %2591  ;;  %v1403_v53 = vadd.f32 1.0, %v2590_v49 }
 0x45b   :  { %v1415_v50 = vadd.f32 1.0, %v2592_v16  ;;  %v2594_v54 = vpop.eup %2593 }
 0x45c   :  { %2603 = vrcp.f32 %v1403_v53  ;;  %v1404_v55 = vadd.f32 1.0, %v2594_v54  ;;  %v2596_v57 = vpop.eup %2595 }
 0x45d   :  { %2605 = vrcp.f32 %v1415_v50  ;;  %v1416_v58 = vadd.f32 1.0, %v2596_v57  ;;  %v2598_v60 = vpop.eup %2597 }
 0x45e   :  { %2607 = vpow2.f32 %v2315_v23  ;;  %v2600_v63 = vpop.eup %2599 }
 0x45f   :  { %2609 = vrcp.f32 %v1404_v55  ;;  %v2602_v59 = vpop.eup %2601  ;;  %v1429_v4 = vadd.f32 1.0, %v2600_v63  ;;  %v3927_v55 = vld [vmem:[#allocation15_spill] sm:$0xff]  ;;  %v3928_v63 = vld [vmem:[#allocation16_spill] sm:$0xff] }
 0x460   :  { %2611 = vrcp.f32 %v1416_v58  ;;  %v1459_v57 = vunpack.c.l.bf16 %v3927_v55 }
 0x461   :  { %2613 = vrcp.f32 %v1429_v4 }
 0x466   :  { %v2604_v0 = vpop.eup %2603 }
 0x467   :  { %v2606_v51 = vpop.eup %2605  ;;  %v1437_v19 = vmul.f32 %v2604_v0, %v2598_v60  ;;  %v3929_v0 = vld [vmem:[#allocation17_spill] sm:$0xff] }
 0x468   :  { %v2608_v2 = vpop.eup %2607  ;;  %v1435_v3 = vmul.f32 %v2606_v51, %v3513_v56  ;;  %v1460_v51 = vunpack.c.l.bf16 %v3929_v0 }
 0x469   :  { %v2610_v5 = vpop.eup %2609  ;;  %v1430_v13 = vadd.f32 1.0, %v2608_v2 }
 0x46a   :  { %v3663_v21 = vadd.f32 %v1437_v19, %v1435_v3  ;;  %v1438_v61 = vmul.f32 %v2610_v5, %v2602_v59  ;;  %v2612_v22 = vpop.eup %2611  ;;  %v1458_v59 = vunpack.c.l.bf16 %v3928_v63 }
 0x46b   :  { %v1436_v34 = vmul.f32 %v2612_v22, %v3517_v62  ;;  %v2614_v8 = vpop.eup %2613  ;;  %v3926_v62 = vld [vmem:[#allocation14_spill] sm:$0xff] }
 0x46c   :  { %2615 = vtanh.f32 %v3663_v21  ;;  %v1457_v54 = vunpack.c.l.bf16 %v3926_v62  ;;  %v1461_v4 = vunpack.c.h.bf16 %v3926_v62 }
 0x46d   :  { %v3667_v30 = vadd.f32 %v1438_v61, %v1436_v34  ;;  %2617 = vrcp.f32 %v1430_v13  ;;  %v1463_v61 = vunpack.c.h.bf16 %v3927_v55 }
 0x46f   :  { %2619 = vtanh.f32 %v3667_v30 }
 0x476   :  { %v2616_v49 = vpop.eup %2615 }
 0x477   :  { %v2618_v56 = vpop.eup %2617  ;;  %v1443_v53 = vmul.f32 %v2616_v49, %v2614_v8  ;;  %v1462_v49 = vunpack.c.h.bf16 %v3928_v63 }
 0x479   :  { %v2620_v16 = vpop.eup %2619 }
 0x47a   :  { %v1444_v23 = vmul.f32 %v2620_v16, %v2618_v56  ;;  %v1464_v56 = vunpack.c.h.bf16 %v3929_v0 }
 0x47c   :  { %v1445_v50 = vpack.c.bf16 %v1444_v23, %v1443_v53 }
 0x47e   :  { %1498 = vmatmul.mubr.bf16.vlgmr.msra.gmra.mrb[48].mxu0 %v1445_v50  ;;  %1541 = vmatmul.mubr.bf16.vlgmr.msra.gmra.mrb[48].mxu1 %v1445_v50 }
 0x47f   :  { %1628 = vmatpush1.bf16.msra.mxu0 %v3413_v24  ;;  %1671 = vmatpush1.bf16.msra.mxu1 %v3419_v1 }
 0x480   :  { %1629 = vmatprep.subr.bf16.mxu0 %v3425_v27  ;;  %1672 = vmatprep.subr.bf16.mxu1 %v3431_v9 }
 0x481   :  { %1659 = vmatprep.mubr.bf16.mxu0 %v3916_v6  ;;  %1702 = vmatprep.mubr.bf16.mxu1 %v3916_v6 }
 0x483   :  { %1630 = vmatpush1.bf16.msra.mxu0 %v3439_v10  ;;  %1673 = vmatpush1.bf16.msra.mxu1 %v3445_v35 }
 0x484   :  { %1631 = vmatprep.subr.bf16.mxu0 %v3451_v43  ;;  %1674 = vmatprep.subr.bf16.mxu1 %v3457_v20 }
 0x487   :  { %1632 = vmatpush1.bf16.msra.mxu0 %v3463_v11  ;;  %1675 = vmatpush1.bf16.msra.mxu1 %v3534_v18 }
 0x488   :  { %1633 = vmatprep.subr.bf16.mxu0 %v3470_v52  ;;  %1676 = vmatprep.subr.bf16.mxu1 %v3541_v28 }
 0x48b   :  { %1634 = vmatpush1.bf16.msra.mxu0 %v3547_v12  ;;  %1677 = vmatpush1.bf16.msra.mxu1 %v3553_v14 }
 0x48c   :  { %1635 = vmatprep.subr.bf16.mxu0 %v3559_v26  ;;  %1678 = vmatprep.subr.bf16.mxu1 %v3565_v15 }
 0x48f   :  { %1636 = vmatpush1.bf16.msra.mxu0 %v3571_v17  ;;  %1679 = vmatpush1.bf16.msra.mxu1 %v3577_v36 }
 0x490   :  { %1637 = vmatprep.subr.bf16.mxu0 %v3583_v37  ;;  %1680 = vmatprep.subr.bf16.mxu1 %v3589_v38 }
 0x493   :  { %1638 = vmatpush1.bf16.msra.mxu0 %v3595_v39  ;;  %1681 = vmatpush1.bf16.msra.mxu1 %v3601_v40 }
 0x494   :  { %1639 = vmatprep.subr.bf16.mxu0 %v3607_v41  ;;  %1682 = vmatprep.subr.bf16.mxu1 %v3613_v42 }
 0x497   :  { %1640 = vmatpush1.bf16.msra.mxu0 %v3619_v44  ;;  %1683 = vmatpush1.bf16.msra.mxu1 %v3625_v45 }
 0x498   :  { %1641 = vmatprep.subr.bf16.mxu0 %v3631_v46  ;;  %1684 = vmatprep.subr.bf16.mxu1 %v3637_v31 }
 0x49b   :  { %1642 = vmatpush1.bf16.msra.mxu0 %v3643_v33  ;;  %1685 = vmatpush1.bf16.msra.mxu1 %v3649_v29 }
 0x49c   :  { %1789 = vmatprep.subr.bf16.mxu0 %v3495_v47  ;;  %1832 = vmatprep.subr.bf16.mxu1 %v3501_v48 }
 0x551   :  { %v1499_v58 = vpop.f32.mrb[48].mxu0  ;;  %v1542_v60 = vpop.f32.mrb[48].mxu1 }
 0x552   :  { %v1551_v19 = vadd.f32 %v1499_v58, %v1457_v54  ;;  %v1553_v2 = vadd.f32 %v1542_v60, %v1459_v57  ;;  %v1501_v3 = vpop.f32.mrb[49].mxu0  ;;  %v1544_v5 = vpop.f32.mrb[49].mxu1 }
 0x553   :  { %v1552_v22 = vadd.f32 %v1501_v3, %v1458_v59  ;;  %v1554_v13 = vadd.f32 %v1544_v5, %v1460_v51  ;;  %v1503_v34 = vpop.f32.mrb[50].mxu0  ;;  %v1546_v8 = vpop.f32.mrb[50].mxu1 }
 0x554   :  { %v2316_v16 = vmul.f32 -1.442695, %v1551_v19  ;;  %v1555_v53 = vadd.f32 %v1503_v34, %v1461_v4  ;;  %v1557_v23 = vadd.f32 %v1546_v8, %v1463_v61  ;;  %v1505_v50 = vpop.f32.mrb[51].mxu0  ;;  %v1548_v54 = vpop.f32.mrb[51].mxu1 }
 0x555   :  { %v2318_v57 = vmul.f32 -1.442695, %v1552_v22  ;;  %v1556_v58 = vadd.f32 %v1505_v50, %v1462_v49  ;;  %v1558_v60 = vadd.f32 %v1548_v54, %v1464_v56  ;;  %v2320_v59 = vmul.f32 -1.442695, %v1554_v13 }
 0x556   :  { %2621 = vpow2.f32 %v2316_v16  ;;  %v2317_v62 = vmul.f32 -1.442695, %v1555_v53 }
 0x557   :  { %2623 = vpow2.f32 %v2318_v57  ;;  %v2319_v55 = vmul.f32 -1.442695, %v1556_v58  ;;  %v2321_v0 = vmul.f32 -1.442695, %v1558_v60 }
 0x558   :  { %2625 = vpow2.f32 %v2317_v62 }
 0x559   :  { %2627 = vpow2.f32 %v2319_v55 }
 0x55a   :  { %2629 = vtanh.f32 %v1553_v2 }
 0x55b   :  { %2631 = vpow2.f32 %v2320_v59 }
 0x55c   :  { %2633 = vtanh.f32 %v1557_v23 }
 0x560   :  { %v2622_v51 = vpop.eup %2621 }
 0x561   :  { %v2624_v63 = vpop.eup %2623  ;;  %v1565_v3 = vadd.f32 1.0, %v2622_v51 }
 0x562   :  { %v1577_v19 = vadd.f32 1.0, %v2624_v63  ;;  %v2626_v5 = vpop.eup %2625 }
 0x563   :  { %2635 = vrcp.f32 %v1565_v3  ;;  %v1566_v4 = vadd.f32 1.0, %v2626_v5  ;;  %v2628_v61 = vpop.eup %2627 }
 0x564   :  { %2637 = vrcp.f32 %v1577_v19  ;;  %v1578_v22 = vadd.f32 1.0, %v2628_v61  ;;  %v2630_v34 = vpop.eup %2629 }
 0x565   :  { %2639 = vpow2.f32 %v2321_v0  ;;  %v2632_v8 = vpop.eup %2631 }
 0x566   :  { %2641 = vrcp.f32 %v1566_v4  ;;  %v2634_v13 = vpop.eup %2633  ;;  %v1591_v23 = vadd.f32 1.0, %v2632_v8  ;;  %v3931_v4 = vld [vmem:[#allocation19_spill] sm:$0xff]  ;;  %v3932_v8 = vld [vmem:[#allocation20_spill] sm:$0xff] }
 0x567   :  { %2643 = vrcp.f32 %v1578_v22  ;;  %v1621_v61 = vunpack.c.l.bf16 %v3931_v4 }
 0x568   :  { %2645 = vrcp.f32 %v1591_v23 }
 0x56d   :  { %v2636_v49 = vpop.eup %2635 }
 0x56e   :  { %v2638_v2 = vpop.eup %2637  ;;  %v1599_v56 = vmul.f32 %v2636_v49, %v2630_v34  ;;  %v3933_v49 = vld [vmem:[#allocation21_spill] sm:$0xff] }
 0x56f   :  { %v2640_v16 = vpop.eup %2639  ;;  %v1597_v53 = vmul.f32 %v2638_v2, %v3663_v21  ;;  %v1622_v2 = vunpack.c.l.bf16 %v3933_v49 }
 0x570   :  { %v2642_v50 = vpop.eup %2641  ;;  %v1592_v60 = vadd.f32 1.0, %v2640_v16 }
 0x571   :  { %v3713_v54 = vadd.f32 %v1599_v56, %v1597_v53  ;;  %v1600_v57 = vmul.f32 %v2642_v50, %v2634_v13  ;;  %v2644_v58 = vpop.eup %2643  ;;  %v1620_v13 = vunpack.c.l.bf16 %v3932_v8 }
 0x572   :  { %v1598_v62 = vmul.f32 %v2644_v58, %v3667_v30  ;;  %v2646_v59 = vpop.eup %2645  ;;  %v3930_v30 = vld [vmem:[#allocation18_spill] sm:$0xff] }
 0x573   :  { %2647 = vtanh.f32 %v3713_v54  ;;  %v1619_v5 = vunpack.c.l.bf16 %v3930_v30  ;;  %v1623_v23 = vunpack.c.h.bf16 %v3930_v30 }
 0x574   :  { %v3717_v55 = vadd.f32 %v1600_v57, %v1598_v62  ;;  %2649 = vrcp.f32 %v1592_v60  ;;  %v1624_v62 = vunpack.c.h.bf16 %v3932_v8 }
 0x576   :  { %2651 = vtanh.f32 %v3717_v55 }
 0x57d   :  { %v2648_v51 = vpop.eup %2647 }
 0x57e   :  { %v2650_v21 = vpop.eup %2649  ;;  %v1605_v3 = vmul.f32 %v2648_v51, %v2646_v59  ;;  %v1626_v59 = vunpack.c.h.bf16 %v3933_v49 }
 0x580   :  { %v2652_v63 = vpop.eup %2651 }
 0x581   :  { %v1606_v0 = vmul.f32 %v2652_v63, %v2650_v21 }
 0x583   :  { %v1607_v19 = vpack.c.bf16 %v1606_v0, %v1605_v3 }
 0x585   :  { %1660 = vmatmul.mubr.bf16.vlgmr.msra.gmra.mrb[52].mxu0 %v1607_v19  ;;  %1703 = vmatmul.mubr.bf16.vlgmr.msra.gmra.mrb[52].mxu1 %v1607_v19 }
 0x586   :  { %1790 = vmatpush1.bf16.msra.mxu0 %v3413_v24  ;;  %1833 = vmatpush1.bf16.msra.mxu1 %v3419_v1 }
 0x587   :  { %1791 = vmatprep.subr.bf16.mxu0 %v3425_v27  ;;  %1834 = vmatprep.subr.bf16.mxu1 %v3431_v9 }
 0x588   :  { %1821 = vmatprep.mubr.bf16.mxu0 %v3916_v6  ;;  %1864 = vmatprep.mubr.bf16.mxu1 %v3916_v6 }
 0x58a   :  { %1792 = vmatpush1.bf16.msra.mxu0 %v3439_v10  ;;  %1835 = vmatpush1.bf16.msra.mxu1 %v3445_v35 }
 0x58b   :  { %1793 = vmatprep.subr.bf16.mxu0 %v3451_v43  ;;  %1836 = vmatprep.subr.bf16.mxu1 %v3457_v20 }
 0x58e   :  { %1794 = vmatpush1.bf16.msra.mxu0 %v3463_v11  ;;  %1837 = vmatpush1.bf16.msra.mxu1 %v3534_v18 }
 0x58f   :  { %1795 = vmatprep.subr.bf16.mxu0 %v3470_v52  ;;  %1838 = vmatprep.subr.bf16.mxu1 %v3541_v28 }
 0x592   :  { %1796 = vmatpush1.bf16.msra.mxu0 %v3547_v12  ;;  %1839 = vmatpush1.bf16.msra.mxu1 %v3553_v14 }
 0x593   :  { %1797 = vmatprep.subr.bf16.mxu0 %v3559_v26  ;;  %1840 = vmatprep.subr.bf16.mxu1 %v3565_v15 }
 0x596   :  { %1798 = vmatpush1.bf16.msra.mxu0 %v3571_v17  ;;  %1841 = vmatpush1.bf16.msra.mxu1 %v3577_v36 }
 0x597   :  { %1799 = vmatprep.subr.bf16.mxu0 %v3583_v37  ;;  %1842 = vmatprep.subr.bf16.mxu1 %v3589_v38 }
 0x59a   :  { %1800 = vmatpush1.bf16.msra.mxu0 %v3595_v39  ;;  %1843 = vmatpush1.bf16.msra.mxu1 %v3601_v40 }
 0x59b   :  { %1801 = vmatprep.subr.bf16.mxu0 %v3607_v41  ;;  %1844 = vmatprep.subr.bf16.mxu1 %v3613_v42 }
 0x59e   :  { %1802 = vmatpush1.bf16.msra.mxu0 %v3619_v44  ;;  %1845 = vmatpush1.bf16.msra.mxu1 %v3625_v45 }
 0x59f   :  { %1803 = vmatprep.subr.bf16.mxu0 %v3631_v46  ;;  %1846 = vmatprep.subr.bf16.mxu1 %v3637_v31 }
 0x5a2   :  { %1804 = vmatpush1.bf16.msra.mxu0 %v3643_v33  ;;  %1847 = vmatpush1.bf16.msra.mxu1 %v3649_v29 }
 0x5a3   :  { %1951 = vmatprep.subr.bf16.mxu0 %v3495_v47  ;;  %1994 = vmatprep.subr.bf16.mxu1 %v3501_v48  ;;  %v1625_v47 = vunpack.c.h.bf16 %v3931_v4 }
 0x658   :  { %v1661_v22 = vpop.f32.mrb[52].mxu0  ;;  %v1704_v34 = vpop.f32.mrb[52].mxu1 }
 0x659   :  { %v1713_v56 = vadd.f32 %v1661_v22, %v1619_v5  ;;  %v1715_v16 = vadd.f32 %v1704_v34, %v1621_v61  ;;  %v1663_v53 = vpop.f32.mrb[53].mxu0  ;;  %v1706_v50 = vpop.f32.mrb[53].mxu1 }
 0x65a   :  { %v1714_v57 = vadd.f32 %v1663_v53, %v1620_v13  ;;  %v1716_v48 = vadd.f32 %v1706_v50, %v1622_v2  ;;  %v1665_v58 = vpop.f32.mrb[54].mxu0  ;;  %v1708_v60 = vpop.f32.mrb[54].mxu1 }
 0x65b   :  { %v2322_v51 = vmul.f32 -1.442695, %v1713_v56  ;;  %v1717_v21 = vadd.f32 %v1665_v58, %v1623_v23  ;;  %v1719_v63 = vadd.f32 %v1708_v60, %v1625_v47  ;;  %v1667_v3 = vpop.f32.mrb[55].mxu0  ;;  %v1710_v0 = vpop.f32.mrb[55].mxu1 }
 0x65c   :  { %v2324_v19 = vmul.f32 -1.442695, %v1714_v57  ;;  %v1718_v5 = vadd.f32 %v1667_v3, %v1624_v62  ;;  %v1720_v61 = vadd.f32 %v1710_v0, %v1626_v59  ;;  %v2326_v22 = vmul.f32 -1.442695, %v1716_v48 }
 0x65d   :  { %2653 = vpow2.f32 %v2322_v51  ;;  %v2323_v30 = vmul.f32 -1.442695, %v1717_v21 }
 0x65e   :  { %2655 = vpow2.f32 %v2324_v19  ;;  %v2325_v4 = vmul.f32 -1.442695, %v1718_v5  ;;  %v2327_v49 = vmul.f32 -1.442695, %v1720_v61 }
 0x65f   :  { %2657 = vpow2.f32 %v2323_v30 }
 0x660   :  { %2659 = vpow2.f32 %v2325_v4 }
 0x661   :  { %2661 = vtanh.f32 %v1715_v16 }
 0x662   :  { %2663 = vpow2.f32 %v2326_v22 }
 0x663   :  { %2665 = vtanh.f32 %v1719_v63 }
 0x667   :  { %v2654_v34 = vpop.eup %2653 }
 0x668   :  { %v2656_v8 = vpop.eup %2655  ;;  %v1727_v13 = vadd.f32 1.0, %v2654_v34 }
 0x669   :  { %v1739_v2 = vadd.f32 1.0, %v2656_v8  ;;  %v2658_v56 = vpop.eup %2657 }
 0x66a   :  { %2667 = vrcp.f32 %v1727_v13  ;;  %v1728_v53 = vadd.f32 1.0, %v2658_v56  ;;  %v2660_v50 = vpop.eup %2659 }
 0x66b   :  { %2669 = vrcp.f32 %v1739_v2  ;;  %v1740_v23 = vadd.f32 1.0, %v2660_v50  ;;  %v2662_v47 = vpop.eup %2661 }
 0x66c   :  { %2671 = vpow2.f32 %v2327_v49  ;;  %v2664_v57 = vpop.eup %2663 }
 0x66d   :  { %2673 = vrcp.f32 %v1728_v53  ;;  %v2666_v48 = vpop.eup %2665  ;;  %v1753_v21 = vadd.f32 1.0, %v2664_v57 }
 0x66e   :  { %2675 = vrcp.f32 %v1740_v23 }
 0x66f   :  { %2677 = vrcp.f32 %v1753_v21 }
 0x674   :  { %v2668_v58 = vpop.eup %2667 }
 0x675   :  { %v2670_v16 = vpop.eup %2669  ;;  %v1761_v60 = vmul.f32 %v2668_v58, %v2662_v47 }
 0x676   :  { %v2672_v62 = vpop.eup %2671  ;;  %v1759_v59 = vmul.f32 %v2670_v16, %v3713_v54 }
 0x677   :  { %v2674_v51 = vpop.eup %2673  ;;  %v1754_v19 = vadd.f32 1.0, %v2672_v62 }
 0x678   :  { %v3763_v63 = vadd.f32 %v1761_v60, %v1759_v59  ;;  %v1762_v3 = vmul.f32 %v2674_v51, %v2666_v48  ;;  %v2676_v0 = vpop.eup %2675 }
 0x679   :  { %v1760_v5 = vmul.f32 %v2676_v0, %v3717_v55  ;;  %v2678_v30 = vpop.eup %2677 }
 0x67a   :  { %2679 = vtanh.f32 %v3763_v63 }
 0x67b   :  { %v3767_v61 = vadd.f32 %v1762_v3, %v1760_v5  ;;  %2681 = vrcp.f32 %v1754_v19 }
 0x67d   :  { %2683 = vtanh.f32 %v3767_v61 }
 0x684   :  { %v2680_v4 = vpop.eup %2679 }
 0x685   :  { %v2682_v54 = vpop.eup %2681  ;;  %v1767_v34 = vmul.f32 %v2680_v4, %v2678_v30 }
 0x687   :  { %v2684_v22 = vpop.eup %2683 }
 0x688   :  { %v1768_v8 = vmul.f32 %v2684_v22, %v2682_v54 }
 0x68a   :  { %v1769_v13 = vpack.c.bf16 %v1768_v8, %v1767_v34 }
 0x68c   :  { %1822 = vmatmul.mubr.bf16.vlgmr.msra.gmra.mrb[56].mxu0 %v1769_v13  ;;  %1865 = vmatmul.mubr.bf16.vlgmr.msra.gmra.mrb[56].mxu1 %v1769_v13  ;;  %v2782_v13 = vmov 0.0  }
 0x68d   :  { %1952 = vmatpush1.bf16.msra.mxu0 %v3413_v24  ;;  %1995 = vmatpush1.bf16.msra.mxu1 %v3419_v1  ;;  %v1783_v24 = vunpack.c.l.bf16 %v3318_v32 }
 0x68e   :  { %1953 = vmatprep.subr.bf16.mxu0 %v3425_v27  ;;  %1996 = vmatprep.subr.bf16.mxu1 %v3431_v9  ;;  %v1782_v9 = vunpack.c.l.bf16 %v3320_v7 }
 0x68f   :  { %1983 = vmatprep.mubr.bf16.mxu0 %v3916_v6  ;;  %2026 = vmatprep.mubr.bf16.mxu1 %v3916_v6  ;;  %v1781_v6 = vunpack.c.l.bf16 %v3316_v25 }
 0x691   :  { %1954 = vmatpush1.bf16.msra.mxu0 %v3439_v10  ;;  %1997 = vmatpush1.bf16.msra.mxu1 %v3445_v35  ;;  %v3934_v10 = vld [vmem:[#allocation22_spill] sm:$0xff] }
 0x692   :  { %1955 = vmatprep.subr.bf16.mxu0 %v3451_v43  ;;  %1998 = vmatprep.subr.bf16.mxu1 %v3457_v20  ;;  %v1784_v35 = vunpack.c.l.bf16 %v3934_v10 }
 0x695   :  { %1956 = vmatpush1.bf16.msra.mxu0 %v3463_v11  ;;  %1999 = vmatpush1.bf16.msra.mxu1 %v3534_v18  ;;  %v1785_v18 = vunpack.c.h.bf16 %v3316_v25 }
 0x696   :  { %1957 = vmatprep.subr.bf16.mxu0 %v3470_v52  ;;  %2000 = vmatprep.subr.bf16.mxu1 %v3541_v28  ;;  %v1787_v28 = vunpack.c.h.bf16 %v3318_v32 }
 0x699   :  { %1958 = vmatpush1.bf16.msra.mxu0 %v3547_v12  ;;  %2001 = vmatpush1.bf16.msra.mxu1 %v3553_v14 }
 0x69a   :  { %1959 = vmatprep.subr.bf16.mxu0 %v3559_v26  ;;  %2002 = vmatprep.subr.bf16.mxu1 %v3565_v15 }
 0x69d   :  { %1960 = vmatpush1.bf16.msra.mxu0 %v3571_v17  ;;  %2003 = vmatpush1.bf16.msra.mxu1 %v3577_v36  ;;  %v1786_v17 = vunpack.c.h.bf16 %v3320_v7  ;;  %v1788_v36 = vunpack.c.h.bf16 %v3934_v10  ;;  %v2491_v10 = vld [vmem:[%s3867_s6 + $0x30] sm:$0xff]  }
 0x69e   :  { %1961 = vmatprep.subr.bf16.mxu0 %v3583_v37  ;;  %2004 = vmatprep.subr.bf16.mxu1 %v3589_v38 }
 0x6a1   :  { %1962 = vmatpush1.bf16.msra.mxu0 %v3595_v39  ;;  %2005 = vmatpush1.bf16.msra.mxu1 %v3601_v40 }
 0x6a2   :  { %1963 = vmatprep.subr.bf16.mxu0 %v3607_v41  ;;  %2006 = vmatprep.subr.bf16.mxu1 %v3613_v42 }
 0x6a5   :  { %1964 = vmatpush1.bf16.msra.mxu0 %v3619_v44  ;;  %2007 = vmatpush1.bf16.msra.mxu1 %v3625_v45 }
 0x6a6   :  { %1965 = vmatprep.subr.bf16.mxu0 %v3631_v46  ;;  %2008 = vmatprep.subr.bf16.mxu1 %v3637_v31 }
 0x6a9   :  { %1966 = vmatpush1.bf16.msra.mxu0 %v3643_v33  ;;  %2009 = vmatpush1.bf16.msra.mxu1 %v3649_v29 }
 0x6aa   :  { %2358 = vmatprep.subr.bf16.mxu0 %v2782_v13 }
 0x75f   :  { %v1823_v1 = vpop.f32.mrb[56].mxu0  ;;  %v1866_v27 = vpop.f32.mrb[56].mxu1 }
 0x760   :  { %v1875_v43 = vadd.f32 %v1823_v1, %v1781_v6  ;;  %v1877_v20 = vadd.f32 %v1866_v27, %v1783_v24  ;;  %v1825_v11 = vpop.f32.mrb[57].mxu0  ;;  %v1868_v52 = vpop.f32.mrb[57].mxu1  ;;  %v2486_v6 = vld [vmem:[%s3867_s6 + $0x8] sm:$0xff]   ;;  %v2487_v24 = vld [vmem:[%s3867_s6 + $0x10] sm:$0xff]   ;;  %v2488_v1 = vld [vmem:[%s3867_s6 + $0x18] sm:$0xff]  }
 0x761   :  { %v1876_v12 = vadd.f32 %v1825_v11, %v1782_v9  ;;  %v1878_v14 = vadd.f32 %v1868_v52, %v1784_v35  ;;  %v1827_v26 = vpop.f32.mrb[58].mxu0  ;;  %v1870_v15 = vpop.f32.mrb[58].mxu1  ;;  %v2489_v27 = vld [vmem:[%s3867_s6 + $0x20] sm:$0xff]   ;;  %v2490_v9 = vld [vmem:[%s3867_s6 + $0x28] sm:$0xff]   ;;  %v2492_v35 = vld [vmem:[%s3867_s6 + $0x38] sm:$0xff]  }
 0x762   :  { %v2328_v37 = vmul.f32 -1.442695, %v1875_v43  ;;  %v1879_v38 = vadd.f32 %v1827_v26, %v1785_v18  ;;  %v1881_v39 = vadd.f32 %v1870_v15, %v1787_v28  ;;  %v1829_v40 = vpop.f32.mrb[59].mxu0  ;;  %v1872_v41 = vpop.f32.mrb[59].mxu1  ;;  %v3935_v43 = vld [vmem:[#allocation23_spill] sm:$0xff]  ;;  %v3936_v11 = vld [vmem:[#allocation24_spill] sm:$0xff] }
 0x763   :  { %v2330_v42 = vmul.f32 -1.442695, %v1876_v12  ;;  %v1880_v44 = vadd.f32 %v1829_v40, %v1786_v17  ;;  %v1882_v45 = vadd.f32 %v1872_v41, %v1788_v36  ;;  %v2332_v46 = vmul.f32 -1.442695, %v1878_v14  ;;  %v3937_v12 = vld [vmem:[#allocation25_spill] sm:$0xff]  ;;  %v3938_v26 = vld [vmem:[#allocation26_spill] sm:$0xff] }
 0x764   :  { %2685 = vpow2.f32 %v2328_v37  ;;  %v2329_v25 = vmul.f32 -1.442695, %v1879_v38  ;;  %v1945_v52 = vunpack.c.l.bf16 %v3936_v11  ;;  %v1944_v14 = vunpack.c.l.bf16 %v3937_v12 }
 0x765   :  { %2687 = vpow2.f32 %v2330_v42  ;;  %v2331_v32 = vmul.f32 -1.442695, %v1880_v44  ;;  %v2333_v29 = vmul.f32 -1.442695, %v1882_v45  ;;  %v1946_v15 = vunpack.c.l.bf16 %v3938_v26 }
 0x766   :  { %2689 = vpow2.f32 %v2329_v25  ;;  %v1949_v40 = vunpack.c.h.bf16 %v3936_v11  ;;  %v1948_v25 = vunpack.c.h.bf16 %v3937_v12 }
 0x767   :  { %2691 = vpow2.f32 %v2331_v32  ;;  %v1950_v32 = vunpack.c.h.bf16 %v3938_v26 }
 0x768   :  { %2693 = vtanh.f32 %v1877_v20  ;;  %v1943_v20 = vunpack.c.l.bf16 %v3935_v43 }
 0x769   :  { %2695 = vpow2.f32 %v2332_v46 }
 0x76a   :  { %2697 = vtanh.f32 %v1881_v39  ;;  %v1947_v39 = vunpack.c.h.bf16 %v3935_v43 }
 0x76e   :  { %v2686_v31 = vpop.eup %2685 }
 0x76f   :  { %v2688_v7 = vpop.eup %2687  ;;  %v1889_v33 = vadd.f32 1.0, %v2686_v31 }
 0x770   :  { %v1901_v55 = vadd.f32 1.0, %v2688_v7  ;;  %v2690_v49 = vpop.eup %2689 }
 0x771   :  { %2699 = vrcp.f32 %v1889_v33  ;;  %v1890_v2 = vadd.f32 1.0, %v2690_v49  ;;  %v2692_v56 = vpop.eup %2691 }
 0x772   :  { %2701 = vrcp.f32 %v1901_v55  ;;  %v1902_v53 = vadd.f32 1.0, %v2692_v56  ;;  %v2694_v50 = vpop.eup %2693 }
 0x773   :  { %2703 = vpow2.f32 %v2333_v29  ;;  %v2696_v23 = vpop.eup %2695 }
 0x774   :  { %2705 = vrcp.f32 %v1890_v2  ;;  %v2698_v47 = vpop.eup %2697  ;;  %v1915_v59 = vadd.f32 1.0, %v2696_v23 }
 0x775   :  { %2707 = vrcp.f32 %v1902_v53 }
 0x776   :  { %2709 = vrcp.f32 %v1915_v59 }
 0x77b   :  { %v2700_v57 = vpop.eup %2699 }
 0x77c   :  { %v2702_v48 = vpop.eup %2701  ;;  %v1923_v58 = vmul.f32 %v2700_v57, %v2694_v50 }
 0x77d   :  { %v2704_v16 = vpop.eup %2703  ;;  %v1921_v60 = vmul.f32 %v2702_v48, %v3763_v63 }
 0x77e   :  { %v2706_v62 = vpop.eup %2705  ;;  %v1916_v0 = vadd.f32 1.0, %v2704_v16 }
 0x77f   :  { %v3811_v51 = vadd.f32 %v1923_v58, %v1921_v60  ;;  %v1924_v21 = vmul.f32 %v2706_v62, %v2698_v47  ;;  %v2708_v3 = vpop.eup %2707 }
 0x780   :  { %v1922_v19 = vmul.f32 %v2708_v3, %v3767_v61  ;;  %v2710_v30 = vpop.eup %2709  ;;  %v2485_v61 = vld [vmem:[%s3867_s6] sm:$0xff]  }
 0x781   :  { %2711 = vtanh.f32 %v3811_v51 }
 0x782   :  { %v3815_v5 = vadd.f32 %v1924_v21, %v1922_v19  ;;  %2713 = vrcp.f32 %v1916_v0 }
 0x784   :  { %2715 = vtanh.f32 %v3815_v5 }
 0x78b   :  { %v2712_v4 = vpop.eup %2711 }
 0x78c   :  { %v2714_v63 = vpop.eup %2713  ;;  %v1929_v22 = vmul.f32 %v2712_v4, %v2710_v30 }
 0x78e   :  { %v2716_v54 = vpop.eup %2715 }
 0x78f   :  { %v1930_v34 = vmul.f32 %v2716_v54, %v2714_v63 }
 0x791   :  { %v1931_v8 = vpack.c.bf16 %v1930_v34, %v1929_v22 }
 0x793   :  { %1984 = vmatmul.mubr.bf16.vlgmr.msra.gmra.mrb[60].mxu0 %v1931_v8  ;;  %2027 = vmatmul.mubr.bf16.vlgmr.msra.gmra.mrb[60].mxu1 %v1931_v8 }
 0x794   :  { %2359 = vmatpush3.bf16.msra.mxu0 %v2485_v61  ;;  %2374 = vmatprep.mubr.msk.bf16.mxu0 %vm2783_vm0, %v2782_v13 }
 0x795   :  { %2360 = vmatprep.subr.bf16.mxu0 %v2782_v13 }
 0x798   :  { %2361 = vmatpush3.bf16.msra.mxu0 %v2486_v6 }
 0x799   :  { %2362 = vmatprep.subr.bf16.mxu0 %v2782_v13 }
 0x79c   :  { %2363 = vmatpush3.bf16.msra.mxu0 %v2487_v24 }
 0x79d   :  { %2364 = vmatprep.subr.bf16.mxu0 %v2782_v13 }
 0x7a0   :  { %2365 = vmatpush3.bf16.msra.mxu0 %v2488_v1 }
 0x7a1   :  { %2366 = vmatprep.subr.bf16.mxu0 %v2782_v13 }
 0x7a4   :  { %2367 = vmatpush3.bf16.msra.mxu0 %v2489_v27 }
 0x7a5   :  { %2368 = vmatprep.subr.bf16.mxu0 %v2782_v13 }
 0x7a8   :  { %2369 = vmatpush3.bf16.msra.mxu0 %v2490_v9 }
 0x7a9   :  { %2370 = vmatprep.subr.bf16.mxu0 %v2782_v13 }
 0x7ac   :  { %2371 = vmatpush3.bf16.msra.mxu0 %v2491_v10 }
 0x7ad   :  { %2372 = vmatprep.subr.bf16.mxu0 %v2782_v13 }
 0x7b0   :  { %2373 = vmatpush3.bf16.msra.mxu0 %v2492_v35 }
 0x866   :  { %v1985_v18 = vpop.f32.mrb[60].mxu0  ;;  %v2028_v28 = vpop.f32.mrb[60].mxu1 }
 0x867   :  { %v2037_v17 = vadd.f32 %v1985_v18, %v1943_v20  ;;  %v2039_v36 = vadd.f32 %v2028_v28, %v1945_v52  ;;  %v1987_v37 = vpop.f32.mrb[61].mxu0  ;;  %v2030_v38 = vpop.f32.mrb[61].mxu1 }
 0x868   :  { %v2038_v41 = vadd.f32 %v1987_v37, %v1944_v14  ;;  %v2040_v42 = vadd.f32 %v2030_v38, %v1946_v15  ;;  %v1989_v44 = vpop.f32.mrb[62].mxu0  ;;  %v2032_v45 = vpop.f32.mrb[62].mxu1 }
 0x869   :  { %v2334_v46 = vmul.f32 -1.442695, %v2037_v17  ;;  %v2041_v31 = vadd.f32 %v1989_v44, %v1947_v39  ;;  %v2043_v7 = vadd.f32 %v2032_v45, %v1949_v40  ;;  %v1991_v33 = vpop.f32.mrb[63].mxu0  ;;  %v2034_v29 = vpop.f32.mrb[63].mxu1 }
 0x86a   :  { %v2336_v55 = vmul.f32 -1.442695, %v2038_v41  ;;  %v2042_v49 = vadd.f32 %v1991_v33, %v1948_v25  ;;  %v2044_v2 = vadd.f32 %v2034_v29, %v1950_v32  ;;  %v2338_v50 = vmul.f32 -1.442695, %v2040_v42 }
 0x86b   :  { %2717 = vpow2.f32 %v2334_v46  ;;  %v2335_v56 = vmul.f32 -1.442695, %v2041_v31 }
 0x86c   :  { %2719 = vpow2.f32 %v2336_v55  ;;  %v2337_v53 = vmul.f32 -1.442695, %v2042_v49  ;;  %v2339_v48 = vmul.f32 -1.442695, %v2044_v2 }
 0x86d   :  { %2721 = vpow2.f32 %v2335_v56 }
 0x86e   :  { %2723 = vpow2.f32 %v2337_v53 }
 0x86f   :  { %2725 = vtanh.f32 %v2039_v36 }
 0x870   :  { %2727 = vpow2.f32 %v2338_v50 }
 0x871   :  { %2729 = vtanh.f32 %v2043_v7 }
 0x875   :  { %v2718_v23 = vpop.eup %2717 }
 0x876   :  { %v2720_v47 = vpop.eup %2719  ;;  %v2051_v57 = vadd.f32 1.0, %v2718_v23 }
 0x877   :  { %v2063_v58 = vadd.f32 1.0, %v2720_v47  ;;  %v2722_v16 = vpop.eup %2721 }
 0x878   :  { %2731 = vrcp.f32 %v2051_v57  ;;  %v2052_v60 = vadd.f32 1.0, %v2722_v16  ;;  %v2724_v62 = vpop.eup %2723 }
 0x879   :  { %2733 = vrcp.f32 %v2063_v58  ;;  %v2064_v59 = vadd.f32 1.0, %v2724_v62  ;;  %v2726_v21 = vpop.eup %2725 }
 0x87a   :  { %2735 = vpow2.f32 %v2339_v48  ;;  %v2728_v3 = vpop.eup %2727 }
 0x87b   :  { %2737 = vrcp.f32 %v2052_v60  ;;  %v2730_v0 = vpop.eup %2729  ;;  %v2077_v63 = vadd.f32 1.0, %v2728_v3 }
 0x87c   :  { %2739 = vrcp.f32 %v2064_v59 }
 0x87d   :  { %2741 = vrcp.f32 %v2077_v63 }
 0x882   :  { %v2732_v19 = vpop.eup %2731 }
 0x883   :  { %v2734_v30 = vpop.eup %2733  ;;  %v2085_v4 = vmul.f32 %v2732_v19, %v2726_v21 }
 0x884   :  { %v2736_v54 = vpop.eup %2735  ;;  %v2083_v22 = vmul.f32 %v2734_v30, %v3811_v51  ;;  %v2340_v51 = vld [vmem:[%s3868_s7] ss:$0 sm:$0xff] }
 0x885   :  { %v2738_v34 = vpop.eup %2737  ;;  %v2078_v6 = vadd.f32 1.0, %v2736_v54 }
 0x886   :  { %v2087_v8 = vadd.f32 %v2085_v4, %v2083_v22  ;;  %v2086_v61 = vmul.f32 %v2738_v34, %v2730_v0  ;;  %v2740_v13 = vpop.eup %2739 }
 0x887   :  { %v2084_v24 = vmul.f32 %v2740_v13, %v3815_v5  ;;  %v2742_v27 = vpop.eup %2741 }
 0x888   :  { %2743 = vtanh.f32 %v2087_v8 }
 0x889   :  { %v2088_v1 = vadd.f32 %v2086_v61, %v2084_v24  ;;  %2745 = vrcp.f32 %v2078_v6 }
 0x88b   :  { %2747 = vtanh.f32 %v2088_v1 }
 0x892   :  { %v2744_v9 = vpop.eup %2743 }
 0x893   :  { %v2091_v10 = vmul.f32 %v2744_v9, %v2742_v27  ;;  %v2746_v35 = vpop.eup %2745 }
 0x895   :  { %v2748_v43 = vpop.eup %2747 }
 0x896   :  { %v2092_v20 = vmul.f32 %v2748_v43, %v2746_v35 }
 0x898   :  { %v2093_v11 = vpack.c.bf16 %v2092_v20, %v2091_v10 }
 0x89a   :  { %2375 = vmatmul.mubr.bf16.vlgmr.msra.gmra.mrb[64].mxu0 %v2093_v11 }
 0x96d   :  { %v2206_v52 = vpop.f32.mrb[64].mxu0 }
 0x96e   :  { %v2207_v18 = vadd.f32 %v2340_v51, %v2206_v52  ;;  %v2376_v28 = vpop.f32.mrb[65].mxu0 }
 0x96f   :  { %v2209_v5 = vpop.f32.mrb[66].mxu0 }
 0x970   :  { %2214 = vst.msk [vmem:[%s3869_s8] sm:$0xff] %vm2213_vm1, %v2207_v18  ;;  %v2210_v12 = vadd.f32 %v2340_v51, %v2209_v5  ;;  %v2377_v14 = vpop.f32.mrb[67].mxu0 }
 0x972   :  { %2215 = vst.msk [vmem:[%s3869_s8 + $0x8] sm:$0xff] %vm2213_vm1, %v2210_v12 }

</bundles_post_ra>
